<compile_context>
chip_gen: v5e
topology: v5e:2x2
jax: 0.10.0
libtpu: 0.0.40
codegen_flags: <defaults>
</compile_context>

<pallas_src>
import jax
import jax.numpy as jnp
from jax.experimental import pallas as pl
from jax.experimental.pallas import tpu as pltpu  # noqa: F401  (TPU backend)


def _ru8(n):
    return ((n + 7) // 8) * 8


# ----------------------------------------------------------------------------
# Fused kernel factory (static-shape closure):
#   GCN (all T) -> 2-layer GRU -> deferred softmax attention -> fc -> +residual
# ----------------------------------------------------------------------------
def _make_kernel(T, M, F, H, O):
    TF, TH, H4 = T * F, T * H, 4 * H
    gcn_b_row = _ru8(TF)
    b1_row, b2_row = 4 * H, 4 * H + 8

    def kernel(x_ref, a_ref, gcn_ref, gru_ref, head_ref, o_ref):
        # ---- GCN for all timesteps: relu(A_hat @ (X @ W_blockdiag) + b) ----
        # x_ref: (M, T*F); gcn_ref rows [0:TF] = block-diagonal W, row
        # gcn_b_row = bias tiled T times.  Result stays a lane-dense (M, T*H)
        # register slab (no VMEM scratch round trip).
        xw = jnp.dot(x_ref[...], gcn_ref[0:TF, :],
                     preferred_element_type=jnp.float32)            # (M, T*H)
        axw = jnp.dot(a_ref[...], xw,
                      preferred_element_type=jnp.float32)           # (M, T*H)
        gcn_b = jnp.broadcast_to(gcn_ref[gcn_b_row:gcn_b_row + 1, :], (M, TH))
        act = jnp.maximum(axw + gcn_b, 0.0)

        # ---- hoisted GRU weights / biases / attention row ----
        wx1 = gru_ref[0:H, :]
        wh1 = gru_ref[H:2 * H, :]
        wx2 = gru_ref[2 * H:3 * H, :]
        wh2 = gru_ref[3 * H:4 * H, :]
        b1 = jnp.broadcast_to(gru_ref[b1_row:b1_row + 1, :], (M, H4))
        b2 = jnp.broadcast_to(gru_ref[b2_row:b2_row + 1, :], (M, H4))
        wa = jnp.broadcast_to(head_ref[0:1, 0:H], (M, H))

        def gru_cell(x, h, wx, wh, b):
            # Gate lane layout [r | z | gi_n | gh_n] (PyTorch order r, z, n).
            # Split x / h matmuls -> no per-step lane concatenate.
            g = (jnp.dot(x, wx, preferred_element_type=jnp.float32)
                 + jnp.dot(h, wh, preferred_element_type=jnp.float32) + b)
            rz = jax.nn.sigmoid(g[:, 0:2 * H])          # one merged EUP push
            r = rz[:, 0:H]
            z = rz[:, H:2 * H]
            n = jnp.tanh(g[:, 2 * H:3 * H] + r * g[:, 3 * H:4 * H])
            return (1.0 - z) * n + z * h

        h1 = jnp.zeros((M, H), jnp.float32)
        h2 = jnp.zeros((M, H), jnp.float32)
        h2_ts = []
        s_ts = []
        for t in range(T):                               # static unroll (T=8)
            x_t = act[:, t * H:(t + 1) * H]
            h1 = gru_cell(x_t, h1, wx1, wh1, b1)
            # TODO(synk): nn.GRU inter-layer dropout (p=0.6) is training-only;
            # this implements the eval forward.
            h2 = gru_cell(h1, h2, wx2, wh2, b2)
            h2_ts.append(h2)
            # attention score: VPU multiply + lane reduce, off the carry chain
            s_ts.append(jnp.sum(h2 * wa, axis=1, keepdims=True))    # (M, 1)

        # ---- deferred (post-loop) softmax over time ----
        # attention bias omitted: softmax over T is invariant to a constant
        # shift, so it has no effect on the output.
        m = s_ts[0]
        for t in range(1, T):
            m = jnp.maximum(m, s_ts[t])
        p_ts = [jnp.exp(s - m) for s in s_ts]
        l = p_ts[0]
        for t in range(1, T):
            l = l + p_ts[t]
        ctx = p_ts[0] * h2_ts[0]
        for t in range(1, T):
            ctx = ctx + p_ts[t] * h2_ts[t]
        ctx = ctx * (1.0 / l)                            # exact normalization

        # ---- fc head (O small): VPU multiply + lane reduce, no 1-lane MXU ---
        cols = []
        for o in range(O):
            r0 = 8 * (1 + o)
            wfc = jnp.broadcast_to(head_ref[r0:r0 + 1, 0:H], (M, H))
            cols.append(jnp.sum(ctx * wfc, axis=1, keepdims=True))
        res = cols[0] if O == 1 else jnp.concatenate(cols, axis=1)   # (M, O)
        rb = 8 * (1 + O)
        res = res + head_ref[rb:rb + 1, 0:O]                         # fc bias

        # ---- fused residual add: last known value = x[:, T-1, :, 0] --------
        last = x_ref[:, (T - 1) * F:(T - 1) * F + 1]                 # (M, 1)
        o_ref[...] = last + res

    return kernel


# ----------------------------------------------------------------------------
# One-time setup (hoisted out of the per-call path)
# ----------------------------------------------------------------------------
def build_normalized_adj(edge_index, num_total):
    src, dst = edge_index[0], edge_index[1]
    a = jnp.zeros((num_total, num_total), jnp.float32)
    a = a.at[dst, src].add(1.0)                       # edge j -> i
    a = a + jnp.eye(num_total, dtype=jnp.float32)     # self loops (GCNConv)
    deg = jnp.sum(a, axis=1)
    dinv = 1.0 / jnp.sqrt(deg)
    return a * dinv[:, None] * dinv[None, :]          # D^-1/2 (A+I) D^-1/2


def _pack_gru_layer(wih, whh, bih, bhh):
    """(in,out) per-gate GRU weights -> split x/h matrices with lane layout
    [r | z | gi_n | gh_n] (PyTorch gate order r, z, n)."""
    H = wih.shape[0]
    z = jnp.zeros((H, H), jnp.float32)
    wx = jnp.concatenate([wih[:, :H], wih[:, H:2 * H], wih[:, 2 * H:], z], axis=1)
    wh = jnp.concatenate([whh[:, :H], whh[:, H:2 * H], z, whh[:, 2 * H:]], axis=1)
    b = jnp.concatenate([bih[:, :H] + bhh[:, :H],
                         bih[:, H:2 * H] + bhh[:, H:2 * H],
                         bih[:, 2 * H:], bhh[:, 2 * H:]], axis=1)      # (1, 4H)
    return wx, wh, b


def pack_parameters(params, T):
    """Pack all weights once per parameter set (constant-folded at setup)."""
    F, H = params["gcn_w"].shape
    O = params["fc_w"].shape[1]
    TF, TH, H4 = T * F, T * H, 4 * H
    assert H <= 128 and O <= 128, "head pack assumes H, O <= 128"

    # GCN: block-diagonal weight => ONE (M,T*F)@(T*F,T*H) matmul in-kernel;
    # tiled bias lives in the trailing 8-aligned row.
    gcn_b_row = _ru8(TF)
    gcn_pack = jnp.zeros((gcn_b_row + 1, TH), jnp.float32)
    for t in range(T):
        gcn_pack = gcn_pack.at[t * F:(t + 1) * F, t * H:(t + 1) * H].set(
            params["gcn_w"])
    gcn_pack = gcn_pack.at[gcn_b_row, :].set(
        jnp.tile(params["gcn_b"].reshape(-1), T))

    # GRU: stacked per-layer x/h gate matrices + 8-aligned bias rows.
    wx1, wh1, b1 = _pack_gru_layer(params["w_ih1"], params["w_hh1"],
                                   params["b_ih1"], params["b_hh1"])
    wx2, wh2, b2 = _pack_gru_layer(params["w_ih2"], params["w_hh2"],
                                   params["b_ih2"], params["b_hh2"])
    gru_pack = jnp.zeros((4 * H + 16, H4), jnp.float32)
    gru_pack = gru_pack.at[0:H].set(wx1).at[H:2 * H].set(wh1)
    gru_pack = gru_pack.at[2 * H:3 * H].set(wx2).at[3 * H:4 * H].set(wh2)
    gru_pack = gru_pack.at[4 * H].set(b1[0]).at[4 * H + 8].set(b2[0])

    # Head: attention row, fc columns, fc bias — each on an 8-aligned row.
    # (attention bias intentionally dropped: softmax over T is shift invariant)
    head_pack = jnp.zeros((8 * (O + 1) + 1, 128), jnp.float32)
    head_pack = head_pack.at[0, :H].set(params["attn_w"].reshape(-1))
    for o in range(O):
        head_pack = head_pack.at[8 * (1 + o), :H].set(params["fc_w"][:, o])
    head_pack = head_pack.at[8 * (1 + O), :O].set(params["fc_b"].reshape(-1))
    return dict(gcn=gcn_pack, gru=gru_pack, head=head_pack)


# ----------------------------------------------------------------------------
# Jitted forward: one transpose/reshape, one gridless pallas_call, one reshape
# ----------------------------------------------------------------------------
@jax.jit
def stgcn_residual_forward(x_seq, a_hat, gcn_pack, gru_pack, head_pack):
    B, T, N, F = x_seq.shape
    M = B * N
    TH = gcn_pack.shape[1]
    H = TH // T
    O = (head_pack.shape[0] - 1) // 8 - 1

    # (B,T,N,F) -> (M, T*F), rows m = b*N + n, columns (t, f)   (PyTorch layout)
    x2d = jnp.transpose(x_seq, (0, 2, 1, 3)).reshape(M, T * F).astype(jnp.float32)

    out = pl.pallas_call(
        _make_kernel(T, M, F, H, O),
        out_shape=jax.ShapeDtypeStruct((M, O), jnp.float32),
    )(x2d, a_hat, gcn_pack, gru_pack, head_pack)
    return out.reshape(B, N, O)


# ----------------------------------------------------------------------------
# Deterministic parameter init (shapes follow the PyTorch module; GRU / Linear
# weights stored pre-transposed to (in, out) form, GRU gate order [r, z, n]).
# ----------------------------------------------------------------------------
def init_params(key, in_channels, hidden, out_channels):
    ks = jax.random.split(key, 14)
    s = 0.1
    rnd = lambda k, shape: jax.random.normal(k, shape, jnp.float32) * s
    return dict(
        gcn_w=rnd(ks[0], (in_channels, hidden)),
        gcn_b=rnd(ks[1], (1, hidden)),
        w_ih1=rnd(ks[2], (hidden, 3 * hidden)),
        w_hh1=rnd(ks[3], (hidden, 3 * hidden)),
        b_ih1=rnd(ks[4], (1, 3 * hidden)),
        b_hh1=rnd(ks[5], (1, 3 * hidden)),
        w_ih2=rnd(ks[6], (hidden, 3 * hidden)),
        w_hh2=rnd(ks[7], (hidden, 3 * hidden)),
        b_ih2=rnd(ks[8], (1, 3 * hidden)),
        b_hh2=rnd(ks[9], (1, 3 * hidden)),
        attn_w=rnd(ks[10], (hidden, 1)),
        attn_b=rnd(ks[11], (1, 1)),
        fc_w=rnd(ks[12], (hidden, out_channels)),
        fc_b=rnd(ks[13], (1, out_channels)),
    )


# Pure-JAX reference (mirrors the PyTorch forward) for a correctness check.
def reference_forward(x_seq, a_hat, p):
    B, T, N, F = x_seq.shape
    H = p["gcn_w"].shape[1]
    M = B * N
    x_tmf = jnp.transpose(x_seq, (1, 0, 2, 3)).reshape(T, M, F)
    gcn = jax.nn.relu(
        jnp.einsum("mn,tnf,fh->tmh", a_hat, x_tmf, p["gcn_w"]) + p["gcn_b"])

    def cell(x, h, wih, whh, bih, bhh):
        gi = x @ wih + bih
        gh = h @ whh + bhh
        r = jax.nn.sigmoid(gi[:, :H] + gh[:, :H])
        z = jax.nn.sigmoid(gi[:, H:2 * H] + gh[:, H:2 * H])
        n = jnp.tanh(gi[:, 2 * H:] + r * gh[:, 2 * H:])
        return (1.0 - z) * n + z * h

    h1 = jnp.zeros((M, H), jnp.float32)
    h2 = jnp.zeros((M, H), jnp.float32)
    outs = []
    for t in range(T):
        h1 = cell(gcn[t], h1, p["w_ih1"], p["w_hh1"], p["b_ih1"], p["b_hh1"])
        h2 = cell(h1, h2, p["w_ih2"], p["w_hh2"], p["b_ih2"], p["b_hh2"])
        outs.append(h2)
    gru_out = jnp.stack(outs, axis=1)                          # (M, T, H)
    scores = gru_out @ p["attn_w"] + p["attn_b"]               # (M, T, 1)
    attn = jax.nn.softmax(scores, axis=1)
    ctx = jnp.sum(attn * gru_out, axis=1)                      # (M, H)
    res = (ctx @ p["fc_w"] + p["fc_b"]).reshape(B, N, -1)
    last = x_seq[:, -1, :, 0][..., None]
    return last + res


if __name__ == "__main__":
    B, T, N, F, H, O = 2, 8, 16, 4, 32, 1
    key = jax.random.PRNGKey(0)
    k_x, k_p = jax.random.split(key)

    x_seq = jax.random.normal(k_x, (B, T, N, F), jnp.float32)
    params = init_params(k_p, F, H, O)

    # Block-diagonal ring graph over the flattened B*N node set (same
    # edge_index semantics the PyTorch forward applies to the flat tensor).
    src, dst = [], []
    for b in range(B):
        off = b * N
        for n in range(N):
            src += [off + n, off + (n + 1) % N]
            dst += [off + (n + 1) % N, off + n]
    edge_index = jnp.array([src, dst], dtype=jnp.int32)

    # One-time setup, hoisted out of the per-call path.
    a_hat = build_normalized_adj(edge_index, B * N)
    packed = pack_parameters(params, T)

    out = stgcn_residual_forward(x_seq, a_hat,
                                 packed["gcn"], packed["gru"], packed["head"])
    out = jax.block_until_ready(out)

    ref = reference_forward(x_seq, a_hat, params)
    assert out.shape == (B, N, O)
    max_err = float(jnp.max(jnp.abs(out - ref)))
    if max_err < 1e-2:
        print("KERNEL_OK")
    else:
        raise SystemExit(f"mismatch vs reference: max_err={max_err}")
</pallas_src>

<mosaic_0001>
module attributes {stable_mosaic.version = 11 : i64} {
  func.func @kernel(%arg0: memref<32x32xf32, #tpu.memory_space<vmem>>, %arg1: memref<32x32xf32, #tpu.memory_space<vmem>>, %arg2: memref<33x256xf32, #tpu.memory_space<vmem>>, %arg3: memref<144x128xf32, #tpu.memory_space<vmem>>, %arg4: memref<17x128xf32, #tpu.memory_space<vmem>>, %arg5: memref<32x1xf32, #tpu.memory_space<vmem>>) attributes {dimension_semantics = [], scalar_prefetch = 0 : i64, scratch_operands = 0 : i64, tpu.core_type = #tpu.core_type<tc>} {
    %c0 = arith.constant 0 : index
    %c0_0 = arith.constant 0 : index
    %0 = vector.load %arg0[%c0, %c0_0] : memref<32x32xf32, #tpu.memory_space<vmem>>, vector<32x32xf32>
    %c0_1 = arith.constant 0 : index
    %c0_2 = arith.constant 0 : index
    %1 = vector.load %arg2[%c0_1, %c0_2] : memref<33x256xf32, #tpu.memory_space<vmem>>, vector<32x256xf32>
    %cst = arith.constant dense<0.000000e+00> : vector<32x256xf32>
    %2 = tpu.matmul %0, %1, %cst {dimension_numbers = #tpu.dot_dimension_numbers<[1], [0], [0], [1], [0, 0, 1, 1], [], []>} : vector<32x32xf32>, vector<32x256xf32>, vector<32x256xf32> -> vector<32x256xf32>
    %c0_3 = arith.constant 0 : index
    %c0_4 = arith.constant 0 : index
    %3 = vector.load %arg1[%c0_3, %c0_4] : memref<32x32xf32, #tpu.memory_space<vmem>>, vector<32x32xf32>
    %cst_5 = arith.constant dense<0.000000e+00> : vector<32x256xf32>
    %4 = tpu.matmul %3, %2, %cst_5 {dimension_numbers = #tpu.dot_dimension_numbers<[1], [0], [0], [1], [0, 0, 1, 1], [], []>} : vector<32x32xf32>, vector<32x256xf32>, vector<32x256xf32> -> vector<32x256xf32>
    %c32 = arith.constant 32 : index
    %c0_6 = arith.constant 0 : index
    %5 = vector.load %arg2[%c32, %c0_6] : memref<33x256xf32, #tpu.memory_space<vmem>>, vector<1x256xf32>
    %6 = vector.shape_cast %5 : vector<1x256xf32> to vector<1x256xf32>
    %7 = vector.broadcast %6 : vector<1x256xf32> to vector<32x256xf32>
    %8 = arith.addf %4, %7 : vector<32x256xf32>
    %cst_7 = arith.constant 0.000000e+00 : f32
    %9 = vector.broadcast %cst_7 : f32 to vector<32x256xf32>
    %10 = arith.maximumf %8, %9 : vector<32x256xf32>
    %c0_8 = arith.constant 0 : index
    %c0_9 = arith.constant 0 : index
    %11 = vector.load %arg3[%c0_8, %c0_9] : memref<144x128xf32, #tpu.memory_space<vmem>>, vector<32x128xf32>
    %c32_10 = arith.constant 32 : index
    %c0_11 = arith.constant 0 : index
    %12 = vector.load %arg3[%c32_10, %c0_11] : memref<144x128xf32, #tpu.memory_space<vmem>>, vector<32x128xf32>
    %c64 = arith.constant 64 : index
    %c0_12 = arith.constant 0 : index
    %13 = vector.load %arg3[%c64, %c0_12] : memref<144x128xf32, #tpu.memory_space<vmem>>, vector<32x128xf32>
    %c96 = arith.constant 96 : index
    %c0_13 = arith.constant 0 : index
    %14 = vector.load %arg3[%c96, %c0_13] : memref<144x128xf32, #tpu.memory_space<vmem>>, vector<32x128xf32>
    %c128 = arith.constant 128 : index
    %c0_14 = arith.constant 0 : index
    %15 = vector.load %arg3[%c128, %c0_14] : memref<144x128xf32, #tpu.memory_space<vmem>>, vector<1x128xf32>
    %16 = vector.shape_cast %15 : vector<1x128xf32> to vector<1x128xf32>
    %17 = vector.broadcast %16 : vector<1x128xf32> to vector<32x128xf32>
    %c136 = arith.constant 136 : index
    %c0_15 = arith.constant 0 : index
    %18 = vector.load %arg3[%c136, %c0_15] : memref<144x128xf32, #tpu.memory_space<vmem>>, vector<1x128xf32>
    %19 = vector.shape_cast %18 : vector<1x128xf32> to vector<1x128xf32>
    %20 = vector.broadcast %19 : vector<1x128xf32> to vector<32x128xf32>
    %c0_16 = arith.constant 0 : index
    %c0_17 = arith.constant 0 : index
    %21 = vector.load %arg4[%c0_16, %c0_17] : memref<17x128xf32, #tpu.memory_space<vmem>>, vector<1x32xf32>
    %22 = vector.shape_cast %21 : vector<1x32xf32> to vector<1x32xf32>
    %23 = vector.broadcast %22 : vector<1x32xf32> to vector<32x32xf32>
    %cst_18 = arith.constant 0.000000e+00 : f32
    %24 = vector.broadcast %cst_18 : f32 to vector<32x32xf32>
    %cst_19 = arith.constant 0.000000e+00 : f32
    %25 = vector.broadcast %cst_19 : f32 to vector<32x32xf32>
    %26 = vector.extract_strided_slice %10 {offsets = [0, 0], sizes = [32, 32], strides = [1, 1]} : vector<32x256xf32> to vector<32x32xf32>
    %cst_20 = arith.constant dense<0.000000e+00> : vector<32x128xf32>
    %27 = tpu.matmul %26, %11, %cst_20 {dimension_numbers = #tpu.dot_dimension_numbers<[1], [0], [0], [1], [0, 0, 1, 1], [], []>} : vector<32x32xf32>, vector<32x128xf32>, vector<32x128xf32> -> vector<32x128xf32>
    %cst_21 = arith.constant dense<0.000000e+00> : vector<32x128xf32>
    %28 = tpu.matmul %24, %12, %cst_21 {dimension_numbers = #tpu.dot_dimension_numbers<[1], [0], [0], [1], [0, 0, 1, 1], [], []>} : vector<32x32xf32>, vector<32x128xf32>, vector<32x128xf32> -> vector<32x128xf32>
    %29 = arith.addf %27, %28 : vector<32x128xf32>
    %30 = arith.addf %29, %17 : vector<32x128xf32>
    %31 = vector.extract_strided_slice %30 {offsets = [0, 0], sizes = [32, 64], strides = [1, 1]} : vector<32x128xf32> to vector<32x64xf32>
    %32 = arith.negf %31 : vector<32x64xf32>
    %33 = math.exp %32 : vector<32x64xf32>
    %cst_22 = arith.constant 1.000000e+00 : f32
    %34 = vector.broadcast %cst_22 : f32 to vector<32x64xf32>
    %35 = arith.addf %34, %33 : vector<32x64xf32>
    %36 = arith.divf %34, %35 : vector<32x64xf32>
    %37 = vector.extract_strided_slice %36 {offsets = [0, 0], sizes = [32, 32], strides = [1, 1]} : vector<32x64xf32> to vector<32x32xf32>
    %38 = vector.extract_strided_slice %36 {offsets = [0, 32], sizes = [32, 32], strides = [1, 1]} : vector<32x64xf32> to vector<32x32xf32>
    %39 = vector.extract_strided_slice %30 {offsets = [0, 64], sizes = [32, 32], strides = [1, 1]} : vector<32x128xf32> to vector<32x32xf32>
    %40 = vector.extract_strided_slice %30 {offsets = [0, 96], sizes = [32, 32], strides = [1, 1]} : vector<32x128xf32> to vector<32x32xf32>
    %41 = arith.mulf %37, %40 : vector<32x32xf32>
    %42 = arith.addf %39, %41 : vector<32x32xf32>
    %43 = math.tanh %42 : vector<32x32xf32>
    %cst_23 = arith.constant 1.000000e+00 : f32
    %44 = vector.broadcast %cst_23 : f32 to vector<32x32xf32>
    %45 = arith.subf %44, %38 : vector<32x32xf32>
    %46 = arith.mulf %45, %43 : vector<32x32xf32>
    %47 = arith.mulf %38, %24 : vector<32x32xf32>
    %48 = arith.addf %46, %47 : vector<32x32xf32>
    %cst_24 = arith.constant dense<0.000000e+00> : vector<32x128xf32>
    %49 = tpu.matmul %48, %13, %cst_24 {dimension_numbers = #tpu.dot_dimension_numbers<[1], [0], [0], [1], [0, 0, 1, 1], [], []>} : vector<32x32xf32>, vector<32x128xf32>, vector<32x128xf32> -> vector<32x128xf32>
    %cst_25 = arith.constant dense<0.000000e+00> : vector<32x128xf32>
    %50 = tpu.matmul %25, %14, %cst_25 {dimension_numbers = #tpu.dot_dimension_numbers<[1], [0], [0], [1], [0, 0, 1, 1], [], []>} : vector<32x32xf32>, vector<32x128xf32>, vector<32x128xf32> -> vector<32x128xf32>
    %51 = arith.addf %49, %50 : vector<32x128xf32>
    %52 = arith.addf %51, %20 : vector<32x128xf32>
    %53 = vector.extract_strided_slice %52 {offsets = [0, 0], sizes = [32, 64], strides = [1, 1]} : vector<32x128xf32> to vector<32x64xf32>
    %54 = arith.negf %53 : vector<32x64xf32>
    %55 = math.exp %54 : vector<32x64xf32>
    %cst_26 = arith.constant 1.000000e+00 : f32
    %56 = vector.broadcast %cst_26 : f32 to vector<32x64xf32>
    %57 = arith.addf %56, %55 : vector<32x64xf32>
    %58 = arith.divf %56, %57 : vector<32x64xf32>
    %59 = vector.extract_strided_slice %58 {offsets = [0, 0], sizes = [32, 32], strides = [1, 1]} : vector<32x64xf32> to vector<32x32xf32>
    %60 = vector.extract_strided_slice %58 {offsets = [0, 32], sizes = [32, 32], strides = [1, 1]} : vector<32x64xf32> to vector<32x32xf32>
    %61 = vector.extract_strided_slice %52 {offsets = [0, 64], sizes = [32, 32], strides = [1, 1]} : vector<32x128xf32> to vector<32x32xf32>
    %62 = vector.extract_strided_slice %52 {offsets = [0, 96], sizes = [32, 32], strides = [1, 1]} : vector<32x128xf32> to vector<32x32xf32>
    %63 = arith.mulf %59, %62 : vector<32x32xf32>
    %64 = arith.addf %61, %63 : vector<32x32xf32>
    %65 = math.tanh %64 : vector<32x32xf32>
    %cst_27 = arith.constant 1.000000e+00 : f32
    %66 = vector.broadcast %cst_27 : f32 to vector<32x32xf32>
    %67 = arith.subf %66, %60 : vector<32x32xf32>
    %68 = arith.mulf %67, %65 : vector<32x32xf32>
    %69 = arith.mulf %60, %25 : vector<32x32xf32>
    %70 = arith.addf %68, %69 : vector<32x32xf32>
    %71 = arith.mulf %70, %23 : vector<32x32xf32>
    %cst_28 = arith.constant dense<0.000000e+00> : vector<32xf32>
    %72 = vector.multi_reduction <add>, %71, %cst_28 [1] : vector<32x32xf32> to vector<32xf32>
    %73 = vector.shape_cast %72 : vector<32xf32> to vector<32x1xf32>
    %74 = vector.extract_strided_slice %10 {offsets = [0, 32], sizes = [32, 32], strides = [1, 1]} : vector<32x256xf32> to vector<32x32xf32>
    %cst_29 = arith.constant dense<0.000000e+00> : vector<32x128xf32>
    %75 = tpu.matmul %74, %11, %cst_29 {dimension_numbers = #tpu.dot_dimension_numbers<[1], [0], [0], [1], [0, 0, 1, 1], [], []>} : vector<32x32xf32>, vector<32x128xf32>, vector<32x128xf32> -> vector<32x128xf32>
    %cst_30 = arith.constant dense<0.000000e+00> : vector<32x128xf32>
    %76 = tpu.matmul %48, %12, %cst_30 {dimension_numbers = #tpu.dot_dimension_numbers<[1], [0], [0], [1], [0, 0, 1, 1], [], []>} : vector<32x32xf32>, vector<32x128xf32>, vector<32x128xf32> -> vector<32x128xf32>
    %77 = arith.addf %75, %76 : vector<32x128xf32>
    %78 = arith.addf %77, %17 : vector<32x128xf32>
    %79 = vector.extract_strided_slice %78 {offsets = [0, 0], sizes = [32, 64], strides = [1, 1]} : vector<32x128xf32> to vector<32x64xf32>
    %80 = arith.negf %79 : vector<32x64xf32>
    %81 = math.exp %80 : vector<32x64xf32>
    %cst_31 = arith.constant 1.000000e+00 : f32
    %82 = vector.broadcast %cst_31 : f32 to vector<32x64xf32>
    %83 = arith.addf %82, %81 : vector<32x64xf32>
    %84 = arith.divf %82, %83 : vector<32x64xf32>
    %85 = vector.extract_strided_slice %84 {offsets = [0, 0], sizes = [32, 32], strides = [1, 1]} : vector<32x64xf32> to vector<32x32xf32>
    %86 = vector.extract_strided_slice %84 {offsets = [0, 32], sizes = [32, 32], strides = [1, 1]} : vector<32x64xf32> to vector<32x32xf32>
    %87 = vector.extract_strided_slice %78 {offsets = [0, 64], sizes = [32, 32], strides = [1, 1]} : vector<32x128xf32> to vector<32x32xf32>
    %88 = vector.extract_strided_slice %78 {offsets = [0, 96], sizes = [32, 32], strides = [1, 1]} : vector<32x128xf32> to vector<32x32xf32>
    %89 = arith.mulf %85, %88 : vector<32x32xf32>
    %90 = arith.addf %87, %89 : vector<32x32xf32>
    %91 = math.tanh %90 : vector<32x32xf32>
    %cst_32 = arith.constant 1.000000e+00 : f32
    %92 = vector.broadcast %cst_32 : f32 to vector<32x32xf32>
    %93 = arith.subf %92, %86 : vector<32x32xf32>
    %94 = arith.mulf %93, %91 : vector<32x32xf32>
    %95 = arith.mulf %86, %48 : vector<32x32xf32>
    %96 = arith.addf %94, %95 : vector<32x32xf32>
    %cst_33 = arith.constant dense<0.000000e+00> : vector<32x128xf32>
    %97 = tpu.matmul %96, %13, %cst_33 {dimension_numbers = #tpu.dot_dimension_numbers<[1], [0], [0], [1], [0, 0, 1, 1], [], []>} : vector<32x32xf32>, vector<32x128xf32>, vector<32x128xf32> -> vector<32x128xf32>
    %cst_34 = arith.constant dense<0.000000e+00> : vector<32x128xf32>
    %98 = tpu.matmul %70, %14, %cst_34 {dimension_numbers = #tpu.dot_dimension_numbers<[1], [0], [0], [1], [0, 0, 1, 1], [], []>} : vector<32x32xf32>, vector<32x128xf32>, vector<32x128xf32> -> vector<32x128xf32>
    %99 = arith.addf %97, %98 : vector<32x128xf32>
    %100 = arith.addf %99, %20 : vector<32x128xf32>
    %101 = vector.extract_strided_slice %100 {offsets = [0, 0], sizes = [32, 64], strides = [1, 1]} : vector<32x128xf32> to vector<32x64xf32>
    %102 = arith.negf %101 : vector<32x64xf32>
    %103 = math.exp %102 : vector<32x64xf32>
    %cst_35 = arith.constant 1.000000e+00 : f32
    %104 = vector.broadcast %cst_35 : f32 to vector<32x64xf32>
    %105 = arith.addf %104, %103 : vector<32x64xf32>
    %106 = arith.divf %104, %105 : vector<32x64xf32>
    %107 = vector.extract_strided_slice %106 {offsets = [0, 0], sizes = [32, 32], strides = [1, 1]} : vector<32x64xf32> to vector<32x32xf32>
    %108 = vector.extract_strided_slice %106 {offsets = [0, 32], sizes = [32, 32], strides = [1, 1]} : vector<32x64xf32> to vector<32x32xf32>
    %109 = vector.extract_strided_slice %100 {offsets = [0, 64], sizes = [32, 32], strides = [1, 1]} : vector<32x128xf32> to vector<32x32xf32>
    %110 = vector.extract_strided_slice %100 {offsets = [0, 96], sizes = [32, 32], strides = [1, 1]} : vector<32x128xf32> to vector<32x32xf32>
    %111 = arith.mulf %107, %110 : vector<32x32xf32>
    %112 = arith.addf %109, %111 : vector<32x32xf32>
    %113 = math.tanh %112 : vector<32x32xf32>
    %cst_36 = arith.constant 1.000000e+00 : f32
    %114 = vector.broadcast %cst_36 : f32 to vector<32x32xf32>
    %115 = arith.subf %114, %108 : vector<32x32xf32>
    %116 = arith.mulf %115, %113 : vector<32x32xf32>
    %117 = arith.mulf %108, %70 : vector<32x32xf32>
    %118 = arith.addf %116, %117 : vector<32x32xf32>
    %119 = arith.mulf %118, %23 : vector<32x32xf32>
    %cst_37 = arith.constant dense<0.000000e+00> : vector<32xf32>
    %120 = vector.multi_reduction <add>, %119, %cst_37 [1] : vector<32x32xf32> to vector<32xf32>
    %121 = vector.shape_cast %120 : vector<32xf32> to vector<32x1xf32>
    %122 = vector.extract_strided_slice %10 {offsets = [0, 64], sizes = [32, 32], strides = [1, 1]} : vector<32x256xf32> to vector<32x32xf32>
    %cst_38 = arith.constant dense<0.000000e+00> : vector<32x128xf32>
    %123 = tpu.matmul %122, %11, %cst_38 {dimension_numbers = #tpu.dot_dimension_numbers<[1], [0], [0], [1], [0, 0, 1, 1], [], []>} : vector<32x32xf32>, vector<32x128xf32>, vector<32x128xf32> -> vector<32x128xf32>
    %cst_39 = arith.constant dense<0.000000e+00> : vector<32x128xf32>
    %124 = tpu.matmul %96, %12, %cst_39 {dimension_numbers = #tpu.dot_dimension_numbers<[1], [0], [0], [1], [0, 0, 1, 1], [], []>} : vector<32x32xf32>, vector<32x128xf32>, vector<32x128xf32> -> vector<32x128xf32>
    %125 = arith.addf %123, %124 : vector<32x128xf32>
    %126 = arith.addf %125, %17 : vector<32x128xf32>
    %127 = vector.extract_strided_slice %126 {offsets = [0, 0], sizes = [32, 64], strides = [1, 1]} : vector<32x128xf32> to vector<32x64xf32>
    %128 = arith.negf %127 : vector<32x64xf32>
    %129 = math.exp %128 : vector<32x64xf32>
    %cst_40 = arith.constant 1.000000e+00 : f32
    %130 = vector.broadcast %cst_40 : f32 to vector<32x64xf32>
    %131 = arith.addf %130, %129 : vector<32x64xf32>
    %132 = arith.divf %130, %131 : vector<32x64xf32>
    %133 = vector.extract_strided_slice %132 {offsets = [0, 0], sizes = [32, 32], strides = [1, 1]} : vector<32x64xf32> to vector<32x32xf32>
    %134 = vector.extract_strided_slice %132 {offsets = [0, 32], sizes = [32, 32], strides = [1, 1]} : vector<32x64xf32> to vector<32x32xf32>
    %135 = vector.extract_strided_slice %126 {offsets = [0, 64], sizes = [32, 32], strides = [1, 1]} : vector<32x128xf32> to vector<32x32xf32>
    %136 = vector.extract_strided_slice %126 {offsets = [0, 96], sizes = [32, 32], strides = [1, 1]} : vector<32x128xf32> to vector<32x32xf32>
    %137 = arith.mulf %133, %136 : vector<32x32xf32>
    %138 = arith.addf %135, %137 : vector<32x32xf32>
    %139 = math.tanh %138 : vector<32x32xf32>
    %cst_41 = arith.constant 1.000000e+00 : f32
    %140 = vector.broadcast %cst_41 : f32 to vector<32x32xf32>
    %141 = arith.subf %140, %134 : vector<32x32xf32>
    %142 = arith.mulf %141, %139 : vector<32x32xf32>
    %143 = arith.mulf %134, %96 : vector<32x32xf32>
    %144 = arith.addf %142, %143 : vector<32x32xf32>
    %cst_42 = arith.constant dense<0.000000e+00> : vector<32x128xf32>
    %145 = tpu.matmul %144, %13, %cst_42 {dimension_numbers = #tpu.dot_dimension_numbers<[1], [0], [0], [1], [0, 0, 1, 1], [], []>} : vector<32x32xf32>, vector<32x128xf32>, vector<32x128xf32> -> vector<32x128xf32>
    %cst_43 = arith.constant dense<0.000000e+00> : vector<32x128xf32>
    %146 = tpu.matmul %118, %14, %cst_43 {dimension_numbers = #tpu.dot_dimension_numbers<[1], [0], [0], [1], [0, 0, 1, 1], [], []>} : vector<32x32xf32>, vector<32x128xf32>, vector<32x128xf32> -> vector<32x128xf32>
    %147 = arith.addf %145, %146 : vector<32x128xf32>
    %148 = arith.addf %147, %20 : vector<32x128xf32>
    %149 = vector.extract_strided_slice %148 {offsets = [0, 0], sizes = [32, 64], strides = [1, 1]} : vector<32x128xf32> to vector<32x64xf32>
    %150 = arith.negf %149 : vector<32x64xf32>
    %151 = math.exp %150 : vector<32x64xf32>
    %cst_44 = arith.constant 1.000000e+00 : f32
    %152 = vector.broadcast %cst_44 : f32 to vector<32x64xf32>
    %153 = arith.addf %152, %151 : vector<32x64xf32>
    %154 = arith.divf %152, %153 : vector<32x64xf32>
    %155 = vector.extract_strided_slice %154 {offsets = [0, 0], sizes = [32, 32], strides = [1, 1]} : vector<32x64xf32> to vector<32x32xf32>
    %156 = vector.extract_strided_slice %154 {offsets = [0, 32], sizes = [32, 32], strides = [1, 1]} : vector<32x64xf32> to vector<32x32xf32>
    %157 = vector.extract_strided_slice %148 {offsets = [0, 64], sizes = [32, 32], strides = [1, 1]} : vector<32x128xf32> to vector<32x32xf32>
    %158 = vector.extract_strided_slice %148 {offsets = [0, 96], sizes = [32, 32], strides = [1, 1]} : vector<32x128xf32> to vector<32x32xf32>
    %159 = arith.mulf %155, %158 : vector<32x32xf32>
    %160 = arith.addf %157, %159 : vector<32x32xf32>
    %161 = math.tanh %160 : vector<32x32xf32>
    %cst_45 = arith.constant 1.000000e+00 : f32
    %162 = vector.broadcast %cst_45 : f32 to vector<32x32xf32>
    %163 = arith.subf %162, %156 : vector<32x32xf32>
    %164 = arith.mulf %163, %161 : vector<32x32xf32>
    %165 = arith.mulf %156, %118 : vector<32x32xf32>
    %166 = arith.addf %164, %165 : vector<32x32xf32>
    %167 = arith.mulf %166, %23 : vector<32x32xf32>
    %cst_46 = arith.constant dense<0.000000e+00> : vector<32xf32>
    %168 = vector.multi_reduction <add>, %167, %cst_46 [1] : vector<32x32xf32> to vector<32xf32>
    %169 = vector.shape_cast %168 : vector<32xf32> to vector<32x1xf32>
    %170 = vector.extract_strided_slice %10 {offsets = [0, 96], sizes = [32, 32], strides = [1, 1]} : vector<32x256xf32> to vector<32x32xf32>
    %cst_47 = arith.constant dense<0.000000e+00> : vector<32x128xf32>
    %171 = tpu.matmul %170, %11, %cst_47 {dimension_numbers = #tpu.dot_dimension_numbers<[1], [0], [0], [1], [0, 0, 1, 1], [], []>} : vector<32x32xf32>, vector<32x128xf32>, vector<32x128xf32> -> vector<32x128xf32>
    %cst_48 = arith.constant dense<0.000000e+00> : vector<32x128xf32>
    %172 = tpu.matmul %144, %12, %cst_48 {dimension_numbers = #tpu.dot_dimension_numbers<[1], [0], [0], [1], [0, 0, 1, 1], [], []>} : vector<32x32xf32>, vector<32x128xf32>, vector<32x128xf32> -> vector<32x128xf32>
    %173 = arith.addf %171, %172 : vector<32x128xf32>
    %174 = arith.addf %173, %17 : vector<32x128xf32>
    %175 = vector.extract_strided_slice %174 {offsets = [0, 0], sizes = [32, 64], strides = [1, 1]} : vector<32x128xf32> to vector<32x64xf32>
    %176 = arith.negf %175 : vector<32x64xf32>
    %177 = math.exp %176 : vector<32x64xf32>
    %cst_49 = arith.constant 1.000000e+00 : f32
    %178 = vector.broadcast %cst_49 : f32 to vector<32x64xf32>
    %179 = arith.addf %178, %177 : vector<32x64xf32>
    %180 = arith.divf %178, %179 : vector<32x64xf32>
    %181 = vector.extract_strided_slice %180 {offsets = [0, 0], sizes = [32, 32], strides = [1, 1]} : vector<32x64xf32> to vector<32x32xf32>
    %182 = vector.extract_strided_slice %180 {offsets = [0, 32], sizes = [32, 32], strides = [1, 1]} : vector<32x64xf32> to vector<32x32xf32>
    %183 = vector.extract_strided_slice %174 {offsets = [0, 64], sizes = [32, 32], strides = [1, 1]} : vector<32x128xf32> to vector<32x32xf32>
    %184 = vector.extract_strided_slice %174 {offsets = [0, 96], sizes = [32, 32], strides = [1, 1]} : vector<32x128xf32> to vector<32x32xf32>
    %185 = arith.mulf %181, %184 : vector<32x32xf32>
    %186 = arith.addf %183, %185 : vector<32x32xf32>
    %187 = math.tanh %186 : vector<32x32xf32>
    %cst_50 = arith.constant 1.000000e+00 : f32
    %188 = vector.broadcast %cst_50 : f32 to vector<32x32xf32>
    %189 = arith.subf %188, %182 : vector<32x32xf32>
    %190 = arith.mulf %189, %187 : vector<32x32xf32>
    %191 = arith.mulf %182, %144 : vector<32x32xf32>
    %192 = arith.addf %190, %191 : vector<32x32xf32>
    %cst_51 = arith.constant dense<0.000000e+00> : vector<32x128xf32>
    %193 = tpu.matmul %192, %13, %cst_51 {dimension_numbers = #tpu.dot_dimension_numbers<[1], [0], [0], [1], [0, 0, 1, 1], [], []>} : vector<32x32xf32>, vector<32x128xf32>, vector<32x128xf32> -> vector<32x128xf32>
    %cst_52 = arith.constant dense<0.000000e+00> : vector<32x128xf32>
    %194 = tpu.matmul %166, %14, %cst_52 {dimension_numbers = #tpu.dot_dimension_numbers<[1], [0], [0], [1], [0, 0, 1, 1], [], []>} : vector<32x32xf32>, vector<32x128xf32>, vector<32x128xf32> -> vector<32x128xf32>
    %195 = arith.addf %193, %194 : vector<32x128xf32>
    %196 = arith.addf %195, %20 : vector<32x128xf32>
    %197 = vector.extract_strided_slice %196 {offsets = [0, 0], sizes = [32, 64], strides = [1, 1]} : vector<32x128xf32> to vector<32x64xf32>
    %198 = arith.negf %197 : vector<32x64xf32>
    %199 = math.exp %198 : vector<32x64xf32>
    %cst_53 = arith.constant 1.000000e+00 : f32
    %200 = vector.broadcast %cst_53 : f32 to vector<32x64xf32>
    %201 = arith.addf %200, %199 : vector<32x64xf32>
    %202 = arith.divf %200, %201 : vector<32x64xf32>
    %203 = vector.extract_strided_slice %202 {offsets = [0, 0], sizes = [32, 32], strides = [1, 1]} : vector<32x64xf32> to vector<32x32xf32>
    %204 = vector.extract_strided_slice %202 {offsets = [0, 32], sizes = [32, 32], strides = [1, 1]} : vector<32x64xf32> to vector<32x32xf32>
    %205 = vector.extract_strided_slice %196 {offsets = [0, 64], sizes = [32, 32], strides = [1, 1]} : vector<32x128xf32> to vector<32x32xf32>
    %206 = vector.extract_strided_slice %196 {offsets = [0, 96], sizes = [32, 32], strides = [1, 1]} : vector<32x128xf32> to vector<32x32xf32>
    %207 = arith.mulf %203, %206 : vector<32x32xf32>
    %208 = arith.addf %205, %207 : vector<32x32xf32>
    %209 = math.tanh %208 : vector<32x32xf32>
    %cst_54 = arith.constant 1.000000e+00 : f32
    %210 = vector.broadcast %cst_54 : f32 to vector<32x32xf32>
    %211 = arith.subf %210, %204 : vector<32x32xf32>
    %212 = arith.mulf %211, %209 : vector<32x32xf32>
    %213 = arith.mulf %204, %166 : vector<32x32xf32>
    %214 = arith.addf %212, %213 : vector<32x32xf32>
    %215 = arith.mulf %214, %23 : vector<32x32xf32>
    %cst_55 = arith.constant dense<0.000000e+00> : vector<32xf32>
    %216 = vector.multi_reduction <add>, %215, %cst_55 [1] : vector<32x32xf32> to vector<32xf32>
    %217 = vector.shape_cast %216 : vector<32xf32> to vector<32x1xf32>
    %218 = vector.extract_strided_slice %10 {offsets = [0, 128], sizes = [32, 32], strides = [1, 1]} : vector<32x256xf32> to vector<32x32xf32>
    %cst_56 = arith.constant dense<0.000000e+00> : vector<32x128xf32>
    %219 = tpu.matmul %218, %11, %cst_56 {dimension_numbers = #tpu.dot_dimension_numbers<[1], [0], [0], [1], [0, 0, 1, 1], [], []>} : vector<32x32xf32>, vector<32x128xf32>, vector<32x128xf32> -> vector<32x128xf32>
    %cst_57 = arith.constant dense<0.000000e+00> : vector<32x128xf32>
    %220 = tpu.matmul %192, %12, %cst_57 {dimension_numbers = #tpu.dot_dimension_numbers<[1], [0], [0], [1], [0, 0, 1, 1], [], []>} : vector<32x32xf32>, vector<32x128xf32>, vector<32x128xf32> -> vector<32x128xf32>
    %221 = arith.addf %219, %220 : vector<32x128xf32>
    %222 = arith.addf %221, %17 : vector<32x128xf32>
    %223 = vector.extract_strided_slice %222 {offsets = [0, 0], sizes = [32, 64], strides = [1, 1]} : vector<32x128xf32> to vector<32x64xf32>
    %224 = arith.negf %223 : vector<32x64xf32>
    %225 = math.exp %224 : vector<32x64xf32>
    %cst_58 = arith.constant 1.000000e+00 : f32
    %226 = vector.broadcast %cst_58 : f32 to vector<32x64xf32>
    %227 = arith.addf %226, %225 : vector<32x64xf32>
    %228 = arith.divf %226, %227 : vector<32x64xf32>
    %229 = vector.extract_strided_slice %228 {offsets = [0, 0], sizes = [32, 32], strides = [1, 1]} : vector<32x64xf32> to vector<32x32xf32>
    %230 = vector.extract_strided_slice %228 {offsets = [0, 32], sizes = [32, 32], strides = [1, 1]} : vector<32x64xf32> to vector<32x32xf32>
    %231 = vector.extract_strided_slice %222 {offsets = [0, 64], sizes = [32, 32], strides = [1, 1]} : vector<32x128xf32> to vector<32x32xf32>
    %232 = vector.extract_strided_slice %222 {offsets = [0, 96], sizes = [32, 32], strides = [1, 1]} : vector<32x128xf32> to vector<32x32xf32>
    %233 = arith.mulf %229, %232 : vector<32x32xf32>
    %234 = arith.addf %231, %233 : vector<32x32xf32>
    %235 = math.tanh %234 : vector<32x32xf32>
    %cst_59 = arith.constant 1.000000e+00 : f32
    %236 = vector.broadcast %cst_59 : f32 to vector<32x32xf32>
    %237 = arith.subf %236, %230 : vector<32x32xf32>
    %238 = arith.mulf %237, %235 : vector<32x32xf32>
    %239 = arith.mulf %230, %192 : vector<32x32xf32>
    %240 = arith.addf %238, %239 : vector<32x32xf32>
    %cst_60 = arith.constant dense<0.000000e+00> : vector<32x128xf32>
    %241 = tpu.matmul %240, %13, %cst_60 {dimension_numbers = #tpu.dot_dimension_numbers<[1], [0], [0], [1], [0, 0, 1, 1], [], []>} : vector<32x32xf32>, vector<32x128xf32>, vector<32x128xf32> -> vector<32x128xf32>
    %cst_61 = arith.constant dense<0.000000e+00> : vector<32x128xf32>
    %242 = tpu.matmul %214, %14, %cst_61 {dimension_numbers = #tpu.dot_dimension_numbers<[1], [0], [0], [1], [0, 0, 1, 1], [], []>} : vector<32x32xf32>, vector<32x128xf32>, vector<32x128xf32> -> vector<32x128xf32>
    %243 = arith.addf %241, %242 : vector<32x128xf32>
    %244 = arith.addf %243, %20 : vector<32x128xf32>
    %245 = vector.extract_strided_slice %244 {offsets = [0, 0], sizes = [32, 64], strides = [1, 1]} : vector<32x128xf32> to vector<32x64xf32>
    %246 = arith.negf %245 : vector<32x64xf32>
    %247 = math.exp %246 : vector<32x64xf32>
    %cst_62 = arith.constant 1.000000e+00 : f32
    %248 = vector.broadcast %cst_62 : f32 to vector<32x64xf32>
    %249 = arith.addf %248, %247 : vector<32x64xf32>
    %250 = arith.divf %248, %249 : vector<32x64xf32>
    %251 = vector.extract_strided_slice %250 {offsets = [0, 0], sizes = [32, 32], strides = [1, 1]} : vector<32x64xf32> to vector<32x32xf32>
    %252 = vector.extract_strided_slice %250 {offsets = [0, 32], sizes = [32, 32], strides = [1, 1]} : vector<32x64xf32> to vector<32x32xf32>
    %253 = vector.extract_strided_slice %244 {offsets = [0, 64], sizes = [32, 32], strides = [1, 1]} : vector<32x128xf32> to vector<32x32xf32>
    %254 = vector.extract_strided_slice %244 {offsets = [0, 96], sizes = [32, 32], strides = [1, 1]} : vector<32x128xf32> to vector<32x32xf32>
    %255 = arith.mulf %251, %254 : vector<32x32xf32>
    %256 = arith.addf %253, %255 : vector<32x32xf32>
    %257 = math.tanh %256 : vector<32x32xf32>
    %cst_63 = arith.constant 1.000000e+00 : f32
    %258 = vector.broadcast %cst_63 : f32 to vector<32x32xf32>
    %259 = arith.subf %258, %252 : vector<32x32xf32>
    %260 = arith.mulf %259, %257 : vector<32x32xf32>
    %261 = arith.mulf %252, %214 : vector<32x32xf32>
    %262 = arith.addf %260, %261 : vector<32x32xf32>
    %263 = arith.mulf %262, %23 : vector<32x32xf32>
    %cst_64 = arith.constant dense<0.000000e+00> : vector<32xf32>
    %264 = vector.multi_reduction <add>, %263, %cst_64 [1] : vector<32x32xf32> to vector<32xf32>
    %265 = vector.shape_cast %264 : vector<32xf32> to vector<32x1xf32>
    %266 = vector.extract_strided_slice %10 {offsets = [0, 160], sizes = [32, 32], strides = [1, 1]} : vector<32x256xf32> to vector<32x32xf32>
    %cst_65 = arith.constant dense<0.000000e+00> : vector<32x128xf32>
    %267 = tpu.matmul %266, %11, %cst_65 {dimension_numbers = #tpu.dot_dimension_numbers<[1], [0], [0], [1], [0, 0, 1, 1], [], []>} : vector<32x32xf32>, vector<32x128xf32>, vector<32x128xf32> -> vector<32x128xf32>
    %cst_66 = arith.constant dense<0.000000e+00> : vector<32x128xf32>
    %268 = tpu.matmul %240, %12, %cst_66 {dimension_numbers = #tpu.dot_dimension_numbers<[1], [0], [0], [1], [0, 0, 1, 1], [], []>} : vector<32x32xf32>, vector<32x128xf32>, vector<32x128xf32> -> vector<32x128xf32>
    %269 = arith.addf %267, %268 : vector<32x128xf32>
    %270 = arith.addf %269, %17 : vector<32x128xf32>
    %271 = vector.extract_strided_slice %270 {offsets = [0, 0], sizes = [32, 64], strides = [1, 1]} : vector<32x128xf32> to vector<32x64xf32>
    %272 = arith.negf %271 : vector<32x64xf32>
    %273 = math.exp %272 : vector<32x64xf32>
    %cst_67 = arith.constant 1.000000e+00 : f32
    %274 = vector.broadcast %cst_67 : f32 to vector<32x64xf32>
    %275 = arith.addf %274, %273 : vector<32x64xf32>
    %276 = arith.divf %274, %275 : vector<32x64xf32>
    %277 = vector.extract_strided_slice %276 {offsets = [0, 0], sizes = [32, 32], strides = [1, 1]} : vector<32x64xf32> to vector<32x32xf32>
    %278 = vector.extract_strided_slice %276 {offsets = [0, 32], sizes = [32, 32], strides = [1, 1]} : vector<32x64xf32> to vector<32x32xf32>
    %279 = vector.extract_strided_slice %270 {offsets = [0, 64], sizes = [32, 32], strides = [1, 1]} : vector<32x128xf32> to vector<32x32xf32>
    %280 = vector.extract_strided_slice %270 {offsets = [0, 96], sizes = [32, 32], strides = [1, 1]} : vector<32x128xf32> to vector<32x32xf32>
    %281 = arith.mulf %277, %280 : vector<32x32xf32>
    %282 = arith.addf %279, %281 : vector<32x32xf32>
    %283 = math.tanh %282 : vector<32x32xf32>
    %cst_68 = arith.constant 1.000000e+00 : f32
    %284 = vector.broadcast %cst_68 : f32 to vector<32x32xf32>
    %285 = arith.subf %284, %278 : vector<32x32xf32>
    %286 = arith.mulf %285, %283 : vector<32x32xf32>
    %287 = arith.mulf %278, %240 : vector<32x32xf32>
    %288 = arith.addf %286, %287 : vector<32x32xf32>
    %cst_69 = arith.constant dense<0.000000e+00> : vector<32x128xf32>
    %289 = tpu.matmul %288, %13, %cst_69 {dimension_numbers = #tpu.dot_dimension_numbers<[1], [0], [0], [1], [0, 0, 1, 1], [], []>} : vector<32x32xf32>, vector<32x128xf32>, vector<32x128xf32> -> vector<32x128xf32>
    %cst_70 = arith.constant dense<0.000000e+00> : vector<32x128xf32>
    %290 = tpu.matmul %262, %14, %cst_70 {dimension_numbers = #tpu.dot_dimension_numbers<[1], [0], [0], [1], [0, 0, 1, 1], [], []>} : vector<32x32xf32>, vector<32x128xf32>, vector<32x128xf32> -> vector<32x128xf32>
    %291 = arith.addf %289, %290 : vector<32x128xf32>
    %292 = arith.addf %291, %20 : vector<32x128xf32>
    %293 = vector.extract_strided_slice %292 {offsets = [0, 0], sizes = [32, 64], strides = [1, 1]} : vector<32x128xf32> to vector<32x64xf32>
    %294 = arith.negf %293 : vector<32x64xf32>
    %295 = math.exp %294 : vector<32x64xf32>
    %cst_71 = arith.constant 1.000000e+00 : f32
    %296 = vector.broadcast %cst_71 : f32 to vector<32x64xf32>
    %297 = arith.addf %296, %295 : vector<32x64xf32>
    %298 = arith.divf %296, %297 : vector<32x64xf32>
    %299 = vector.extract_strided_slice %298 {offsets = [0, 0], sizes = [32, 32], strides = [1, 1]} : vector<32x64xf32> to vector<32x32xf32>
    %300 = vector.extract_strided_slice %298 {offsets = [0, 32], sizes = [32, 32], strides = [1, 1]} : vector<32x64xf32> to vector<32x32xf32>
    %301 = vector.extract_strided_slice %292 {offsets = [0, 64], sizes = [32, 32], strides = [1, 1]} : vector<32x128xf32> to vector<32x32xf32>
    %302 = vector.extract_strided_slice %292 {offsets = [0, 96], sizes = [32, 32], strides = [1, 1]} : vector<32x128xf32> to vector<32x32xf32>
    %303 = arith.mulf %299, %302 : vector<32x32xf32>
    %304 = arith.addf %301, %303 : vector<32x32xf32>
    %305 = math.tanh %304 : vector<32x32xf32>
    %cst_72 = arith.constant 1.000000e+00 : f32
    %306 = vector.broadcast %cst_72 : f32 to vector<32x32xf32>
    %307 = arith.subf %306, %300 : vector<32x32xf32>
    %308 = arith.mulf %307, %305 : vector<32x32xf32>
    %309 = arith.mulf %300, %262 : vector<32x32xf32>
    %310 = arith.addf %308, %309 : vector<32x32xf32>
    %311 = arith.mulf %310, %23 : vector<32x32xf32>
    %cst_73 = arith.constant dense<0.000000e+00> : vector<32xf32>
    %312 = vector.multi_reduction <add>, %311, %cst_73 [1] : vector<32x32xf32> to vector<32xf32>
    %313 = vector.shape_cast %312 : vector<32xf32> to vector<32x1xf32>
    %314 = vector.extract_strided_slice %10 {offsets = [0, 192], sizes = [32, 32], strides = [1, 1]} : vector<32x256xf32> to vector<32x32xf32>
    %cst_74 = arith.constant dense<0.000000e+00> : vector<32x128xf32>
    %315 = tpu.matmul %314, %11, %cst_74 {dimension_numbers = #tpu.dot_dimension_numbers<[1], [0], [0], [1], [0, 0, 1, 1], [], []>} : vector<32x32xf32>, vector<32x128xf32>, vector<32x128xf32> -> vector<32x128xf32>
    %cst_75 = arith.constant dense<0.000000e+00> : vector<32x128xf32>
    %316 = tpu.matmul %288, %12, %cst_75 {dimension_numbers = #tpu.dot_dimension_numbers<[1], [0], [0], [1], [0, 0, 1, 1], [], []>} : vector<32x32xf32>, vector<32x128xf32>, vector<32x128xf32> -> vector<32x128xf32>
    %317 = arith.addf %315, %316 : vector<32x128xf32>
    %318 = arith.addf %317, %17 : vector<32x128xf32>
    %319 = vector.extract_strided_slice %318 {offsets = [0, 0], sizes = [32, 64], strides = [1, 1]} : vector<32x128xf32> to vector<32x64xf32>
    %320 = arith.negf %319 : vector<32x64xf32>
    %321 = math.exp %320 : vector<32x64xf32>
    %cst_76 = arith.constant 1.000000e+00 : f32
    %322 = vector.broadcast %cst_76 : f32 to vector<32x64xf32>
    %323 = arith.addf %322, %321 : vector<32x64xf32>
    %324 = arith.divf %322, %323 : vector<32x64xf32>
    %325 = vector.extract_strided_slice %324 {offsets = [0, 0], sizes = [32, 32], strides = [1, 1]} : vector<32x64xf32> to vector<32x32xf32>
    %326 = vector.extract_strided_slice %324 {offsets = [0, 32], sizes = [32, 32], strides = [1, 1]} : vector<32x64xf32> to vector<32x32xf32>
    %327 = vector.extract_strided_slice %318 {offsets = [0, 64], sizes = [32, 32], strides = [1, 1]} : vector<32x128xf32> to vector<32x32xf32>
    %328 = vector.extract_strided_slice %318 {offsets = [0, 96], sizes = [32, 32], strides = [1, 1]} : vector<32x128xf32> to vector<32x32xf32>
    %329 = arith.mulf %325, %328 : vector<32x32xf32>
    %330 = arith.addf %327, %329 : vector<32x32xf32>
    %331 = math.tanh %330 : vector<32x32xf32>
    %cst_77 = arith.constant 1.000000e+00 : f32
    %332 = vector.broadcast %cst_77 : f32 to vector<32x32xf32>
    %333 = arith.subf %332, %326 : vector<32x32xf32>
    %334 = arith.mulf %333, %331 : vector<32x32xf32>
    %335 = arith.mulf %326, %288 : vector<32x32xf32>
    %336 = arith.addf %334, %335 : vector<32x32xf32>
    %cst_78 = arith.constant dense<0.000000e+00> : vector<32x128xf32>
    %337 = tpu.matmul %336, %13, %cst_78 {dimension_numbers = #tpu.dot_dimension_numbers<[1], [0], [0], [1], [0, 0, 1, 1], [], []>} : vector<32x32xf32>, vector<32x128xf32>, vector<32x128xf32> -> vector<32x128xf32>
    %cst_79 = arith.constant dense<0.000000e+00> : vector<32x128xf32>
    %338 = tpu.matmul %310, %14, %cst_79 {dimension_numbers = #tpu.dot_dimension_numbers<[1], [0], [0], [1], [0, 0, 1, 1], [], []>} : vector<32x32xf32>, vector<32x128xf32>, vector<32x128xf32> -> vector<32x128xf32>
    %339 = arith.addf %337, %338 : vector<32x128xf32>
    %340 = arith.addf %339, %20 : vector<32x128xf32>
    %341 = vector.extract_strided_slice %340 {offsets = [0, 0], sizes = [32, 64], strides = [1, 1]} : vector<32x128xf32> to vector<32x64xf32>
    %342 = arith.negf %341 : vector<32x64xf32>
    %343 = math.exp %342 : vector<32x64xf32>
    %cst_80 = arith.constant 1.000000e+00 : f32
    %344 = vector.broadcast %cst_80 : f32 to vector<32x64xf32>
    %345 = arith.addf %344, %343 : vector<32x64xf32>
    %346 = arith.divf %344, %345 : vector<32x64xf32>
    %347 = vector.extract_strided_slice %346 {offsets = [0, 0], sizes = [32, 32], strides = [1, 1]} : vector<32x64xf32> to vector<32x32xf32>
    %348 = vector.extract_strided_slice %346 {offsets = [0, 32], sizes = [32, 32], strides = [1, 1]} : vector<32x64xf32> to vector<32x32xf32>
    %349 = vector.extract_strided_slice %340 {offsets = [0, 64], sizes = [32, 32], strides = [1, 1]} : vector<32x128xf32> to vector<32x32xf32>
    %350 = vector.extract_strided_slice %340 {offsets = [0, 96], sizes = [32, 32], strides = [1, 1]} : vector<32x128xf32> to vector<32x32xf32>
    %351 = arith.mulf %347, %350 : vector<32x32xf32>
    %352 = arith.addf %349, %351 : vector<32x32xf32>
    %353 = math.tanh %352 : vector<32x32xf32>
    %cst_81 = arith.constant 1.000000e+00 : f32
    %354 = vector.broadcast %cst_81 : f32 to vector<32x32xf32>
    %355 = arith.subf %354, %348 : vector<32x32xf32>
    %356 = arith.mulf %355, %353 : vector<32x32xf32>
    %357 = arith.mulf %348, %310 : vector<32x32xf32>
    %358 = arith.addf %356, %357 : vector<32x32xf32>
    %359 = arith.mulf %358, %23 : vector<32x32xf32>
    %cst_82 = arith.constant dense<0.000000e+00> : vector<32xf32>
    %360 = vector.multi_reduction <add>, %359, %cst_82 [1] : vector<32x32xf32> to vector<32xf32>
    %361 = vector.shape_cast %360 : vector<32xf32> to vector<32x1xf32>
    %362 = vector.extract_strided_slice %10 {offsets = [0, 224], sizes = [32, 32], strides = [1, 1]} : vector<32x256xf32> to vector<32x32xf32>
    %cst_83 = arith.constant dense<0.000000e+00> : vector<32x128xf32>
    %363 = tpu.matmul %362, %11, %cst_83 {dimension_numbers = #tpu.dot_dimension_numbers<[1], [0], [0], [1], [0, 0, 1, 1], [], []>} : vector<32x32xf32>, vector<32x128xf32>, vector<32x128xf32> -> vector<32x128xf32>
    %cst_84 = arith.constant dense<0.000000e+00> : vector<32x128xf32>
    %364 = tpu.matmul %336, %12, %cst_84 {dimension_numbers = #tpu.dot_dimension_numbers<[1], [0], [0], [1], [0, 0, 1, 1], [], []>} : vector<32x32xf32>, vector<32x128xf32>, vector<32x128xf32> -> vector<32x128xf32>
    %365 = arith.addf %363, %364 : vector<32x128xf32>
    %366 = arith.addf %365, %17 : vector<32x128xf32>
    %367 = vector.extract_strided_slice %366 {offsets = [0, 0], sizes = [32, 64], strides = [1, 1]} : vector<32x128xf32> to vector<32x64xf32>
    %368 = arith.negf %367 : vector<32x64xf32>
    %369 = math.exp %368 : vector<32x64xf32>
    %cst_85 = arith.constant 1.000000e+00 : f32
    %370 = vector.broadcast %cst_85 : f32 to vector<32x64xf32>
    %371 = arith.addf %370, %369 : vector<32x64xf32>
    %372 = arith.divf %370, %371 : vector<32x64xf32>
    %373 = vector.extract_strided_slice %372 {offsets = [0, 0], sizes = [32, 32], strides = [1, 1]} : vector<32x64xf32> to vector<32x32xf32>
    %374 = vector.extract_strided_slice %372 {offsets = [0, 32], sizes = [32, 32], strides = [1, 1]} : vector<32x64xf32> to vector<32x32xf32>
    %375 = vector.extract_strided_slice %366 {offsets = [0, 64], sizes = [32, 32], strides = [1, 1]} : vector<32x128xf32> to vector<32x32xf32>
    %376 = vector.extract_strided_slice %366 {offsets = [0, 96], sizes = [32, 32], strides = [1, 1]} : vector<32x128xf32> to vector<32x32xf32>
    %377 = arith.mulf %373, %376 : vector<32x32xf32>
    %378 = arith.addf %375, %377 : vector<32x32xf32>
    %379 = math.tanh %378 : vector<32x32xf32>
    %cst_86 = arith.constant 1.000000e+00 : f32
    %380 = vector.broadcast %cst_86 : f32 to vector<32x32xf32>
    %381 = arith.subf %380, %374 : vector<32x32xf32>
    %382 = arith.mulf %381, %379 : vector<32x32xf32>
    %383 = arith.mulf %374, %336 : vector<32x32xf32>
    %384 = arith.addf %382, %383 : vector<32x32xf32>
    %cst_87 = arith.constant dense<0.000000e+00> : vector<32x128xf32>
    %385 = tpu.matmul %384, %13, %cst_87 {dimension_numbers = #tpu.dot_dimension_numbers<[1], [0], [0], [1], [0, 0, 1, 1], [], []>} : vector<32x32xf32>, vector<32x128xf32>, vector<32x128xf32> -> vector<32x128xf32>
    %cst_88 = arith.constant dense<0.000000e+00> : vector<32x128xf32>
    %386 = tpu.matmul %358, %14, %cst_88 {dimension_numbers = #tpu.dot_dimension_numbers<[1], [0], [0], [1], [0, 0, 1, 1], [], []>} : vector<32x32xf32>, vector<32x128xf32>, vector<32x128xf32> -> vector<32x128xf32>
    %387 = arith.addf %385, %386 : vector<32x128xf32>
    %388 = arith.addf %387, %20 : vector<32x128xf32>
    %389 = vector.extract_strided_slice %388 {offsets = [0, 0], sizes = [32, 64], strides = [1, 1]} : vector<32x128xf32> to vector<32x64xf32>
    %390 = arith.negf %389 : vector<32x64xf32>
    %391 = math.exp %390 : vector<32x64xf32>
    %cst_89 = arith.constant 1.000000e+00 : f32
    %392 = vector.broadcast %cst_89 : f32 to vector<32x64xf32>
    %393 = arith.addf %392, %391 : vector<32x64xf32>
    %394 = arith.divf %392, %393 : vector<32x64xf32>
    %395 = vector.extract_strided_slice %394 {offsets = [0, 0], sizes = [32, 32], strides = [1, 1]} : vector<32x64xf32> to vector<32x32xf32>
    %396 = vector.extract_strided_slice %394 {offsets = [0, 32], sizes = [32, 32], strides = [1, 1]} : vector<32x64xf32> to vector<32x32xf32>
    %397 = vector.extract_strided_slice %388 {offsets = [0, 64], sizes = [32, 32], strides = [1, 1]} : vector<32x128xf32> to vector<32x32xf32>
    %398 = vector.extract_strided_slice %388 {offsets = [0, 96], sizes = [32, 32], strides = [1, 1]} : vector<32x128xf32> to vector<32x32xf32>
    %399 = arith.mulf %395, %398 : vector<32x32xf32>
    %400 = arith.addf %397, %399 : vector<32x32xf32>
    %401 = math.tanh %400 : vector<32x32xf32>
    %cst_90 = arith.constant 1.000000e+00 : f32
    %402 = vector.broadcast %cst_90 : f32 to vector<32x32xf32>
    %403 = arith.subf %402, %396 : vector<32x32xf32>
    %404 = arith.mulf %403, %401 : vector<32x32xf32>
    %405 = arith.mulf %396, %358 : vector<32x32xf32>
    %406 = arith.addf %404, %405 : vector<32x32xf32>
    %407 = arith.mulf %406, %23 : vector<32x32xf32>
    %cst_91 = arith.constant dense<0.000000e+00> : vector<32xf32>
    %408 = vector.multi_reduction <add>, %407, %cst_91 [1] : vector<32x32xf32> to vector<32xf32>
    %409 = vector.shape_cast %408 : vector<32xf32> to vector<32x1xf32>
    %410 = arith.maximumf %73, %121 : vector<32x1xf32>
    %411 = arith.maximumf %410, %169 : vector<32x1xf32>
    %412 = arith.maximumf %411, %217 : vector<32x1xf32>
    %413 = arith.maximumf %412, %265 : vector<32x1xf32>
    %414 = arith.maximumf %413, %313 : vector<32x1xf32>
    %415 = arith.maximumf %414, %361 : vector<32x1xf32>
    %416 = arith.maximumf %415, %409 : vector<32x1xf32>
    %417 = arith.subf %73, %416 : vector<32x1xf32>
    %418 = math.exp %417 : vector<32x1xf32>
    %419 = arith.subf %121, %416 : vector<32x1xf32>
    %420 = math.exp %419 : vector<32x1xf32>
    %421 = arith.subf %169, %416 : vector<32x1xf32>
    %422 = math.exp %421 : vector<32x1xf32>
    %423 = arith.subf %217, %416 : vector<32x1xf32>
    %424 = math.exp %423 : vector<32x1xf32>
    %425 = arith.subf %265, %416 : vector<32x1xf32>
    %426 = math.exp %425 : vector<32x1xf32>
    %427 = arith.subf %313, %416 : vector<32x1xf32>
    %428 = math.exp %427 : vector<32x1xf32>
    %429 = arith.subf %361, %416 : vector<32x1xf32>
    %430 = math.exp %429 : vector<32x1xf32>
    %431 = arith.subf %409, %416 : vector<32x1xf32>
    %432 = math.exp %431 : vector<32x1xf32>
    %433 = arith.addf %418, %420 : vector<32x1xf32>
    %434 = arith.addf %433, %422 : vector<32x1xf32>
    %435 = arith.addf %434, %424 : vector<32x1xf32>
    %436 = arith.addf %435, %426 : vector<32x1xf32>
    %437 = arith.addf %436, %428 : vector<32x1xf32>
    %438 = arith.addf %437, %430 : vector<32x1xf32>
    %439 = arith.addf %438, %432 : vector<32x1xf32>
    %440 = vector.broadcast %418 : vector<32x1xf32> to vector<32x32xf32>
    %441 = arith.mulf %440, %70 : vector<32x32xf32>
    %442 = vector.broadcast %420 : vector<32x1xf32> to vector<32x32xf32>
    %443 = arith.mulf %442, %118 : vector<32x32xf32>
    %444 = arith.addf %441, %443 : vector<32x32xf32>
    %445 = vector.broadcast %422 : vector<32x1xf32> to vector<32x32xf32>
    %446 = arith.mulf %445, %166 : vector<32x32xf32>
    %447 = arith.addf %444, %446 : vector<32x32xf32>
    %448 = vector.broadcast %424 : vector<32x1xf32> to vector<32x32xf32>
    %449 = arith.mulf %448, %214 : vector<32x32xf32>
    %450 = arith.addf %447, %449 : vector<32x32xf32>
    %451 = vector.broadcast %426 : vector<32x1xf32> to vector<32x32xf32>
    %452 = arith.mulf %451, %262 : vector<32x32xf32>
    %453 = arith.addf %450, %452 : vector<32x32xf32>
    %454 = vector.broadcast %428 : vector<32x1xf32> to vector<32x32xf32>
    %455 = arith.mulf %454, %310 : vector<32x32xf32>
    %456 = arith.addf %453, %455 : vector<32x32xf32>
    %457 = vector.broadcast %430 : vector<32x1xf32> to vector<32x32xf32>
    %458 = arith.mulf %457, %358 : vector<32x32xf32>
    %459 = arith.addf %456, %458 : vector<32x32xf32>
    %460 = vector.broadcast %432 : vector<32x1xf32> to vector<32x32xf32>
    %461 = arith.mulf %460, %406 : vector<32x32xf32>
    %462 = arith.addf %459, %461 : vector<32x32xf32>
    %cst_92 = arith.constant 1.000000e+00 : f32
    %463 = vector.broadcast %cst_92 : f32 to vector<32x1xf32>
    %464 = arith.divf %463, %439 : vector<32x1xf32>
    %465 = vector.broadcast %464 : vector<32x1xf32> to vector<32x32xf32>
    %466 = arith.mulf %462, %465 : vector<32x32xf32>
    %c8 = arith.constant 8 : index
    %c0_93 = arith.constant 0 : index
    %467 = vector.load %arg4[%c8, %c0_93] : memref<17x128xf32, #tpu.memory_space<vmem>>, vector<1x32xf32>
    %468 = vector.shape_cast %467 : vector<1x32xf32> to vector<1x32xf32>
    %469 = vector.broadcast %468 : vector<1x32xf32> to vector<32x32xf32>
    %470 = arith.mulf %466, %469 : vector<32x32xf32>
    %cst_94 = arith.constant dense<0.000000e+00> : vector<32xf32>
    %471 = vector.multi_reduction <add>, %470, %cst_94 [1] : vector<32x32xf32> to vector<32xf32>
    %472 = vector.shape_cast %471 : vector<32xf32> to vector<32x1xf32>
    %c16 = arith.constant 16 : index
    %c0_95 = arith.constant 0 : index
    %473 = vector.load %arg4[%c16, %c0_95] : memref<17x128xf32, #tpu.memory_space<vmem>>, vector<1x1xf32>
    %474 = vector.broadcast %473 : vector<1x1xf32> to vector<32x1xf32>
    %475 = arith.addf %472, %474 : vector<32x1xf32>
    %c0_96 = arith.constant 0 : index
    %c28 = arith.constant 28 : index
    %476 = vector.load %arg0[%c0_96, %c28] : memref<32x32xf32, #tpu.memory_space<vmem>>, vector<32x1xf32>
    %477 = arith.addf %476, %475 : vector<32x1xf32>
    %c0_97 = arith.constant 0 : index
    %c0_98 = arith.constant 0 : index
    %478 = vector.load %arg5[%c0_97, %c0_98] : memref<32x1xf32, #tpu.memory_space<vmem>>, vector<32x1xf32>
    tpu.vector_store %arg5[%c0_97, %c0_98], %477 {strides = array<i32>} : memref<32x1xf32, #tpu.memory_space<vmem>>, vector<32x1xf32>,
    return
  }
}

</mosaic_0001>

<bundles_post_ra>
// kernel: stgcn_residual_forward.1
= control target key start
LH: loop header
LB: loop body
LE: loop exit
PB: predicated region body
PF: predicated region fallthrough
CT: control target
= control target key end

     0   :  { %vm32_vm0 = vcmask 261120   ;;  %v5397_v28 = vmov 0.0   ;;  %s5398_s19 = smov 32   ;;  %s5399_s20 = smov 64   ;;  %s7800_s2 = inlined_call_operand.vmem [shape: f32[33,256], index: 2, kind: input, shape index: {}]   ;;  %s7801_s0 = inlined_call_operand.vmem [shape: f32[32,32], index: 0, kind: input, shape index: {}]   ;;  %s7802_s3 = inlined_call_operand.vmem [shape: f32[144,128], index: 3, kind: input, shape index: {}]   ;;  %s7803_s1 = inlined_call_operand.vmem [shape: f32[32,32], index: 1, kind: input, shape index: {}]   ;;  %s7804_s4 = inlined_call_operand.vmem [shape: f32[17,128], index: 4, kind: input, shape index: {}]   ;;  %s7805_s5 = inlined_call_operand.vmem [shape: f32[32,1], index: 5, kind: output, shape index: {}]  }
   0x1   :  { %v30_v0 = vld [vmem:[%s7800_s2 + $0x30] sm:$0xff]  ;;  %v28_v1 = vld [vmem:[%s7800_s2 + $0x20] sm:$0xff]  ;;  %v21_v5 = vld [vmem:[%s7801_s0 + $0x8] sm:$0xff]  ;;  %s5400_s21 = smov 96  }
   0x2   :  { %57 = vmatpush.msra.mxu0 %v30_v0  ;;  %v26_v2 = vld [vmem:[%s7800_s2 + $0x10] sm:$0xff]  ;;  %v24_v3 = vld [vmem:[%s7800_s2] sm:$0xff]  ;;  %v23_v7 = vld [vmem:[%s7801_s0 + $0x18] sm:$0xff] }
   0x3   :  { %v20_v4 = vld [vmem:[%s7801_s0] sm:$0xff]  ;;  %v22_v6 = vld [vmem:[%s7801_s0 + $0x10] sm:$0xff]  ;;  %v31_v12 = vld [vmem:[%s7800_s2 + $0x38] sm:$0xff] }
   0x4   :  { %58 = vmatpush.msra.mxu0 %v28_v1  ;;  %v29_v13 = vld [vmem:[%s7800_s2 + $0x28] sm:$0xff]  ;;  %86 = vmatpush.msra.mxu1 %v31_v12  ;;  %v5470_v14 = vld [vmem:[%s7802_s3 + $0x38] sm:$0xff]  ;;  %v5479_v16 = vld [vmem:[%s7802_s3 + $0x30] sm:$0xff] }
   0x5   :  { %v27_v15 = vld [vmem:[%s7800_s2 + $0x18] sm:$0xff]  ;;  %v5484_v17 = vld [vmem:[%s7802_s3 + $0x28] sm:$0xff]  ;;  %v5493_v19 = vld [vmem:[%s7803_s1] sm:$0xff] }
   0x6   :  { %59 = vmatpush.msra.mxu0 %v26_v2  ;;  %87 = vmatpush.msra.mxu1 %v29_v13  ;;  %v25_v18 = vld [vmem:[%s7800_s2 + $0x8] sm:$0xff]  ;;  %v5498_v20 = vld [vmem:[%s7802_s3 + $0x18] sm:$0xff]  ;;  %v5504_v21 = vld [vmem:[%s7802_s3 + $0x20] sm:$0xff] }
   0x7   :  { %v5512_v22 = vld [vmem:[%s7802_s3 + $0x10] sm:$0xff]  ;;  %v5519_v23 = vld [vmem:[%s7802_s3 + $0x8] sm:$0xff]  ;;  %v5526_v24 = vld [vmem:[%s7802_s3] sm:$0xff] }
   0x8   :  { %60 = vmatpush.msra.mxu0 %v24_v3  ;;  %88 = vmatpush.msra.mxu1 %v27_v15  ;;  %v104_v25 = vld [vmem:[%s7803_s1 + $0x8] sm:$0xff]  ;;  %v105_v26 = vld [vmem:[%s7803_s1 + $0x10] sm:$0xff]  ;;  %v106_v27 = vld [vmem:[%s7803_s1 + $0x18] sm:$0xff] }
   0x9   :  { %4686 = vmatmul.msk.f32.vlgmr.msra.gmra.mxu0 %vm32_vm0, %v20_v4  ;;  %v4694_v29 = vld [vmem:[%s7800_s2 + $0x40] ss:$8 sm:$0x3] }
   0xa   :  { %229 = vmatpush.msrb.mxu0 %v5470_v14  ;;  %89 = vmatpush.msra.mxu1 %v25_v18  ;;  %v110_v30 = vperm.slane %v4694_v29, 0  ;;  %v5591_v48 = vld [vmem:[%s7802_s3 + $0x80] ss:$0 sm:$0xff] }
   0xb   :  { %4690 = vmatmul.msk.f32.vlgmr.msra.gmra.mxu1 %vm32_vm0, %v20_v4 }
   0xc   :  { %230 = vmatpush.msrb.mxu0 %v5479_v16  ;;  %270 = vmatpush.msrb.mxu1 %v5498_v20 }
   0xe   :  { %231 = vmatpush.msrb.mxu0 %v5484_v17  ;;  %271 = vmatpush.msrb.mxu1 %v5512_v22 }
  0x10   :  { %232 = vmatpush.msrb.mxu0 %v5504_v21  ;;  %272 = vmatpush.msrb.mxu1 %v5519_v23 }
  0x11   :  { %4687 = vmatmul.msk.f32.gmra.mxu0 %vm32_vm0, %v21_v5 }
  0x12   :  { %725 = vmatpush.msra.mxu0 %v5470_v14  ;;  %273 = vmatpush.msrb.mxu1 %v5526_v24 }
  0x13   :  { %4691 = vmatmul.msk.f32.gmra.mxu1 %vm32_vm0, %v21_v5 }
  0x14   :  { %726 = vmatpush.msra.mxu0 %v5479_v16  ;;  %770 = vmatpush.msra.mxu1 %v5498_v20 }
  0x16   :  { %727 = vmatpush.msra.mxu0 %v5484_v17  ;;  %771 = vmatpush.msra.mxu1 %v5512_v22 }
  0x18   :  { %728 = vmatpush.msra.mxu0 %v5504_v21  ;;  %772 = vmatpush.msra.mxu1 %v5519_v23 }
  0x19   :  { %4688 = vmatmul.msk.f32.gmra.mxu0 %vm32_vm0, %v22_v6 }
  0x1a   :  { %773 = vmatpush.msra.mxu1 %v5526_v24 }
  0x1b   :  { %4692 = vmatmul.msk.f32.gmra.mxu1 %vm32_vm0, %v22_v6 }
  0x21   :  { %4689 = vmatmul.msk.f32.gmra.mxu0 %vm32_vm0, %v23_v7 }
  0x23   :  { %4693 = vmatmul.msk.f32.gmra.mxu1 %vm32_vm0, %v23_v7 }
  0x29   :  { %233 = vmatmul.f32.vlgmr.msrb.gmra.mxu0 %v5397_v28 }
  0x2a   :  { %1241 = vmatpush.msrb.mxu0 %v5470_v14 }
  0x2c   :  { %1242 = vmatpush.msrb.mxu0 %v5479_v16 }
  0x2e   :  { %1243 = vmatpush.msrb.mxu0 %v5484_v17 }
  0x30   :  { %1244 = vmatpush.msrb.mxu0 %v5504_v21 }
  0x31   :  { %236 = vmatmul.f32.gmra.mxu0 %v5397_v28 }
  0x39   :  { %239 = vmatmul.f32.gmra.mxu0 %v5397_v28 }
  0x41   :  { %242 = vmatmul.f32.gmra.mxu0 %v5397_v28 }
  0x86   :  { %v62_v8 = vpop.f32.mrf.mxu0 }
  0x88   :  { %v91_v31 = vpop.f32.mrf.mxu1 }
  0x8e   :  { %v65_v9 = vpop.f32.mrf.mxu0 }
  0x90   :  { %v94_v35 = vpop.f32.mrf.mxu1 }
  0x96   :  { %v68_v10 = vpop.f32.mrf.mxu0 }
  0x98   :  { %v97_v39 = vpop.f32.mrf.mxu1 }
  0x9e   :  { %v71_v11 = vpop.f32.mrf.mxu0 }
  0x9f   :  { %138 = vmatpush.msra.mxu2 %v71_v11 }
  0xa0   :  { %v100_v43 = vpop.f32.mrf.mxu1 }
  0xa1   :  { %139 = vmatpush.msra.mxu2 %v68_v10  ;;  %167 = vmatpush.msra.mxu3 %v100_v43 }
  0xa3   :  { %140 = vmatpush.msra.mxu2 %v65_v9  ;;  %168 = vmatpush.msra.mxu3 %v97_v39 }
  0xa5   :  { %141 = vmatpush.msra.mxu2 %v62_v8  ;;  %169 = vmatpush.msra.mxu3 %v94_v35 }
  0xa6   :  { %4695 = vmatmul.msk.f32.vlgmr.msra.gmra.mxu2 %vm32_vm0, %v5493_v19  ;;  %v234_v47 = vpop.f32.mrf.mxu0 }
  0xa7   :  { %170 = vmatpush.msra.mxu3 %v91_v31 }
  0xa8   :  { %4699 = vmatmul.msk.f32.vlgmr.msra.gmra.mxu3 %vm32_vm0, %v5493_v19 }
  0xae   :  { %4696 = vmatmul.msk.f32.gmra.mxu2 %vm32_vm0, %v104_v25  ;;  %v237_v51 = vpop.f32.mrf.mxu0 }
  0xb0   :  { %4700 = vmatmul.msk.f32.gmra.mxu3 %vm32_vm0, %v104_v25 }
  0xb6   :  { %4697 = vmatmul.msk.f32.gmra.mxu2 %vm32_vm0, %v105_v26  ;;  %v240_v56 = vpop.f32.mrf.mxu0 }
  0xb8   :  { %4701 = vmatmul.msk.f32.gmra.mxu3 %vm32_vm0, %v105_v26 }
  0xbe   :  { %4698 = vmatmul.msk.f32.gmra.mxu2 %vm32_vm0, %v106_v27  ;;  %v243_v60 = vpop.f32.mrf.mxu0 }
  0xc0   :  { %4702 = vmatmul.msk.f32.gmra.mxu3 %vm32_vm0, %v106_v27 }
 0x129   :  { %v143_v32 = vpop.f32.mrf.mxu2 }
 0x12a   :  { %v144_v33 = vadd.f32 %v143_v32, %v110_v30 }
 0x12c   :  { %v5563_v34 = vmax.f32 %v144_v33, 0.0 }
 0x12e   :  { %4703 = vmatmul.msk.f32.vlgmr.msrb.gmra.mxu1 %vm32_vm0, %v5563_v34 }
 0x12f   :  { %1286 = vmatpush.msrb.mxu1 %v5498_v20 }
 0x131   :  { %v146_v36 = vpop.f32.mrf.mxu2  ;;  %1287 = vmatpush.msrb.mxu1 %v5512_v22 }
 0x132   :  { %v147_v37 = vadd.f32 %v146_v36, %v110_v30 }
 0x133   :  { %1288 = vmatpush.msrb.mxu1 %v5519_v23 }
 0x134   :  { %v5570_v38 = vmax.f32 %v147_v37, 0.0 }
 0x135   :  { %1289 = vmatpush.msrb.mxu1 %v5526_v24 }
 0x136   :  { %4704 = vmatmul.msk.f32.gmra.mxu1 %vm32_vm0, %v5570_v38 }
 0x139   :  { %v149_v40 = vpop.f32.mrf.mxu2 }
 0x13a   :  { %v150_v41 = vadd.f32 %v149_v40, %v110_v30 }
 0x13c   :  { %v5575_v42 = vmax.f32 %v150_v41, 0.0 }
 0x13e   :  { %4705 = vmatmul.msk.f32.gmra.mxu1 %vm32_vm0, %v5575_v42 }
 0x141   :  { %v152_v44 = vpop.f32.mrf.mxu2 }
 0x142   :  { %v153_v45 = vadd.f32 %v152_v44, %v110_v30 }
 0x144   :  { %v5579_v46 = vmax.f32 %v153_v45, 0.0 }
 0x146   :  { %4706 = vmatmul.msk.f32.gmra.mxu1 %vm32_vm0, %v5579_v46 }
 0x1ab   :  { %v275_v49 = vpop.f32.mrf.mxu1 }
 0x1ac   :  { %v276_v50 = vadd.f32 %v275_v49, %v234_v47 }
 0x1ae   :  { %v5594_v52 = vadd.f32 %v5591_v48, %v276_v50 }
 0x1b0   :  { %371 = vrot.lane.b32.xlu0 %v5594_v52, %s5398_s19  ;;  %v4707_v0 = vmul.f32 -1.442695, %v5594_v52 }
 0x1b2   :  { %4898 = vpow2.f32 %v4707_v0 }
 0x1b3   :  { %v278_v53 = vpop.f32.mrf.mxu1 }
 0x1b4   :  { %v279_v54 = vadd.f32 %v278_v53, %v237_v51 }
 0x1b6   :  { %v5599_v55 = vadd.f32 %v5591_v48, %v279_v54 }
 0x1b8   :  { %373 = vrot.lane.b32.xlu0 %v5599_v55, %s5398_s19  ;;  %v4708_v1 = vmul.f32 -1.442695, %v5599_v55  ;;  %v4899_v2 = vpop.eup %4898 }
 0x1b9   :  { %v303_v3 = vadd.f32 1.0, %v4899_v2 }
 0x1ba   :  { %4900 = vpow2.f32 %v4708_v1 }
 0x1bb   :  { %v281_v57 = vpop.f32.mrf.mxu1  ;;  %4902 = vrcp.f32 %v303_v3  ;;  %v318_v30 = vand.u32 2147483648, %v303_v3  ;;  %vm312_vm2 = vweird.f32 %v303_v3  ;;  %v316_v31 = vand.u32 2147483647, %v303_v3 }
 0x1bc   :  { %v282_v58 = vadd.f32 %v281_v57, %v240_v56 }
 0x1bd   :  { %v319_v36 = vor.u32 1.1754944e-38, %v318_v30  ;;  %vm317_vm4 = vcmp.eq.f32.partialorder %v316_v31, 8.507059e+37 }
 0x1be   :  { %v5604_v59 = vadd.f32 %v5591_v48, %v282_v58 }
 0x1c0   :  { %375 = vrot.lane.b32.xlu1 %v5604_v59, %s5398_s19  ;;  %v4709_v4 = vmul.f32 -1.442695, %v5604_v59  ;;  %v4901_v5 = vpop.eup %4900 }
 0x1c1   :  { %v304_v6 = vadd.f32 1.0, %v4901_v5  ;;  %v4903_v7 = vpop.eup %4902 }
 0x1c2   :  { %4904 = vpow2.f32 %v4709_v4  ;;  %v308_v10 = vmul.f32 %v4903_v7, %v303_v3  ;;  %vm313_vm1 = vweird.f32 %v4903_v7 }
 0x1c3   :  { %v284_v61 = vpop.f32.mrf.mxu1  ;;  %4906 = vrcp.f32 %v304_v6  ;;  %vm314_vm3 = vmor %vm312_vm2, %vm313_vm1  ;;  %vm327_vm5 = vweird.f32 %v304_v6  ;;  %v333_v40 = vand.u32 2147483648, %v304_v6  ;;  %v331_v44 = vand.u32 2147483647, %v304_v6 }
 0x1c4   :  { %v285_v62 = vadd.f32 %v284_v61, %v243_v60  ;;  %v309_v12 = vsub.f32 1.0, %v308_v10 }
 0x1c5   :  { %v334_v49 = vor.u32 1.1754944e-38, %v333_v40  ;;  %vm332_vm8 = vcmp.eq.f32.partialorder %v331_v44, 8.507059e+37 }
 0x1c6   :  { %v5609_v63 = vadd.f32 %v5591_v48, %v285_v62  ;;  %v310_v18 = vmul.f32 %v4903_v7, %v309_v12 }
 0x1c8   :  { %377 = vrot.lane.b32.xlu1 %v5609_v63, %s5398_s19  ;;  %v4710_v8 = vmul.f32 -1.442695, %v5609_v63  ;;  %v4905_v9 = vpop.eup %4904  ;;  %v311_v26 = vadd.f32 %v4903_v7, %v310_v18 }
 0x1c9   :  { %v305_v11 = vadd.f32 1.0, %v4905_v9  ;;  %v4907_v13 = vpop.eup %4906 }
 0x1ca   :  { %4908 = vpow2.f32 %v4710_v8  ;;  %v323_v19 = vmul.f32 %v4907_v13, %v304_v6  ;;  %v315_v32 = vsel %vm314_vm3, %v4903_v7, %v311_v26  ;;  %vm328_vm6 = vweird.f32 %v4907_v13 }
 0x1cb   :  { %4910 = vrcp.f32 %v305_v11  ;;  %v5617_v39 = vsel %vm317_vm4, %v319_v36, %v315_v32  ;;  %vm329_vm7 = vmor %vm327_vm5, %vm328_vm6  ;;  %vm342_vm9 = vweird.f32 %v305_v11  ;;  %v348_v57 = vand.u32 2147483648, %v305_v11 }
 0x1cc   :  { %v324_v27 = vsub.f32 1.0, %v323_v19  ;;  %v346_v61 = vand.u32 2147483647, %v305_v11  ;;  %v435_v36 = vmul.f32 0.0, %v5617_v39 }
 0x1cd   :  { %v349_v0 = vor.u32 1.1754944e-38, %v348_v57 }
 0x1ce   :  { %v325_v33 = vmul.f32 %v4907_v13, %v324_v27  ;;  %vm347_vm12 = vcmp.eq.f32.partialorder %v346_v61, 8.507059e+37 }
 0x1d0   :  { %v4909_v15 = vpop.eup %4908  ;;  %v326_v43 = vadd.f32 %v4907_v13, %v325_v33 }
 0x1d1   :  { %v306_v25 = vadd.f32 1.0, %v4909_v15  ;;  %v4911_v29 = vpop.eup %4910 }
 0x1d2   :  { %v338_v35 = vmul.f32 %v4911_v29, %v305_v11  ;;  %v330_v50 = vsel %vm329_vm7, %v4907_v13, %v326_v43  ;;  %vm343_vm10 = vweird.f32 %v4911_v29 }
 0x1d3   :  { %4912 = vrcp.f32 %v306_v25  ;;  %v5621_v54 = vsel %vm332_vm8, %v334_v49, %v330_v50  ;;  %vm344_vm11 = vmor %vm342_vm9, %vm343_vm10  ;;  %vm357_vm13 = vweird.f32 %v306_v25  ;;  %v363_v5 = vand.u32 2147483648, %v306_v25  ;;  %v5676_v49 = vld [vmem:[%s7802_s3 + $0x50] sm:$0xff] }
 0x1d4   :  { %v339_v45 = vsub.f32 1.0, %v338_v35  ;;  %v361_v8 = vand.u32 2147483647, %v306_v25 }
 0x1d5   :  { %v364_v9 = vor.u32 1.1754944e-38, %v363_v5 }
 0x1d6   :  { %v340_v51 = vmul.f32 %v4911_v29, %v339_v45  ;;  %vm362_vm1 = vcmp.eq.f32.partialorder %v361_v8, 8.507059e+37  ;;  %v5664_v45 = vld [vmem:[%s7802_s3 + $0x58] sm:$0xff] }
 0x1d7   :  { %504 = vmatpush.msrb.mxu3 %v5664_v45 }
 0x1d8   :  { %v341_v60 = vadd.f32 %v4911_v29, %v340_v51  ;;  %v5681_v51 = vld [vmem:[%s7802_s3 + $0x68] sm:$0xff] }
 0x1d9   :  { %v4913_v47 = vpop.eup %4912  ;;  %505 = vmatpush.msrb.mxu3 %v5676_v49 }
 0x1da   :  { %v353_v53 = vmul.f32 %v4913_v47, %v306_v25  ;;  %v345_v1 = vsel %vm344_vm11, %v4911_v29, %v341_v60  ;;  %vm358_vm14 = vweird.f32 %v4913_v47  ;;  %v5698_v60 = vld [vmem:[%s7802_s3 + $0x40] sm:$0xff] }
 0x1db   :  { %v5625_v4 = vsel %vm347_vm12, %v349_v0, %v345_v1  ;;  %vm359_vm15 = vmor %vm357_vm13, %vm358_vm14 }
 0x1dc   :  { %v354_v62 = vsub.f32 1.0, %v353_v53  ;;  %v5686_v53 = vld [vmem:[%s7802_s3 + $0x48] sm:$0xff]  ;;  %v437_v1 = vmul.f32 0.0, %v5625_v4 }
 0x1dd   :  { %506 = vmatpush.msrb.mxu3 %v5686_v53 }
 0x1de   :  { %v355_v2 = vmul.f32 %v4913_v47, %v354_v62  ;;  %v413_v62 = vsub.f32 1.0, %v5625_v4 }
 0x1df   :  { %507 = vmatpush.msrb.mxu3 %v5698_v60 }
 0x1e0   :  { %v356_v7 = vadd.f32 %v4913_v47, %v355_v2 }
 0x1e1   :  { %1024 = vmatpush.msra.mxu3 %v5664_v45 }
 0x1e2   :  { %v360_v10 = vsel %vm359_vm15, %v4913_v47, %v356_v7  ;;  %v5669_v47 = vld [vmem:[%s7802_s3 + $0x70] sm:$0xff] }
 0x1e3   :  { %v365_v11 = vsel %vm362_vm1, %v364_v9, %v360_v10  ;;  %1025 = vmatpush.msra.mxu3 %v5676_v49 }
 0x1e4   :  { %v414_v50 = vsub.f32 1.0, %v365_v11 }
 0x1e5   :  { %1026 = vmatpush.msra.mxu3 %v5686_v53 }
 0x1e7   :  { %1027 = vmatpush.msra.mxu3 %v5698_v60 }
 0x222   :  { %v372_v37 = vpop.permute.xlu0 %371 }
 0x223   :  { %v383_v41 = vmul.f32 %v372_v37, %v5617_v39 }
 0x225   :  { %391 = vrot.lane.b32.xlu2 %v383_v41, %s5399_s20  ;;  %v436_v41 = vmul.f32 0.0, %v5621_v54 }
 0x22a   :  { %v374_v56 = vpop.permute.xlu0 %373 }
 0x22b   :  { %v384_v58 = vmul.f32 %v374_v56, %v5621_v54  ;;  %v438_v56 = vmul.f32 0.0, %v365_v11 }
 0x22d   :  { %393 = vrot.lane.b32.xlu2 %v384_v58, %s5399_s20  ;;  %v5693_v58 = vld [vmem:[%s7802_s3 + $0x60] sm:$0xff] }
 0x232   :  { %v376_v3 = vpop.permute.xlu1 %375 }
 0x233   :  { %v385_v6 = vmul.f32 %v376_v3, %v5625_v4 }
 0x235   :  { %395 = vrot.lane.b32.xlu0 %v385_v6, %s5399_s20 }
 0x23a   :  { %v378_v12 = vpop.permute.xlu1 %377 }
 0x23b   :  { %v386_v13 = vmul.f32 %v378_v12, %v365_v11  ;;  %v5770_v12 = vld [vmem:[%s7802_s3 + $0x88] ss:$0 sm:$0xff] }
 0x23d   :  { %397 = vrot.lane.b32.xlu1 %v386_v13, %s5399_s20 }
 0x27f   :  { %v392_v15 = vpop.permute.xlu2 %391 }
 0x280   :  { %v403_v18 = vadd.f32 %v392_v15, %v5594_v52 }
 0x282   :  { %4914 = vtanh.f32 %v403_v18 }
 0x287   :  { %v394_v19 = vpop.permute.xlu2 %393 }
 0x288   :  { %v4915_v26 = vpop.eup %4914  ;;  %v404_v27 = vadd.f32 %v394_v19, %v5599_v55  ;;  %v411_v55 = vsub.f32 1.0, %v5617_v39  ;;  %v5659_v39 = vld [vmem:[%s7802_s3 + $0x78] sm:$0xff] }
 0x289   :  { %419 = vrot.lane.b32.xlu2 %v4915_v26, %s5400_s21  ;;  %455 = vmatpush.msrb.mxu2 %v5659_v39 }
 0x28a   :  { %4916 = vtanh.f32 %v404_v27 }
 0x28b   :  { %456 = vmatpush.msrb.mxu2 %v5669_v47 }
 0x28d   :  { %457 = vmatpush.msrb.mxu2 %v5681_v51 }
 0x28f   :  { %458 = vmatpush.msrb.mxu2 %v5693_v58 }
 0x290   :  { %v4917_v25 = vpop.eup %4916  ;;  %459 = vmatmul.f32.vlgmr.msrb.gmra.mxu2 %v5397_v28 }
 0x291   :  { %421 = vrot.lane.b32.xlu0 %v4917_v25, %s5400_s21  ;;  %975 = vmatpush.msra.mxu2 %v5659_v39 }
 0x293   :  { %976 = vmatpush.msra.mxu2 %v5669_v47 }
 0x295   :  { %977 = vmatpush.msra.mxu2 %v5681_v51 }
 0x297   :  { %978 = vmatpush.msra.mxu2 %v5693_v58 }
 0x298   :  { %462 = vmatmul.f32.gmra.mxu2 %v5397_v28 }
 0x299   :  { %1491 = vmatpush.msrb.mxu2 %v5659_v39 }
 0x29b   :  { %1492 = vmatpush.msrb.mxu2 %v5669_v47 }
 0x29d   :  { %1493 = vmatpush.msrb.mxu2 %v5681_v51 }
 0x29f   :  { %1494 = vmatpush.msrb.mxu2 %v5693_v58 }
 0x2a0   :  { %465 = vmatmul.f32.gmra.mxu2 %v5397_v28 }
 0x2a7   :  { %v396_v29 = vpop.permute.xlu0 %395 }
 0x2a8   :  { %v405_v30 = vadd.f32 %v396_v29, %v5604_v59  ;;  %468 = vmatmul.f32.gmra.mxu2 %v5397_v28 }
 0x2aa   :  { %4918 = vtanh.f32 %v405_v30 }
 0x2af   :  { %v398_v31 = vpop.permute.xlu1 %397 }
 0x2b0   :  { %v4919_v32 = vpop.eup %4918  ;;  %v406_v52 = vadd.f32 %v398_v31, %v5609_v63  ;;  %v412_v63 = vsub.f32 1.0, %v5621_v54 }
 0x2b1   :  { %423 = vrot.lane.b32.xlu1 %v4919_v32, %s5400_s21 }
 0x2b2   :  { %4920 = vtanh.f32 %v406_v52 }
 0x2b8   :  { %v4921_v33 = vpop.eup %4920 }
 0x2b9   :  { %742 = vrot.lane.b32.xlu1 %v5563_v34, %s5400_s21  ;;  %425 = vrot.lane.b32.xlu2 %v4921_v33, %s5400_s21 }
 0x2e3   :  { %v420_v35 = vpop.permute.xlu2 %419 }
 0x2e4   :  { %v431_v59 = vmul.f32 %v420_v35, %v411_v55 }
 0x2e6   :  { %v5642_v37 = vadd.f32 %v435_v36, %v431_v59 }
 0x2e8   :  { %476 = vrot.lane.b32.xlu0 %v5642_v37, %s5400_s21 }
 0x2f0   :  { %744 = vrot.lane.b32.xlu0 %v5570_v38, %s5400_s21 }
 0x303   :  { %v422_v40 = vpop.permute.xlu0 %421 }
 0x304   :  { %v432_v43 = vmul.f32 %v422_v40, %v412_v63 }
 0x306   :  { %v5650_v44 = vadd.f32 %v436_v41, %v432_v43 }
 0x308   :  { %478 = vrot.lane.b32.xlu2 %v5650_v44, %s5400_s21 }
 0x310   :  { %746 = vrot.lane.b32.xlu2 %v5575_v42, %s5400_s21 }
 0x313   :  { %v426_v54 = vpop.permute.xlu2 %425  ;;  %v460_v10 = vpop.f32.mrf.mxu2 }
 0x314   :  { %v434_v57 = vmul.f32 %v426_v54, %v414_v50 }
 0x316   :  { %v5702_v61 = vadd.f32 %v438_v56, %v434_v57 }
 0x318   :  { %482 = vrot.lane.b32.xlu0 %v5702_v61, %s5400_s21 }
 0x31b   :  { %v463_v27 = vpop.f32.mrf.mxu2 }
 0x323   :  { %v424_v0 = vpop.permute.xlu1 %423  ;;  %v466_v63 = vpop.f32.mrf.mxu2 }
 0x324   :  { %v433_v2 = vmul.f32 %v424_v0, %v413_v62 }
 0x326   :  { %v5723_v3 = vadd.f32 %v437_v1, %v433_v2 }
 0x328   :  { %480 = vrot.lane.b32.xlu1 %v5723_v3, %s5400_s21 }
 0x32b   :  { %v743_v5 = vpop.permute.xlu1 %742  ;;  %v469_v1 = vpop.f32.mrf.mxu2 }
 0x32c   :  { %4723 = vmatmul.msk.f32.vlgmr.msra.gmra.mxu1 %vm32_vm0, %v743_v5 }
 0x32d   :  { %1802 = vmatpush.msra.mxu1 %v5498_v20 }
 0x32f   :  { %1803 = vmatpush.msra.mxu1 %v5512_v22 }
 0x330   :  { %748 = vrot.lane.b32.xlu1 %v5579_v46, %s5400_s21 }
 0x331   :  { %1804 = vmatpush.msra.mxu1 %v5519_v23 }
 0x333   :  { %1805 = vmatpush.msra.mxu1 %v5526_v24 }
 0x35a   :  { %v477_v4 = vpop.permute.xlu0 %476 }
 0x35b   :  { %4711 = vmatmul.msk.f32.vlgmr.msrb.gmra.mxu3 %vm32_vm0, %v477_v4  ;;  %4719 = vmatmul.msk.f32.vlgmr.msra.gmra.mxu0 %vm32_vm0, %v477_v4 }
 0x35c   :  { %1757 = vmatpush.msra.mxu0 %v5470_v14  ;;  %1540 = vmatpush.msrb.mxu3 %v5664_v45 }
 0x35e   :  { %1758 = vmatpush.msra.mxu0 %v5479_v16  ;;  %1541 = vmatpush.msrb.mxu3 %v5676_v49 }
 0x360   :  { %1759 = vmatpush.msra.mxu0 %v5484_v17  ;;  %1542 = vmatpush.msrb.mxu3 %v5686_v53 }
 0x362   :  { %v745_v20 = vpop.permute.xlu0 %744  ;;  %v479_v22 = vpop.permute.xlu2 %478  ;;  %1760 = vmatpush.msra.mxu0 %v5504_v21  ;;  %1543 = vmatpush.msrb.mxu3 %v5698_v60 }
 0x363   :  { %4712 = vmatmul.msk.f32.gmra.mxu3 %vm32_vm0, %v479_v22  ;;  %4720 = vmatmul.msk.f32.gmra.mxu0 %vm32_vm0, %v479_v22  ;;  %v5756_v21 = vpop.f32.mrf.mxu3 }
 0x364   :  { %4724 = vmatmul.msk.f32.gmra.mxu1 %vm32_vm0, %v745_v20 }
 0x36a   :  { %v747_v14 = vpop.permute.xlu2 %746 }
 0x36b   :  { %v5758_v24 = vpop.f32.mrf.mxu3 }
 0x36c   :  { %4725 = vmatmul.msk.f32.gmra.mxu1 %vm32_vm0, %v747_v14 }
 0x373   :  { %v5760_v28 = vpop.f32.mrf.mxu3 }
 0x37b   :  { %v5762_v6 = vpop.f32.mrf.mxu3 }
 0x38a   :  { %v483_v17 = vpop.permute.xlu0 %482 }
 0x39a   :  { %v481_v16 = vpop.permute.xlu1 %480 }
 0x39b   :  { %4713 = vmatmul.msk.f32.gmra.mxu3 %vm32_vm0, %v481_v16  ;;  %4721 = vmatmul.msk.f32.gmra.mxu0 %vm32_vm0, %v481_v16 }
 0x3a2   :  { %v749_v23 = vpop.permute.xlu1 %748 }
 0x3a3   :  { %4714 = vmatmul.msk.f32.gmra.mxu3 %vm32_vm0, %v483_v17  ;;  %4722 = vmatmul.msk.f32.gmra.mxu0 %vm32_vm0, %v483_v17 }
 0x3a4   :  { %4726 = vmatmul.msk.f32.gmra.mxu1 %vm32_vm0, %v749_v23 }
 0x3a9   :  { %v775_v7 = vpop.f32.mrf.mxu1 }
 0x3d8   :  { %v730_v8 = vpop.f32.mrf.mxu0 }
 0x3d9   :  { %v776_v9 = vadd.f32 %v775_v7, %v730_v8 }
 0x3db   :  { %v5765_v11 = vadd.f32 %v5591_v48, %v776_v9 }
 0x3dd   :  { %871 = vrot.lane.b32.xlu0 %v5765_v11, %s5398_s19  ;;  %v4727_v57 = vmul.f32 -1.442695, %v5765_v11 }
 0x3de   :  { %v509_v13 = vpop.f32.mrf.mxu3 }
 0x3df   :  { %v510_v15 = vadd.f32 %v509_v13, %v460_v10 }
 0x3e0   :  { %v733_v19 = vpop.f32.mrf.mxu0 }
 0x3e1   :  { %v5775_v18 = vadd.f32 %v5770_v12, %v510_v15  ;;  %v778_v26 = vpop.f32.mrf.mxu1 }
 0x3e2   :  { %v779_v25 = vadd.f32 %v778_v26, %v733_v19 }
 0x3e3   :  { %605 = vrot.lane.b32.xlu2 %v5775_v18, %s5398_s19  ;;  %v4715_v52 = vmul.f32 -1.442695, %v5775_v18 }
 0x3e4   :  { %v5780_v31 = vadd.f32 %v5591_v48, %v779_v25 }
 0x3e5   :  { %4922 = vpow2.f32 %v4715_v52 }
 0x3e6   :  { %v512_v29 = vpop.f32.mrf.mxu3  ;;  %v4728_v33 = vmul.f32 -1.442695, %v5780_v31 }
 0x3e7   :  { %v513_v30 = vadd.f32 %v512_v29, %v463_v27 }
 0x3e8   :  { %4924 = vpow2.f32 %v4728_v33 }
 0x3e9   :  { %v5783_v32 = vadd.f32 %v5770_v12, %v513_v30  ;;  %v781_v55 = vpop.f32.mrf.mxu1 }
 0x3eb   :  { %873 = vrot.lane.b32.xlu2 %v5780_v31, %s5398_s19  ;;  %607 = vrot.lane.b32.xlu1 %v5783_v32, %s5398_s19  ;;  %v4923_v59 = vpop.eup %4922  ;;  %v4716_v10 = vmul.f32 -1.442695, %v5783_v32 }
 0x3ec   :  { %v537_v41 = vadd.f32 1.0, %v4923_v59 }
 0x3ee   :  { %4926 = vrcp.f32 %v537_v41  ;;  %v4925_v56 = vpop.eup %4924  ;;  %v552_v26 = vand.u32 2147483648, %v537_v41  ;;  %vm546_vm3 = vweird.f32 %v537_v41  ;;  %v550_v27 = vand.u32 2147483647, %v537_v41 }
 0x3ef   :  { %v804_v2 = vadd.f32 1.0, %v4925_v56  ;;  %4928 = vpow2.f32 %v4727_v57 }
 0x3f0   :  { %v553_v33 = vor.u32 1.1754944e-38, %v552_v26  ;;  %vm551_vm5 = vcmp.eq.f32.partialorder %v550_v27, 8.507059e+37 }
 0x3f1   :  { %4930 = vrcp.f32 %v804_v2  ;;  %vm827_vm7 = vweird.f32 %v804_v2 }
 0x3f4   :  { %v4927_v20 = vpop.eup %4926 }
 0x3f5   :  { %v542_v17 = vmul.f32 %v4927_v20, %v537_v41  ;;  %v4929_v23 = vpop.eup %4928  ;;  %vm547_vm2 = vweird.f32 %v4927_v20  ;;  %v831_v41 = vand.u32 2147483647, %v804_v2 }
 0x3f6   :  { %v803_v9 = vadd.f32 1.0, %v4929_v23  ;;  %vm548_vm4 = vmor %vm546_vm3, %vm547_vm2 }
 0x3f7   :  { %v543_v7 = vsub.f32 1.0, %v542_v17  ;;  %v4931_v8 = vpop.eup %4930  ;;  %vm832_vm9 = vcmp.eq.f32.partialorder %v831_v41, 8.507059e+37 }
 0x3f8   :  { %v823_v15 = vmul.f32 %v4931_v8, %v804_v2  ;;  %4932 = vrcp.f32 %v803_v9  ;;  %vm828_vm6 = vweird.f32 %v4931_v8  ;;  %v818_v17 = vand.u32 2147483648, %v803_v9 }
 0x3f9   :  { %v544_v13 = vmul.f32 %v4927_v20, %v543_v7  ;;  %4934 = vpow2.f32 %v4716_v10  ;;  %vm829_vm8 = vmor %vm827_vm7, %vm828_vm6  ;;  %vm812_vm11 = vweird.f32 %v803_v9 }
 0x3fa   :  { %v824_v19 = vsub.f32 1.0, %v823_v15 }
 0x3fc   :  { %v825_v52 = vmul.f32 %v4931_v8, %v824_v19 }
 0x3fe   :  { %v4933_v25 = vpop.eup %4932 }
 0x3ff   :  { %v4935_v29 = vpop.eup %4934  ;;  %vm813_vm10 = vweird.f32 %v4933_v25 }
 0x400   :  { %vm814_vm12 = vmor %vm812_vm11, %vm813_vm10 }
 0x418   :  { %v736_v35 = vpop.f32.mrf.mxu0 }
 0x419   :  { %v782_v36 = vadd.f32 %v781_v55, %v736_v35  ;;  %v808_v55 = vmul.f32 %v4933_v25, %v803_v9  ;;  %v538_v35 = vadd.f32 1.0, %v4935_v29 }
 0x41b   :  { %v5792_v40 = vadd.f32 %v5591_v48, %v782_v36  ;;  %v809_v56 = vsub.f32 1.0, %v808_v55  ;;  %4936 = vrcp.f32 %v538_v35  ;;  %v567_v27 = vand.u32 2147483648, %v538_v35 }
 0x41c   :  { %vm561_vm15 = vweird.f32 %v538_v35 }
 0x41d   :  { %875 = vrot.lane.b32.xlu1 %v5792_v40, %s5398_s19 }
 0x41e   :  { %v515_v43 = vpop.f32.mrf.mxu3 }
 0x41f   :  { %v516_v50 = vadd.f32 %v515_v43, %v466_v63  ;;  %v826_v43 = vadd.f32 %v4931_v8, %v825_v52 }
 0x420   :  { %v739_v62 = vpop.f32.mrf.mxu0 }
 0x421   :  { %v5797_v54 = vadd.f32 %v5770_v12, %v516_v50  ;;  %v784_v0 = vpop.f32.mrf.mxu1  ;;  %v833_v50 = vand.u32 2147483648, %v804_v2  ;;  %v830_v57 = vsel %vm829_vm8, %v4931_v8, %v826_v43  ;;  %v816_v2 = vand.u32 2147483647, %v803_v9 }
 0x422   :  { %v785_v5 = vadd.f32 %v784_v0, %v739_v62  ;;  %v810_v0 = vmul.f32 %v4933_v25, %v809_v56  ;;  %v819_v8 = vor.u32 1.1754944e-38, %v818_v17  ;;  %v565_v9 = vand.u32 2147483647, %v538_v35 }
 0x423   :  { %609 = vrot.lane.b32.xlu0 %v5797_v54, %s5398_s19  ;;  %v834_v62 = vor.u32 1.1754944e-38, %v833_v50  ;;  %vm817_vm13 = vcmp.eq.f32.partialorder %v816_v2, 8.507059e+37  ;;  %v4717_v50 = vmul.f32 -1.442695, %v5797_v54 }
 0x424   :  { %v5803_v14 = vadd.f32 %v5591_v48, %v785_v5  ;;  %v545_v48 = vadd.f32 %v4927_v20, %v544_v13  ;;  %vm566_vm2 = vcmp.eq.f32.partialorder %v565_v9, 8.507059e+37 }
 0x426   :  { %v518_v4 = vpop.f32.mrf.mxu3  ;;  %v549_v30 = vsel %vm548_vm4, %v4927_v20, %v545_v48  ;;  %v4937_v20 = vpop.eup %4936 }
 0x427   :  { %v519_v22 = vadd.f32 %v518_v4, %v469_v1  ;;  %v5813_v36 = vsel %vm551_vm5, %v553_v33, %v549_v30  ;;  %v5817_v1 = vsel %vm832_vm9, %v834_v62, %v830_v57  ;;  %v557_v23 = vmul.f32 %v4937_v20, %v538_v35 }
 0x428   :  { %vm562_vm14 = vweird.f32 %v4937_v20  ;;  %v568_v30 = vor.u32 1.1754944e-38, %v567_v27  ;;  %v4730_v57 = vmul.f32 -1.442695, %v5803_v14 }
 0x429   :  { %v5806_v16 = vadd.f32 %v5770_v12, %v519_v22  ;;  %v811_v22 = vadd.f32 %v4933_v25, %v810_v0  ;;  %v558_v10 = vsub.f32 1.0, %v557_v23  ;;  %vm563_vm1 = vmor %vm561_vm15, %vm562_vm14 }
 0x42b   :  { %611 = vrot.lane.b32.xlu2 %v5806_v16, %s5398_s19  ;;  %877 = vrot.lane.b32.xlu0 %v5803_v14, %s5398_s19  ;;  %v815_v7 = vsel %vm814_vm12, %v4933_v25, %v811_v22  ;;  %v559_v19 = vmul.f32 %v4937_v20, %v558_v10  ;;  %v4718_v29 = vmul.f32 -1.442695, %v5806_v16 }
 0x42c   :  { %v5821_v13 = vsel %vm817_vm13, %v819_v8, %v815_v7 }
 0x42d   :  { %v560_v26 = vadd.f32 %v4937_v20, %v559_v19  ;;  %4938 = vpow2.f32 %v4718_v29 }
 0x42f   :  { %v564_v25 = vsel %vm563_vm1, %v4937_v20, %v560_v26 }
 0x430   :  { %v5826_v33 = vsel %vm566_vm2, %v568_v30, %v564_v25 }
 0x43d   :  { %v606_v59 = vpop.permute.xlu2 %605 }
 0x43e   :  { %v617_v63 = vmul.f32 %v606_v59, %v5813_v36  ;;  %v4939_v59 = vpop.eup %4938 }
 0x43f   :  { %v540_v43 = vadd.f32 1.0, %v4939_v59 }
 0x440   :  { %625 = vrot.lane.b32.xlu1 %v617_v63, %s5399_s20  ;;  %v4729_v63 = vmul.f32 -1.442695, %v5792_v40 }
 0x441   :  { %v597_v10 = vand.u32 2147483648, %v540_v43  ;;  %vm591_vm4 = vweird.f32 %v540_v43 }
 0x442   :  { %4940 = vpow2.f32 %v4729_v63 }
 0x443   :  { %4942 = vrcp.f32 %v540_v43  ;;  %v598_v27 = vor.u32 1.1754944e-38, %v597_v10 }
 0x444   :  { %4944 = vpow2.f32 %v4717_v50 }
 0x445   :  { %v874_v5 = vpop.permute.xlu2 %873 }
 0x446   :  { %v884_v4 = vmul.f32 %v874_v5, %v5817_v1 }
 0x448   :  { %893 = vrot.lane.b32.xlu1 %v884_v4, %s5399_s20  ;;  %v4941_v35 = vpop.eup %4940 }
 0x449   :  { %v4943_v41 = vpop.eup %4942  ;;  %v805_v56 = vadd.f32 1.0, %v4941_v35 }
 0x44a   :  { %v4945_v62 = vpop.eup %4944  ;;  %v587_v0 = vmul.f32 %v4943_v41, %v540_v43  ;;  %vm592_vm3 = vweird.f32 %v4943_v41 }
 0x44b   :  { %4946 = vrcp.f32 %v805_v56  ;;  %v539_v5 = vadd.f32 1.0, %v4945_v62  ;;  %vm593_vm5 = vmor %vm591_vm4, %vm592_vm3  ;;  %v848_v63 = vand.u32 2147483648, %v805_v56  ;;  %vm842_vm8 = vweird.f32 %v805_v56 }
 0x44c   :  { %4948 = vpow2.f32 %v4730_v57  ;;  %v588_v4 = vsub.f32 1.0, %v587_v0 }
 0x44d   :  { %4950 = vrcp.f32 %v539_v5  ;;  %v849_v57 = vor.u32 1.1754944e-38, %v848_v63  ;;  %vm576_vm12 = vweird.f32 %v539_v5 }
 0x44e   :  { %v589_v17 = vmul.f32 %v4943_v41, %v588_v4 }
 0x44f   :  { %v872_v15 = vpop.permute.xlu0 %871 }
 0x450   :  { %v883_v48 = vmul.f32 %v872_v15, %v5821_v13  ;;  %v590_v7 = vadd.f32 %v4943_v41, %v589_v17  ;;  %v595_v15 = vand.u32 2147483647, %v540_v43  ;;  %v846_v43 = vand.u32 2147483647, %v805_v56 }
 0x451   :  { %v4947_v20 = vpop.eup %4946  ;;  %v582_v17 = vand.u32 2147483648, %v539_v5 }
 0x452   :  { %891 = vrot.lane.b32.xlu2 %v883_v48, %s5399_s20  ;;  %v4949_v22 = vpop.eup %4948  ;;  %v838_v2 = vmul.f32 %v4947_v20, %v805_v56  ;;  %v594_v19 = vsel %vm593_vm5, %v4943_v41, %v590_v7  ;;  %vm596_vm6 = vcmp.eq.f32.partialorder %v595_v15, 8.507059e+37  ;;  %vm843_vm7 = vweird.f32 %v4947_v20 }
 0x453   :  { %v806_v23 = vadd.f32 1.0, %v4949_v22  ;;  %v4951_v8 = vpop.eup %4950  ;;  %v5833_v9 = vsel %vm596_vm6, %v598_v27, %v594_v19  ;;  %vm844_vm9 = vmor %vm842_vm8, %vm843_vm7  ;;  %vm847_vm10 = vcmp.eq.f32.partialorder %v846_v43, 8.507059e+37  ;;  %v580_v7 = vand.u32 2147483647, %v539_v5 }
 0x454   :  { %v839_v48 = vsub.f32 1.0, %v838_v2  ;;  %v572_v26 = vmul.f32 %v4951_v8, %v539_v5  ;;  %vm577_vm11 = vweird.f32 %v4951_v8  ;;  %v583_v15 = vor.u32 1.1754944e-38, %v582_v17 }
 0x455   :  { %4952 = vrcp.f32 %v806_v23  ;;  %vm578_vm13 = vmor %vm576_vm12, %vm577_vm11  ;;  %vm581_vm14 = vcmp.eq.f32.partialorder %v580_v7, 8.507059e+37  ;;  %v863_v27 = vand.u32 2147483648, %v806_v23  ;;  %vm857_vm1 = vweird.f32 %v806_v23 }
 0x456   :  { %v840_v29 = vmul.f32 %v4947_v20, %v839_v48 }
 0x458   :  { %v841_v59 = vadd.f32 %v4947_v20, %v840_v29  ;;  %v861_v29 = vand.u32 2147483647, %v806_v23 }
 0x45a   :  { %v845_v41 = vsel %vm844_vm9, %v4947_v20, %v841_v59  ;;  %vm862_vm3 = vcmp.eq.f32.partialorder %v861_v29, 8.507059e+37 }
 0x45b   :  { %v5837_v22 = vsel %vm847_vm10, %v849_v57, %v845_v41 }
 0x45d   :  { %v608_v52 = vpop.permute.xlu1 %607 }
 0x45e   :  { %v618_v55 = vmul.f32 %v608_v52, %v5826_v33  ;;  %v573_v52 = vsub.f32 1.0, %v572_v26 }
 0x460   :  { %627 = vrot.lane.b32.xlu0 %v618_v55, %s5399_s20  ;;  %v4953_v55 = vpop.eup %4952  ;;  %v574_v50 = vmul.f32 %v4951_v8, %v573_v52 }
 0x461   :  { %v853_v35 = vmul.f32 %v4953_v55, %v806_v23  ;;  %vm858_vm15 = vweird.f32 %v4953_v55 }
 0x462   :  { %v575_v62 = vadd.f32 %v4951_v8, %v574_v50  ;;  %vm859_vm2 = vmor %vm857_vm1, %vm858_vm15 }
 0x463   :  { %v854_v0 = vsub.f32 1.0, %v853_v35 }
 0x464   :  { %v579_v56 = vsel %vm578_vm13, %v4951_v8, %v575_v62 }
 0x465   :  { %v855_v10 = vmul.f32 %v4953_v55, %v854_v0  ;;  %v5841_v48 = vsel %vm581_vm14, %v583_v15, %v579_v56 }
 0x467   :  { %v856_v26 = vadd.f32 %v4953_v55, %v855_v10 }
 0x469   :  { %v860_v5 = vsel %vm859_vm2, %v4953_v55, %v856_v26 }
 0x485   :  { %v612_v25 = vpop.permute.xlu2 %611 }
 0x486   :  { %v620_v30 = vmul.f32 %v612_v25, %v5833_v9  ;;  %v864_v25 = vor.u32 1.1754944e-38, %v863_v27  ;;  %v645_v27 = vsub.f32 1.0, %v5813_v36 }
 0x488   :  { %631 = vrot.lane.b32.xlu1 %v620_v30, %s5399_s20  ;;  %v5845_v30 = vsel %vm862_vm3, %v864_v25, %v860_v5  ;;  %v669_v5 = vmul.f32 0.0, %v5813_v36 }
 0x48f   :  { %v876_v4 = vpop.permute.xlu1 %875 }
 0x490   :  { %v885_v2 = vmul.f32 %v876_v4, %v5837_v22 }
 0x492   :  { %895 = vrot.lane.b32.xlu0 %v885_v2, %s5399_s20 }
 0x495   :  { %v610_v20 = vpop.permute.xlu0 %609 }
 0x496   :  { %v619_v19 = vmul.f32 %v610_v20, %v5841_v48 }
 0x498   :  { %629 = vrot.lane.b32.xlu2 %v619_v19, %s5399_s20 }
 0x49d   :  { %v878_v8 = vpop.permute.xlu0 %877 }
 0x49e   :  { %v886_v52 = vmul.f32 %v878_v8, %v5845_v30 }
 0x4a0   :  { %897 = vrot.lane.b32.xlu2 %v886_v52, %s5399_s20  ;;  %v912_v52 = vsub.f32 1.0, %v5817_v1 }
 0x4ac   :  { %v892_v59 = vpop.permute.xlu2 %891 }
 0x4ad   :  { %v903_v63 = vadd.f32 %v892_v59, %v5765_v11 }
 0x4af   :  { %4954 = vtanh.f32 %v903_v63  ;;  %v936_v63 = vmul.f32 %v5817_v1, %v5650_v44  ;;  %v937_v44 = vmul.f32 %v5837_v22, %v5723_v3 }
 0x4b2   :  { %v626_v43 = vpop.permute.xlu1 %625 }
 0x4b3   :  { %v637_v50 = vadd.f32 %v626_v43, %v5775_v18 }
 0x4b5   :  { %v4955_v35 = vpop.eup %4954  ;;  %4956 = vtanh.f32 %v637_v50  ;;  %v670_v50 = vmul.f32 0.0, %v5826_v33 }
 0x4b6   :  { %919 = vrot.lane.b32.xlu1 %v4955_v35, %s5400_s21 }
 0x4ba   :  { %v894_v23 = vpop.permute.xlu1 %893 }
 0x4bb   :  { %v4957_v55 = vpop.eup %4956  ;;  %v904_v41 = vadd.f32 %v894_v23, %v5780_v31 }
 0x4bc   :  { %653 = vrot.lane.b32.xlu0 %v4957_v55, %s5400_s21  ;;  %v913_v55 = vsub.f32 1.0, %v5837_v22  ;;  %v914_v22 = vsub.f32 1.0, %v5845_v30 }
 0x4bd   :  { %4958 = vtanh.f32 %v904_v41 }
 0x4c3   :  { %v4959_v57 = vpop.eup %4958 }
 0x4c4   :  { %921 = vrot.lane.b32.xlu0 %v4959_v57, %s5400_s21 }
 0x4d2   :  { %v628_v62 = vpop.permute.xlu0 %627 }
 0x4d3   :  { %v638_v11 = vadd.f32 %v628_v62, %v5783_v32 }
 0x4d5   :  { %4960 = vtanh.f32 %v638_v11  ;;  %v671_v11 = vmul.f32 0.0, %v5841_v48 }
 0x4db   :  { %v4961_v0 = vpop.eup %4960 }
 0x4dc   :  { %655 = vrot.lane.b32.xlu2 %v4961_v0, %s5400_s21 }
 0x4f2   :  { %v630_v18 = vpop.permute.xlu2 %629 }
 0x4f3   :  { %v639_v4 = vadd.f32 %v630_v18, %v5797_v54 }
 0x4f5   :  { %4962 = vtanh.f32 %v639_v4  ;;  %v648_v4 = vsub.f32 1.0, %v5833_v9 }
 0x4fa   :  { %v632_v17 = vpop.permute.xlu1 %631  ;;  %v898_v2 = vpop.permute.xlu2 %897 }
 0x4fb   :  { %v4963_v31 = vpop.eup %4962  ;;  %v640_v7 = vadd.f32 %v632_v17, %v5806_v16  ;;  %v906_v56 = vadd.f32 %v898_v2, %v5803_v14  ;;  %v935_v16 = vmul.f32 %v5821_v13, %v5642_v37  ;;  %v646_v37 = vsub.f32 1.0, %v5826_v33 }
 0x4fc   :  { %657 = vrot.lane.b32.xlu1 %v4963_v31, %s5400_s21  ;;  %v647_v33 = vsub.f32 1.0, %v5841_v48  ;;  %v672_v17 = vmul.f32 0.0, %v5833_v9  ;;  %v5929_v9 = vld [vmem:[%s7802_s3 + $0x18] sm:$0xff] }
 0x4fd   :  { %4964 = vtanh.f32 %v640_v7  ;;  %v938_v7 = vmul.f32 %v5845_v30, %v5702_v61  ;;  %v5935_v61 = vld [vmem:[%s7802_s3 + $0x10] sm:$0xff]  ;;  %v5941_v30 = vld [vmem:[%s7802_s3 + $0x8] sm:$0xff] }
 0x4fe   :  { %4966 = vtanh.f32 %v906_v56 }
 0x503   :  { %v4965_v32 = vpop.eup %4964 }
 0x504   :  { %v4967_v10 = vpop.eup %4966  ;;  %v896_v15 = vpop.permute.xlu0 %895  ;;  %659 = vrot.lane.b32.xlu0 %v4965_v32, %s5400_s21 }
 0x505   :  { %v905_v20 = vadd.f32 %v896_v15, %v5792_v40  ;;  %925 = vrot.lane.b32.xlu1 %v4967_v10, %s5400_s21  ;;  %v911_v40 = vsub.f32 1.0, %v5821_v13 }
 0x507   :  { %4968 = vtanh.f32 %v905_v20  ;;  %v5947_v20 = vld [vmem:[%s7802_s3] sm:$0xff] }
 0x50d   :  { %v4969_v54 = vpop.eup %4968  ;;  %1258 = vrot.lane.b32.xlu1 %v5563_v34, %s5399_s20 }
 0x50e   :  { %923 = vrot.lane.b32.xlu2 %v4969_v54, %s5400_s21 }
 0x515   :  { %1260 = vrot.lane.b32.xlu1 %v5570_v38, %s5399_s20 }
 0x51d   :  { %1262 = vrot.lane.b32.xlu1 %v5575_v42, %s5399_s20 }
 0x525   :  { %1264 = vrot.lane.b32.xlu1 %v5579_v46, %s5399_s20 }
 0x528   :  { %v920_v14 = vpop.permute.xlu1 %919 }
 0x529   :  { %v931_v19 = vmul.f32 %v920_v14, %v911_v40 }
 0x52b   :  { %v5876_v26 = vadd.f32 %v935_v16, %v931_v19 }
 0x52d   :  { %996 = vrot.lane.b32.xlu0 %v5876_v26, %s5400_s21 }
 0x52e   :  { %v654_v29 = vpop.permute.xlu0 %653 }
 0x52f   :  { %v665_v25 = vmul.f32 %v654_v29, %v645_v27 }
 0x531   :  { %v5882_v8 = vadd.f32 %v669_v5, %v665_v25 }
 0x533   :  { %7823 = vst [vmem:[#allocation2_spill] sm:$0xff] %v5882_v8  ;;  %947 = vrot.lane.b32.xlu2 %v5882_v8, %s5400_s21 }
 0x536   :  { %v922_v13 = vpop.permute.xlu0 %921  ;;  %v656_v59 = vpop.permute.xlu2 %655 }
 0x537   :  { %v932_v43 = vmul.f32 %v922_v13, %v912_v52  ;;  %v666_v35 = vmul.f32 %v656_v59, %v646_v37  ;;  %v6000_v52 = vld [vmem:[%s7802_s3 + $0x80] ss:$0 sm:$0xff] }
 0x539   :  { %v5891_v36 = vadd.f32 %v936_v63, %v932_v43  ;;  %v5893_v23 = vadd.f32 %v670_v50, %v666_v35 }
 0x53b   :  { %7824 = vst [vmem:[#allocation3_spill] sm:$0xff] %v5893_v23  ;;  %998 = vrot.lane.b32.xlu0 %v5891_v36, %s5400_s21  ;;  %949 = vrot.lane.b32.xlu2 %v5893_v23, %s5400_s21 }
 0x568   :  { %v924_v41 = vpop.permute.xlu2 %923 }
 0x569   :  { %v933_v1 = vmul.f32 %v924_v41, %v913_v55 }
 0x56b   :  { %v5902_v57 = vadd.f32 %v937_v44, %v933_v1 }
 0x56d   :  { %1000 = vrot.lane.b32.xlu0 %v5902_v57, %s5400_s21 }
 0x56e   :  { %v658_v62 = vpop.permute.xlu1 %657 }
 0x56f   :  { %v667_v0 = vmul.f32 %v658_v62, %v647_v33 }
 0x571   :  { %v5908_v18 = vadd.f32 %v671_v11, %v667_v0 }
 0x573   :  { %7825 = vst [vmem:[#allocation4_spill] sm:$0xff] %v5908_v18  ;;  %951 = vrot.lane.b32.xlu2 %v5908_v18, %s5400_s21 }
 0x576   :  { %v660_v3 = vpop.permute.xlu0 %659 }
 0x577   :  { %v668_v2 = vmul.f32 %v660_v3, %v648_v4  ;;  %v926_v31 = vpop.permute.xlu1 %925 }
 0x578   :  { %v934_v56 = vmul.f32 %v926_v31, %v914_v22 }
 0x579   :  { %v5917_v48 = vadd.f32 %v672_v17, %v668_v2 }
 0x57a   :  { %v5919_v32 = vadd.f32 %v938_v7, %v934_v56 }
 0x57b   :  { %7826 = vst [vmem:[#allocation5_spill] sm:$0xff] %v5917_v48  ;;  %953 = vrot.lane.b32.xlu2 %v5917_v48, %s5400_s21 }
 0x57c   :  { %1002 = vrot.lane.b32.xlu0 %v5919_v32, %s5400_s21 }
 0x57f   :  { %v1259_v10 = vpop.permute.xlu1 %1258 }
 0x580   :  { %4747 = vmatmul.msk.f32.vlgmr.msrb.gmra.mxu1 %vm32_vm0, %v1259_v10 }
 0x581   :  { %2314 = vmatpush.msrb.mxu1 %v5929_v9 }
 0x583   :  { %2315 = vmatpush.msrb.mxu1 %v5935_v61 }
 0x585   :  { %2316 = vmatpush.msrb.mxu1 %v5941_v30 }
 0x587   :  { %v1261_v15 = vpop.permute.xlu1 %1260  ;;  %2317 = vmatpush.msrb.mxu1 %v5947_v20 }
 0x588   :  { %4748 = vmatmul.msk.f32.gmra.mxu1 %vm32_vm0, %v1261_v15 }
 0x58d   :  { %v948_v54 = vpop.permute.xlu2 %947 }
 0x58e   :  { %4731 = vmatmul.msk.f32.vlgmr.msra.gmra.mxu2 %vm32_vm0, %v948_v54 }
 0x58f   :  { %v1263_v40 = vpop.permute.xlu1 %1262  ;;  %2007 = vmatpush.msra.mxu2 %v5659_v39  ;;  %v5965_v39 = vld [vmem:[%s7802_s3 + $0x38] sm:$0xff] }
 0x590   :  { %4749 = vmatmul.msk.f32.gmra.mxu1 %vm32_vm0, %v1263_v40 }
 0x591   :  { %2008 = vmatpush.msra.mxu2 %v5669_v47  ;;  %v5972_v47 = vld [vmem:[%s7802_s3 + $0x30] sm:$0xff] }
 0x593   :  { %2009 = vmatpush.msra.mxu2 %v5681_v51 }
 0x595   :  { %v950_v14 = vpop.permute.xlu2 %949  ;;  %2010 = vmatpush.msra.mxu2 %v5693_v58 }
 0x596   :  { %4732 = vmatmul.msk.f32.gmra.mxu2 %vm32_vm0, %v950_v14 }
 0x597   :  { %v1265_v16 = vpop.permute.xlu1 %1264 }
 0x598   :  { %4750 = vmatmul.msk.f32.gmra.mxu1 %vm32_vm0, %v1265_v16 }
 0x59f   :  { %v997_v19 = vpop.permute.xlu0 %996 }
 0x5a0   :  { %4735 = vmatmul.msk.f32.vlgmr.msra.gmra.mxu3 %vm32_vm0, %v997_v19  ;;  %4743 = vmatmul.msk.f32.vlgmr.msrb.gmra.mxu0 %vm32_vm0, %v997_v19 }
 0x5a1   :  { %2056 = vmatpush.msra.mxu3 %v5664_v45  ;;  %2273 = vmatpush.msrb.mxu0 %v5965_v39  ;;  %v5979_v45 = vld [vmem:[%s7802_s3 + $0x28] sm:$0xff] }
 0x5a3   :  { %2057 = vmatpush.msra.mxu3 %v5676_v49  ;;  %2274 = vmatpush.msrb.mxu0 %v5972_v47  ;;  %v5986_v49 = vld [vmem:[%s7802_s3 + $0x20] sm:$0xff] }
 0x5a5   :  { %2058 = vmatpush.msra.mxu3 %v5686_v53  ;;  %2275 = vmatpush.msrb.mxu0 %v5979_v45 }
 0x5a7   :  { %2059 = vmatpush.msra.mxu3 %v5698_v60  ;;  %2276 = vmatpush.msrb.mxu0 %v5986_v49 }
 0x5ad   :  { %v999_v51 = vpop.permute.xlu0 %998 }
 0x5ae   :  { %4736 = vmatmul.msk.f32.gmra.mxu3 %vm32_vm0, %v999_v51  ;;  %4744 = vmatmul.msk.f32.gmra.mxu0 %vm32_vm0, %v999_v51 }
 0x5cd   :  { %v952_v53 = vpop.permute.xlu2 %951 }
 0x5ce   :  { %4733 = vmatmul.msk.f32.gmra.mxu2 %vm32_vm0, %v952_v53 }
 0x5d5   :  { %v954_v58 = vpop.permute.xlu2 %953 }
 0x5d6   :  { %4734 = vmatmul.msk.f32.gmra.mxu2 %vm32_vm0, %v954_v58 }
 0x5df   :  { %v1001_v27 = vpop.permute.xlu0 %1000 }
 0x5e0   :  { %4737 = vmatmul.msk.f32.gmra.mxu3 %vm32_vm0, %v1001_v27  ;;  %4745 = vmatmul.msk.f32.gmra.mxu0 %vm32_vm0, %v1001_v27 }
 0x5ee   :  { %v1003_v60 = vpop.permute.xlu0 %1002 }
 0x5ef   :  { %4738 = vmatmul.msk.f32.gmra.mxu3 %vm32_vm0, %v1003_v60  ;;  %4746 = vmatmul.msk.f32.gmra.mxu0 %vm32_vm0, %v1003_v60 }
 0x5fd   :  { %v1291_v29 = vpop.f32.mrf.mxu1 }
 0x605   :  { %v1294_v50 = vpop.f32.mrf.mxu1 }
 0x60d   :  { %v1297_v0 = vpop.f32.mrf.mxu1 }
 0x611   :  { %v980_v13 = vpop.f32.mrf.mxu2 }
 0x615   :  { %v1300_v19 = vpop.f32.mrf.mxu1 }
 0x619   :  { %v983_v44 = vpop.f32.mrf.mxu2 }
 0x61d   :  { %v1246_v5 = vpop.f32.mrf.mxu0 }
 0x61e   :  { %v1292_v25 = vadd.f32 %v1291_v29, %v1246_v5 }
 0x620   :  { %v6003_v37 = vadd.f32 %v6000_v52, %v1292_v25 }
 0x622   :  { %1387 = vrot.lane.b32.xlu0 %v6003_v37, %s5398_s19  ;;  %v4751_v40 = vmul.f32 -1.442695, %v6003_v37 }
 0x623   :  { %v1029_v59 = vpop.f32.mrf.mxu3 }
 0x624   :  { %v1030_v63 = vadd.f32 %v1029_v59, %v980_v13 }
 0x626   :  { %v6008_v43 = vadd.f32 %v5770_v12, %v1030_v63 }
 0x628   :  { %1125 = vrot.lane.b32.xlu2 %v6008_v43, %s5398_s19  ;;  %v4739_v11 = vmul.f32 -1.442695, %v6008_v43 }
 0x62a   :  { %4970 = vpow2.f32 %v4739_v11 }
 0x62b   :  { %v1249_v35 = vpop.f32.mrf.mxu0 }
 0x62c   :  { %v1295_v55 = vadd.f32 %v1294_v50, %v1249_v35 }
 0x62e   :  { %v6013_v41 = vadd.f32 %v6000_v52, %v1295_v55 }
 0x630   :  { %1389 = vrot.lane.b32.xlu2 %v6013_v41, %s5398_s19  ;;  %v4752_v4 = vmul.f32 -1.442695, %v6013_v41  ;;  %v4971_v17 = vpop.eup %4970 }
 0x631   :  { %v1032_v1 = vpop.f32.mrf.mxu3  ;;  %v1057_v31 = vadd.f32 1.0, %v4971_v17 }
 0x632   :  { %v1033_v33 = vadd.f32 %v1032_v1, %v983_v44  ;;  %4972 = vpow2.f32 %v4752_v4 }
 0x633   :  { %4974 = vrcp.f32 %v1057_v31  ;;  %v1072_v11 = vand.u32 2147483648, %v1057_v31  ;;  %vm1066_vm5 = vweird.f32 %v1057_v31 }
 0x634   :  { %v6018_v62 = vadd.f32 %v5770_v12, %v1033_v33  ;;  %4976 = vpow2.f32 %v4751_v40 }
 0x636   :  { %1127 = vrot.lane.b32.xlu1 %v6018_v62, %s5398_s19  ;;  %v4740_v44 = vmul.f32 -1.442695, %v6018_v62 }
 0x638   :  { %v4973_v54 = vpop.eup %4972 }
 0x639   :  { %v1320_v14 = vadd.f32 1.0, %v4973_v54  ;;  %v4975_v16 = vpop.eup %4974 }
 0x63a   :  { %v1062_v27 = vmul.f32 %v4975_v16, %v1057_v31  ;;  %v4977_v60 = vpop.eup %4976  ;;  %vm1067_vm4 = vweird.f32 %v4975_v16 }
 0x63b   :  { %4978 = vrcp.f32 %v1320_v14  ;;  %v1319_v63 = vadd.f32 1.0, %v4977_v60  ;;  %vm1068_vm6 = vmor %vm1066_vm5, %vm1067_vm4  ;;  %v1349_v40 = vand.u32 2147483648, %v1320_v14  ;;  %vm1343_vm9 = vweird.f32 %v1320_v14 }
 0x63c   :  { %v1063_v13 = vsub.f32 1.0, %v1062_v27 }
 0x63d   :  { %4980 = vrcp.f32 %v1319_v63  ;;  %v1350_v27 = vor.u32 1.1754944e-38, %v1349_v40  ;;  %vm1328_vm13 = vweird.f32 %v1319_v63 }
 0x63e   :  { %v1064_v35 = vmul.f32 %v4975_v16, %v1063_v13  ;;  %4982 = vpow2.f32 %v4740_v44 }
 0x640   :  { %v1065_v1 = vadd.f32 %v4975_v16, %v1064_v35  ;;  %v1334_v35 = vand.u32 2147483648, %v1319_v63 }
 0x641   :  { %v4979_v59 = vpop.eup %4978 }
 0x642   :  { %v1339_v55 = vmul.f32 %v4979_v59, %v1320_v14  ;;  %vm1344_vm8 = vweird.f32 %v4979_v59  ;;  %v1335_v44 = vor.u32 1.1754944e-38, %v1334_v35 }
 0x643   :  { %v4981_v4 = vpop.eup %4980  ;;  %vm1345_vm10 = vmor %vm1343_vm9, %vm1344_vm8 }
 0x644   :  { %v1340_v33 = vsub.f32 1.0, %v1339_v55  ;;  %v1324_v17 = vmul.f32 %v4981_v4, %v1319_v63  ;;  %vm1329_vm12 = vweird.f32 %v4981_v4 }
 0x645   :  { %vm1330_vm14 = vmor %vm1328_vm13, %vm1329_vm12 }
 0x651   :  { %v986_v7 = vpop.f32.mrf.mxu2 }
 0x659   :  { %v989_v29 = vpop.f32.mrf.mxu2 }
 0x65d   :  { %v1252_v3 = vpop.f32.mrf.mxu0 }
 0x65e   :  { %v1298_v22 = vadd.f32 %v1297_v0, %v1252_v3  ;;  %v1070_v0 = vand.u32 2147483647, %v1057_v31  ;;  %v1069_v3 = vsel %vm1068_vm6, %v4975_v16, %v1065_v1  ;;  %v1347_v31 = vand.u32 2147483647, %v1320_v14 }
 0x65f   :  { %v1332_v14 = vand.u32 2147483647, %v1319_v63 }
 0x660   :  { %v6025_v2 = vadd.f32 %v6000_v52, %v1298_v22  ;;  %v1073_v22 = vor.u32 1.1754944e-38, %v1072_v11  ;;  %vm1071_vm7 = vcmp.eq.f32.partialorder %v1070_v0, 8.507059e+37  ;;  %vm1348_vm11 = vcmp.eq.f32.partialorder %v1347_v31, 8.507059e+37 }
 0x661   :  { %vm1333_vm15 = vcmp.eq.f32.partialorder %v1332_v14, 8.507059e+37 }
 0x662   :  { %1391 = vrot.lane.b32.xlu1 %v6025_v2, %s5398_s19 }
 0x663   :  { %v1035_v56 = vpop.f32.mrf.mxu3 }
 0x664   :  { %v1036_v10 = vadd.f32 %v1035_v56, %v986_v7  ;;  %v6046_v7 = vsel %vm1071_vm7, %v1073_v22, %v1069_v3 }
 0x666   :  { %v6030_v15 = vadd.f32 %v5770_v12, %v1036_v10 }
 0x668   :  { %1129 = vrot.lane.b32.xlu0 %v6030_v15, %s5398_s19 }
 0x66c   :  { %v1255_v51 = vpop.f32.mrf.mxu0 }
 0x66d   :  { %v1301_v53 = vadd.f32 %v1300_v19, %v1255_v51  ;;  %v4983_v19 = vpop.eup %4982  ;;  %v1325_v51 = vsub.f32 1.0, %v1324_v17 }
 0x66f   :  { %v6036_v58 = vadd.f32 %v6000_v52, %v1301_v53  ;;  %v1058_v53 = vadd.f32 1.0, %v4983_v19  ;;  %v1326_v60 = vmul.f32 %v4981_v4, %v1325_v51  ;;  %v4741_v51 = vmul.f32 -1.442695, %v6030_v15 }
 0x671   :  { %1393 = vrot.lane.b32.xlu0 %v6036_v58, %s5398_s19  ;;  %4984 = vrcp.f32 %v1058_v53  ;;  %v1327_v13 = vadd.f32 %v4981_v4, %v1326_v60  ;;  %v1087_v17 = vand.u32 2147483648, %v1058_v53  ;;  %vm1081_vm2 = vweird.f32 %v1058_v53 }
 0x672   :  { %v1038_v5 = vpop.f32.mrf.mxu3  ;;  %v1085_v63 = vand.u32 2147483647, %v1058_v53 }
 0x673   :  { %v1039_v25 = vadd.f32 %v1038_v5, %v989_v29  ;;  %v1331_v55 = vsel %vm1330_vm14, %v4981_v4, %v1327_v13 }
 0x674   :  { %v6054_v1 = vsel %vm1333_vm15, %v1335_v44, %v1331_v55  ;;  %vm1086_vm4 = vcmp.eq.f32.partialorder %v1085_v63, 8.507059e+37 }
 0x675   :  { %v6041_v50 = vadd.f32 %v5770_v12, %v1039_v25  ;;  %v1341_v12 = vmul.f32 %v4979_v59, %v1340_v33 }
 0x677   :  { %1131 = vrot.lane.b32.xlu2 %v6041_v50, %s5398_s19  ;;  %v1342_v54 = vadd.f32 %v4979_v59, %v1341_v12  ;;  %v4742_v4 = vmul.f32 -1.442695, %v6041_v50 }
 0x679   :  { %v1346_v16 = vsel %vm1345_vm10, %v4979_v59, %v1342_v54  ;;  %v4985_v59 = vpop.eup %4984  ;;  %v4753_v54 = vmul.f32 -1.442695, %v6025_v2  ;;  %4986 = vpow2.f32 %v4742_v4 }
 0x67a   :  { %v6050_v29 = vsel %vm1348_vm11, %v1350_v27, %v1346_v16  ;;  %v1077_v0 = vmul.f32 %v4985_v59, %v1058_v53  ;;  %vm1082_vm1 = vweird.f32 %v4985_v59 }
 0x67b   :  { %vm1083_vm3 = vmor %vm1081_vm2, %vm1082_vm1  ;;  %4988 = vpow2.f32 %v4753_v54 }
 0x67c   :  { %v1078_v3 = vsub.f32 1.0, %v1077_v0  ;;  %4990 = vpow2.f32 %v4741_v51 }
 0x67e   :  { %v1079_v12 = vmul.f32 %v4985_v59, %v1078_v3 }
 0x67f   :  { %v4987_v16 = vpop.eup %4986 }
 0x680   :  { %v1080_v22 = vadd.f32 %v4985_v59, %v1079_v12  ;;  %v1060_v27 = vadd.f32 1.0, %v4987_v16 }
 0x681   :  { %v4989_v53 = vpop.eup %4988 }
 0x682   :  { %v1126_v56 = vpop.permute.xlu2 %1125  ;;  %v1321_v60 = vadd.f32 1.0, %v4989_v53  ;;  %4992 = vrcp.f32 %v1060_v27  ;;  %v1117_v4 = vand.u32 2147483648, %v1060_v27  ;;  %vm1111_vm6 = vweird.f32 %v1060_v27 }
 0x683   :  { %v1137_v10 = vmul.f32 %v1126_v56, %v6046_v7  ;;  %v1084_v56 = vsel %vm1083_vm3, %v4985_v59, %v1080_v22 }
 0x684   :  { %4994 = vrcp.f32 %v1321_v60  ;;  %v1364_v51 = vand.u32 2147483648, %v1321_v60  ;;  %v1118_v16 = vor.u32 1.1754944e-38, %v1117_v4  ;;  %vm1358_vm9 = vweird.f32 %v1321_v60 }
 0x685   :  { %1145 = vrot.lane.b32.xlu1 %v1137_v10, %s5399_s20  ;;  %v1088_v10 = vor.u32 1.1754944e-38, %v1087_v17  ;;  %v1362_v53 = vand.u32 2147483647, %v1321_v60 }
 0x687   :  { %v6060_v19 = vsel %vm1086_vm4, %v1088_v10, %v1084_v56  ;;  %v1115_v10 = vand.u32 2147483647, %v1060_v27  ;;  %vm1363_vm12 = vcmp.eq.f32.partialorder %v1362_v53, 8.507059e+37 }
 0x689   :  { %vm1116_vm10 = vcmp.eq.f32.partialorder %v1115_v10, 8.507059e+37 }
 0x68a   :  { %v1390_v5 = vpop.permute.xlu2 %1389 }
 0x68b   :  { %v1400_v25 = vmul.f32 %v1390_v5, %v6050_v29  ;;  %v4754_v5 = vmul.f32 -1.442695, %v6036_v58 }
 0x68d   :  { %1409 = vrot.lane.b32.xlu1 %v1400_v25, %s5399_s20  ;;  %v4991_v25 = vpop.eup %4990  ;;  %4996 = vpow2.f32 %v4754_v5 }
 0x68e   :  { %v1059_v13 = vadd.f32 1.0, %v4991_v25  ;;  %v4993_v35 = vpop.eup %4992 }
 0x68f   :  { %v4995_v14 = vpop.eup %4994  ;;  %v1107_v55 = vmul.f32 %v4993_v35, %v1060_v27  ;;  %vm1112_vm5 = vweird.f32 %v4993_v35  ;;  %v1365_v27 = vor.u32 1.1754944e-38, %v1364_v51 }
 0x690   :  { %4998 = vrcp.f32 %v1059_v13  ;;  %v1354_v44 = vmul.f32 %v4995_v14, %v1321_v60  ;;  %vm1113_vm7 = vmor %vm1111_vm6, %vm1112_vm5  ;;  %vm1359_vm8 = vweird.f32 %v4995_v14  ;;  %v1102_v60 = vand.u32 2147483648, %v1059_v13 }
 0x691   :  { %vm1360_vm11 = vmor %vm1358_vm9, %vm1359_vm8  ;;  %vm1096_vm14 = vweird.f32 %v1059_v13 }
 0x692   :  { %v1355_v3 = vsub.f32 1.0, %v1354_v44  ;;  %v1103_v4 = vor.u32 1.1754944e-38, %v1102_v60 }
 0x693   :  { %v4997_v59 = vpop.eup %4996 }
 0x694   :  { %v1388_v33 = vpop.permute.xlu0 %1387  ;;  %v1356_v17 = vmul.f32 %v4995_v14, %v1355_v3 }
 0x695   :  { %v1399_v11 = vmul.f32 %v1388_v33, %v6054_v1  ;;  %v1108_v33 = vsub.f32 1.0, %v1107_v55 }
 0x696   :  { %v4999_v0 = vpop.eup %4998 }
 0x697   :  { %1407 = vrot.lane.b32.xlu2 %v1399_v11, %s5399_s20  ;;  %v1322_v11 = vadd.f32 1.0, %v4997_v59  ;;  %v1109_v12 = vmul.f32 %v4993_v35, %v1108_v33  ;;  %v1092_v22 = vmul.f32 %v4999_v0, %v1059_v13  ;;  %vm1097_vm13 = vweird.f32 %v4999_v0 }
 0x698   :  { %vm1098_vm15 = vmor %vm1096_vm14, %vm1097_vm13 }
 0x699   :  { %5000 = vrcp.f32 %v1322_v11  ;;  %v1110_v63 = vadd.f32 %v4993_v35, %v1109_v12  ;;  %v1093_v56 = vsub.f32 1.0, %v1092_v22  ;;  %vm1373_vm3 = vweird.f32 %v1322_v11 }
 0x69a   :  { %v1377_v53 = vand.u32 2147483647, %v1322_v11 }
 0x69b   :  { %v1094_v5 = vmul.f32 %v4999_v0, %v1093_v56 }
 0x69c   :  { %vm1378_vm5 = vcmp.eq.f32.partialorder %v1377_v53, 8.507059e+37 }
 0x69d   :  { %v1095_v3 = vadd.f32 %v4999_v0, %v1094_v5 }
 0x69f   :  { %v5001_v54 = vpop.eup %5000 }
 0x6a0   :  { %v1369_v25 = vmul.f32 %v5001_v54, %v1322_v11  ;;  %vm1374_vm2 = vweird.f32 %v5001_v54 }
 0x6a1   :  { %vm1375_vm4 = vmor %vm1373_vm3, %vm1374_vm2 }
 0x6a2   :  { %v1370_v22 = vsub.f32 1.0, %v1369_v25 }
 0x6a4   :  { %v1371_v56 = vmul.f32 %v5001_v54, %v1370_v22 }
 0x6a6   :  { %v1372_v51 = vadd.f32 %v5001_v54, %v1371_v56 }
 0x6a8   :  { %v1128_v40 = vpop.permute.xlu1 %1127 }
 0x6a9   :  { %v1138_v31 = vmul.f32 %v1128_v40, %v6060_v19  ;;  %v1357_v40 = vadd.f32 %v4995_v14, %v1356_v17 }
 0x6ab   :  { %1147 = vrot.lane.b32.xlu0 %v1138_v31, %s5399_s20  ;;  %v1114_v31 = vsel %vm1113_vm7, %v4993_v35, %v1110_v63  ;;  %v1361_v44 = vsel %vm1360_vm11, %v4995_v14, %v1357_v40  ;;  %v1100_v63 = vand.u32 2147483647, %v1059_v13  ;;  %v1099_v14 = vsel %vm1098_vm15, %v4999_v0, %v1095_v3 }
 0x6ac   :  { %v6066_v55 = vsel %vm1116_vm10, %v1118_v16, %v1114_v31  ;;  %v6070_v35 = vsel %vm1363_vm12, %v1365_v27, %v1361_v44  ;;  %v1379_v16 = vand.u32 2147483648, %v1322_v11  ;;  %v1376_v13 = vsel %vm1375_vm4, %v5001_v54, %v1372_v51 }
 0x6ad   :  { %vm1101_vm1 = vcmp.eq.f32.partialorder %v1100_v63, 8.507059e+37 }
 0x6ae   :  { %v6074_v40 = vsel %vm1101_vm1, %v1103_v4, %v1099_v14  ;;  %v1380_v5 = vor.u32 1.1754944e-38, %v1379_v16 }
 0x6b0   :  { %v6078_v0 = vsel %vm1378_vm5, %v1380_v5, %v1376_v13 }
 0x6d1   :  { %v1132_v59 = vpop.permute.xlu2 %1131 }
 0x6d2   :  { %v1140_v33 = vmul.f32 %v1132_v59, %v6066_v55 }
 0x6d4   :  { %1151 = vrot.lane.b32.xlu1 %v1140_v33, %s5399_s20  ;;  %v1392_v12 = vpop.permute.xlu1 %1391 }
 0x6d5   :  { %v1401_v17 = vmul.f32 %v1392_v12, %v6070_v35 }
 0x6d7   :  { %1411 = vrot.lane.b32.xlu0 %v1401_v17, %s5399_s20 }
 0x6da   :  { %v1130_v10 = vpop.permute.xlu0 %1129 }
 0x6db   :  { %v1139_v31 = vmul.f32 %v1130_v10, %v6074_v40 }
 0x6dd   :  { %1149 = vrot.lane.b32.xlu2 %v1139_v31, %s5399_s20 }
 0x6e3   :  { %v1394_v25 = vpop.permute.xlu0 %1393 }
 0x6e4   :  { %v1402_v59 = vmul.f32 %v1394_v25, %v6078_v0 }
 0x6e6   :  { %1413 = vrot.lane.b32.xlu2 %v1402_v59, %s5399_s20  ;;  %v1452_v59 = vmul.f32 %v6050_v29, %v5891_v36  ;;  %v1429_v36 = vsub.f32 1.0, %v6070_v35 }
 0x6f1   :  { %v1408_v44 = vpop.permute.xlu2 %1407 }
 0x6f2   :  { %v1419_v33 = vadd.f32 %v1408_v44, %v6003_v37 }
 0x6f4   :  { %5002 = vtanh.f32 %v1419_v33 }
 0x6f7   :  { %v1146_v27 = vpop.permute.xlu1 %1145 }
 0x6f8   :  { %v1157_v3 = vadd.f32 %v1146_v27, %v6008_v43 }
 0x6fa   :  { %v5003_v12 = vpop.eup %5002  ;;  %5004 = vtanh.f32 %v1157_v3  ;;  %v1190_v3 = vmul.f32 %v6060_v19, %v5893_v23 }
 0x6fb   :  { %1435 = vrot.lane.b32.xlu1 %v5003_v12, %s5400_s21 }
 0x6ff   :  { %v1410_v11 = vpop.permute.xlu1 %1409 }
 0x700   :  { %v5005_v54 = vpop.eup %5004  ;;  %v1420_v60 = vadd.f32 %v1410_v11, %v6013_v41 }
 0x701   :  { %1173 = vrot.lane.b32.xlu0 %v5005_v54, %s5400_s21  ;;  %v1453_v54 = vmul.f32 %v6070_v35, %v5902_v57  ;;  %v1430_v57 = vsub.f32 1.0, %v6078_v0 }
 0x702   :  { %5006 = vtanh.f32 %v1420_v60 }
 0x708   :  { %v5007_v22 = vpop.eup %5006 }
 0x709   :  { %1437 = vrot.lane.b32.xlu0 %v5007_v22, %s5400_s21 }
 0x71d   :  { %v1148_v17 = vpop.permute.xlu0 %1147 }
 0x71e   :  { %v1158_v37 = vadd.f32 %v1148_v17, %v6018_v62 }
 0x720   :  { %5008 = vtanh.f32 %v1158_v37  ;;  %v1191_v37 = vmul.f32 %v6074_v40, %v5908_v18 }
 0x726   :  { %v5009_v63 = vpop.eup %5008 }
 0x727   :  { %1175 = vrot.lane.b32.xlu2 %v5009_v63, %s5400_s21 }
 0x737   :  { %v1150_v43 = vpop.permute.xlu2 %1149 }
 0x738   :  { %v1159_v14 = vadd.f32 %v1150_v43, %v6030_v15 }
 0x73a   :  { %5010 = vtanh.f32 %v1159_v14  ;;  %v1454_v14 = vmul.f32 %v6078_v0, %v5919_v32 }
 0x740   :  { %v5011_v4 = vpop.eup %5010  ;;  %v1414_v56 = vpop.permute.xlu2 %1413 }
 0x741   :  { %v1422_v41 = vadd.f32 %v1414_v56, %v6036_v58  ;;  %1177 = vrot.lane.b32.xlu1 %v5011_v4, %s5400_s21 }
 0x743   :  { %5012 = vtanh.f32 %v1422_v41 }
 0x746   :  { %v1152_v10 = vpop.permute.xlu1 %1151 }
 0x747   :  { %v1160_v31 = vadd.f32 %v1152_v10, %v6041_v50  ;;  %v1451_v50 = vmul.f32 %v6054_v1, %v5876_v26  ;;  %v1428_v26 = vsub.f32 1.0, %v6050_v29  ;;  %v1192_v10 = vmul.f32 %v6066_v55, %v5917_v48 }
 0x749   :  { %v5013_v51 = vpop.eup %5012  ;;  %5014 = vtanh.f32 %v1160_v31  ;;  %v1412_v62 = vpop.permute.xlu0 %1411 }
 0x74a   :  { %v1421_v16 = vadd.f32 %v1412_v62, %v6025_v2  ;;  %1441 = vrot.lane.b32.xlu1 %v5013_v51, %s5400_s21  ;;  %v1427_v2 = vsub.f32 1.0, %v6054_v1 }
 0x74c   :  { %5016 = vtanh.f32 %v1421_v16  ;;  %v6172_v16 = vld [vmem:[%s7802_s3 + $0x78] sm:$0xff] }
 0x74f   :  { %v5015_v15 = vpop.eup %5014 }
 0x750   :  { %1179 = vrot.lane.b32.xlu0 %v5015_v15, %s5400_s21  ;;  %v6179_v15 = vld [vmem:[%s7802_s3 + $0x70] sm:$0xff] }
 0x752   :  { %v5017_v53 = vpop.eup %5016  ;;  %1774 = vrot.lane.b32.xlu1 %v5563_v34, %s5398_s19  ;;  %v1165_v34 = vsub.f32 1.0, %v6046_v7 }
 0x753   :  { %1439 = vrot.lane.b32.xlu2 %v5017_v53, %s5400_s21  ;;  %v6185_v53 = vld [vmem:[%s7802_s3 + $0x68] sm:$0xff] }
 0x75a   :  { %1776 = vrot.lane.b32.xlu1 %v5570_v38, %s5398_s19 }
 0x762   :  { %1778 = vrot.lane.b32.xlu1 %v5575_v42, %s5398_s19  ;;  %v1189_v42 = vmul.f32 %v6046_v7, %v5882_v8  ;;  %v1166_v7 = vsub.f32 1.0, %v6060_v19  ;;  %v1167_v19 = vsub.f32 1.0, %v6074_v40  ;;  %v1168_v40 = vsub.f32 1.0, %v6066_v55 }
 0x76a   :  { %1780 = vrot.lane.b32.xlu1 %v5579_v46, %s5398_s19 }
 0x76d   :  { %v1436_v58 = vpop.permute.xlu1 %1435 }
 0x76e   :  { %v1447_v13 = vmul.f32 %v1436_v58, %v1427_v2  ;;  %v6191_v2 = vld [vmem:[%s7802_s3 + $0x60] sm:$0xff] }
 0x76f   :  { %v5367_v58 = vld [vmem:[%s7800_s2 + $0x40] ss:$8 sm:$0x3] }
 0x770   :  { %v6109_v5 = vadd.f32 %v1451_v50, %v1447_v13  ;;  %v111_v50 = vperm.slane %v5367_v58, 1 }
 0x772   :  { %1512 = vrot.lane.b32.xlu0 %v6109_v5, %s5400_s21 }
 0x773   :  { %v1174_v38 = vpop.permute.xlu0 %1173 }
 0x774   :  { %v1185_v25 = vmul.f32 %v1174_v38, %v1165_v34  ;;  %v173_v34 = vadd.f32 %v5756_v21, %v111_v50  ;;  %v176_v21 = vadd.f32 %v5758_v24, %v111_v50 }
 0x776   :  { %v6116_v46 = vadd.f32 %v1189_v42, %v1185_v25  ;;  %v6200_v42 = vmax.f32 %v173_v34, 0.0  ;;  %v6229_v24 = vmax.f32 %v176_v21, 0.0 }
 0x778   :  { %1463 = vrot.lane.b32.xlu2 %v6116_v46, %s5400_s21 }
 0x77b   :  { %v1438_v1 = vpop.permute.xlu0 %1437 }
 0x77c   :  { %v1448_v44 = vmul.f32 %v1438_v1, %v1428_v26  ;;  %v6209_v26 = vld [vmem:[%s7802_s3 + $0x58] sm:$0xff]  ;;  %v6218_v1 = vld [vmem:[%s7802_s3 + $0x50] sm:$0xff] }
 0x77e   :  { %v6123_v33 = vadd.f32 %v1452_v59, %v1448_v44  ;;  %v6226_v59 = vld [vmem:[%s7802_s3 + $0x48] sm:$0xff] }
 0x780   :  { %1514 = vrot.lane.b32.xlu0 %v6123_v33, %s5400_s21 }
 0x781   :  { %v1176_v27 = vpop.permute.xlu2 %1175 }
 0x782   :  { %v1186_v12 = vmul.f32 %v1176_v27, %v1166_v7 }
 0x784   :  { %v6130_v11 = vadd.f32 %v1190_v3, %v1186_v12 }
 0x786   :  { %1465 = vrot.lane.b32.xlu2 %v6130_v11, %s5400_s21 }
 0x7ad   :  { %v1440_v29 = vpop.permute.xlu2 %1439 }
 0x7ae   :  { %v1449_v60 = vmul.f32 %v1440_v29, %v1429_v36 }
 0x7b0   :  { %v6137_v22 = vadd.f32 %v1453_v54, %v1449_v60  ;;  %v6269_v54 = vld [vmem:[%s7802_s3 + $0x88] ss:$0 sm:$0xff] }
 0x7b2   :  { %1516 = vrot.lane.b32.xlu0 %v6137_v22, %s5400_s21 }
 0x7b3   :  { %v1178_v17 = vpop.permute.xlu1 %1177 }
 0x7b4   :  { %v1187_v63 = vmul.f32 %v1178_v17, %v1167_v19 }
 0x7b6   :  { %v6144_v43 = vadd.f32 %v1191_v37, %v1187_v63 }
 0x7b8   :  { %7827 = vst [vmem:[#allocation6_spill] sm:$0xff] %v6144_v43  ;;  %1467 = vrot.lane.b32.xlu2 %v6144_v43, %s5400_s21 }
 0x7bc   :  { %v1442_v35 = vpop.permute.xlu1 %1441 }
 0x7bd   :  { %v1450_v4 = vmul.f32 %v1442_v35, %v1430_v57 }
 0x7bf   :  { %v6151_v56 = vadd.f32 %v1454_v14, %v1450_v4 }
 0x7c1   :  { %1518 = vrot.lane.b32.xlu0 %v6151_v56, %s5400_s21 }
 0x7c2   :  { %v1180_v41 = vpop.permute.xlu0 %1179 }
 0x7c3   :  { %v1188_v31 = vmul.f32 %v1180_v41, %v1168_v40 }
 0x7c4   :  { %v1775_v51 = vpop.permute.xlu1 %1774 }
 0x7c5   :  { %v6158_v62 = vadd.f32 %v1192_v10, %v1188_v31  ;;  %4771 = vmatmul.msk.f32.vlgmr.msra.gmra.mxu1 %vm32_vm0, %v1775_v51 }
 0x7c6   :  { %2830 = vmatpush.msra.mxu1 %v5929_v9 }
 0x7c7   :  { %7828 = vst [vmem:[#allocation7_spill] sm:$0xff] %v6158_v62  ;;  %1469 = vrot.lane.b32.xlu2 %v6158_v62, %s5400_s21 }
 0x7c8   :  { %2831 = vmatpush.msra.mxu1 %v5935_v61 }
 0x7ca   :  { %2832 = vmatpush.msra.mxu1 %v5941_v30 }
 0x7cc   :  { %v1777_v32 = vpop.permute.xlu1 %1776  ;;  %2833 = vmatpush.msra.mxu1 %v5947_v20 }
 0x7cd   :  { %4772 = vmatmul.msk.f32.gmra.mxu1 %vm32_vm0, %v1777_v32 }
 0x7d2   :  { %v1464_v55 = vpop.permute.xlu2 %1463 }
 0x7d3   :  { %4755 = vmatmul.msk.f32.vlgmr.msrb.gmra.mxu2 %vm32_vm0, %v1464_v55 }
 0x7d4   :  { %v1779_v0 = vpop.permute.xlu1 %1778  ;;  %2519 = vmatpush.msrb.mxu2 %v6172_v16 }
 0x7d5   :  { %4773 = vmatmul.msk.f32.gmra.mxu1 %vm32_vm0, %v1779_v0 }
 0x7d6   :  { %2520 = vmatpush.msrb.mxu2 %v6179_v15 }
 0x7d8   :  { %2521 = vmatpush.msrb.mxu2 %v6185_v53 }
 0x7da   :  { %2522 = vmatpush.msrb.mxu2 %v6191_v2 }
 0x7dc   :  { %v1781_v13 = vpop.permute.xlu1 %1780 }
 0x7dd   :  { %4774 = vmatmul.msk.f32.gmra.mxu1 %vm32_vm0, %v1781_v13 }
 0x7e0   :  { %v1466_v38 = vpop.permute.xlu2 %1465 }
 0x7e1   :  { %4756 = vmatmul.msk.f32.gmra.mxu2 %vm32_vm0, %v1466_v38 }
 0x7e4   :  { %v1513_v25 = vpop.permute.xlu0 %1512 }
 0x7e5   :  { %4795 = vmatmul.msk.f32.vlgmr.msrb.gmra.mxu1 %vm32_vm0, %v6200_v42  ;;  %4759 = vmatmul.msk.f32.vlgmr.msrb.gmra.mxu3 %vm32_vm0, %v1513_v25 }
 0x7e6   :  { %4767 = vmatmul.msk.f32.vlgmr.msra.gmra.mxu0 %vm32_vm0, %v1513_v25  ;;  %2568 = vmatpush.msrb.mxu3 %v6209_v26 }
 0x7e7   :  { %2785 = vmatpush.msra.mxu0 %v5965_v39  ;;  %3346 = vmatpush.msrb.mxu1 %v5929_v9  ;;  %v6236_v9 = vld [vmem:[%s7802_s3 + $0x40] sm:$0xff] }
 0x7e8   :  { %2569 = vmatpush.msrb.mxu3 %v6218_v1 }
 0x7e9   :  { %2786 = vmatpush.msra.mxu0 %v5972_v47  ;;  %3347 = vmatpush.msrb.mxu1 %v5935_v61  ;;  %v179_v61 = vadd.f32 %v5760_v28, %v111_v50 }
 0x7ea   :  { %2570 = vmatpush.msrb.mxu3 %v6226_v59 }
 0x7eb   :  { %2787 = vmatpush.msra.mxu0 %v5979_v45  ;;  %3348 = vmatpush.msrb.mxu1 %v5941_v30  ;;  %v6244_v47 = vmax.f32 %v179_v61, 0.0  ;;  %v182_v30 = vadd.f32 %v5762_v6, %v111_v50 }
 0x7ec   :  { %2571 = vmatpush.msrb.mxu3 %v6236_v9 }
 0x7ed   :  { %4796 = vmatmul.msk.f32.gmra.mxu1 %vm32_vm0, %v6229_v24  ;;  %2788 = vmatpush.msra.mxu0 %v5986_v49  ;;  %v6251_v45 = vmax.f32 %v182_v30, 0.0 }
 0x7ee   :  { %3349 = vmatpush.msrb.mxu1 %v5947_v20 }
 0x7f2   :  { %v1515_v39 = vpop.permute.xlu0 %1514 }
 0x7f3   :  { %4760 = vmatmul.msk.f32.gmra.mxu3 %vm32_vm0, %v1515_v39  ;;  %4768 = vmatmul.msk.f32.gmra.mxu0 %vm32_vm0, %v1515_v39 }
 0x7f5   :  { %4797 = vmatmul.msk.f32.gmra.mxu1 %vm32_vm0, %v6244_v47 }
 0x7fd   :  { %4798 = vmatmul.msk.f32.gmra.mxu1 %vm32_vm0, %v6251_v45 }
 0x812   :  { %v1468_v20 = vpop.permute.xlu2 %1467 }
 0x813   :  { %4757 = vmatmul.msk.f32.gmra.mxu2 %vm32_vm0, %v1468_v20 }
 0x821   :  { %v1470_v28 = vpop.permute.xlu2 %1469 }
 0x822   :  { %4758 = vmatmul.msk.f32.gmra.mxu2 %vm32_vm0, %v1470_v28 }
 0x824   :  { %v1517_v49 = vpop.permute.xlu0 %1516 }
 0x825   :  { %4761 = vmatmul.msk.f32.gmra.mxu3 %vm32_vm0, %v1517_v49  ;;  %4769 = vmatmul.msk.f32.gmra.mxu0 %vm32_vm0, %v1517_v49 }
 0x833   :  { %v1519_v44 = vpop.permute.xlu0 %1518 }
 0x834   :  { %4762 = vmatmul.msk.f32.gmra.mxu3 %vm32_vm0, %v1519_v44  ;;  %4770 = vmatmul.msk.f32.gmra.mxu0 %vm32_vm0, %v1519_v44 }
 0x842   :  { %v1807_v6 = vpop.f32.mrf.mxu1 }
 0x84a   :  { %v1810_v19 = vpop.f32.mrf.mxu1 }
 0x852   :  { %v1813_v41 = vpop.f32.mrf.mxu1 }
 0x856   :  { %v1496_v12 = vpop.f32.mrf.mxu2 }
 0x85a   :  { %v1816_v39 = vpop.f32.mrf.mxu1 }
 0x863   :  { %v1762_v7 = vpop.f32.mrf.mxu0 }
 0x864   :  { %v1808_v27 = vadd.f32 %v1807_v6, %v1762_v7  ;;  %v1499_v57 = vpop.f32.mrf.mxu2 }
 0x866   :  { %v6262_v3 = vadd.f32 %v6000_v52, %v1808_v27 }
 0x868   :  { %1903 = vrot.lane.b32.xlu0 %v6262_v3, %s5398_s19  ;;  %v1545_v36 = vpop.f32.mrf.mxu3  ;;  %v4775_v25 = vmul.f32 -1.442695, %v6262_v3 }
 0x869   :  { %v1546_v29 = vadd.f32 %v1545_v36, %v1496_v12 }
 0x86b   :  { %v6272_v60 = vadd.f32 %v6269_v54, %v1546_v29 }
 0x86d   :  { %1641 = vrot.lane.b32.xlu2 %v6272_v60, %s5398_s19  ;;  %v4763_v40 = vmul.f32 -1.442695, %v6272_v60 }
 0x86f   :  { %5018 = vpow2.f32 %v4763_v40 }
 0x870   :  { %v1765_v17 = vpop.f32.mrf.mxu0 }
 0x871   :  { %v1811_v37 = vadd.f32 %v1810_v19, %v1765_v17 }
 0x873   :  { %v6277_v63 = vadd.f32 %v6000_v52, %v1811_v37 }
 0x875   :  { %1905 = vrot.lane.b32.xlu2 %v6277_v63, %s5398_s19  ;;  %v4776_v10 = vmul.f32 -1.442695, %v6277_v63  ;;  %v5019_v32 = vpop.eup %5018 }
 0x876   :  { %v1548_v35 = vpop.f32.mrf.mxu3  ;;  %v1573_v0 = vadd.f32 1.0, %v5019_v32 }
 0x877   :  { %v1549_v14 = vadd.f32 %v1548_v35, %v1499_v57  ;;  %5020 = vpow2.f32 %v4776_v10 }
 0x878   :  { %5022 = vrcp.f32 %v1573_v0  ;;  %vm1582_vm7 = vweird.f32 %v1573_v0  ;;  %v1586_v40 = vand.u32 2147483647, %v1573_v0 }
 0x879   :  { %v6282_v4 = vadd.f32 %v6269_v54, %v1549_v14  ;;  %5024 = vpow2.f32 %v4775_v25  ;;  %v1588_v14 = vand.u32 2147483648, %v1573_v0 }
 0x87a   :  { %vm1587_vm9 = vcmp.eq.f32.partialorder %v1586_v40, 8.507059e+37 }
 0x87b   :  { %1643 = vrot.lane.b32.xlu1 %v6282_v4, %s5398_s19  ;;  %v4764_v37 = vmul.f32 -1.442695, %v6282_v4 }
 0x87d   :  { %v5021_v38 = vpop.eup %5020 }
 0x87e   :  { %v1836_v21 = vadd.f32 1.0, %v5021_v38  ;;  %v5023_v61 = vpop.eup %5022 }
 0x87f   :  { %v1578_v49 = vmul.f32 %v5023_v61, %v1573_v0  ;;  %v5025_v44 = vpop.eup %5024  ;;  %vm1583_vm6 = vweird.f32 %v5023_v61 }
 0x880   :  { %5026 = vrcp.f32 %v1836_v21  ;;  %v1835_v29 = vadd.f32 1.0, %v5025_v44  ;;  %vm1584_vm8 = vmor %vm1582_vm7, %vm1583_vm6  ;;  %v1865_v25 = vand.u32 2147483648, %v1836_v21  ;;  %vm1859_vm11 = vweird.f32 %v1836_v21 }
 0x881   :  { %v1579_v12 = vsub.f32 1.0, %v1578_v49  ;;  %v1863_v0 = vand.u32 2147483647, %v1836_v21 }
 0x882   :  { %5028 = vrcp.f32 %v1835_v29  ;;  %v1866_v49 = vor.u32 1.1754944e-38, %v1865_v25  ;;  %vm1844_vm15 = vweird.f32 %v1835_v29 }
 0x883   :  { %v1580_v17 = vmul.f32 %v5023_v61, %v1579_v12  ;;  %5030 = vpow2.f32 %v4764_v37  ;;  %vm1864_vm13 = vcmp.eq.f32.partialorder %v1863_v0, 8.507059e+37 }
 0x885   :  { %v1581_v57 = vadd.f32 %v5023_v61, %v1580_v17  ;;  %v1850_v17 = vand.u32 2147483648, %v1835_v29 }
 0x886   :  { %v5027_v36 = vpop.eup %5026 }
 0x887   :  { %v1585_v10 = vsel %vm1584_vm8, %v5023_v61, %v1581_v57  ;;  %vm1860_vm10 = vweird.f32 %v5027_v36  ;;  %v1851_v37 = vor.u32 1.1754944e-38, %v1850_v17 }
 0x888   :  { %vm1861_vm12 = vmor %vm1859_vm11, %vm1860_vm10 }
 0x896   :  { %v1502_v58 = vpop.f32.mrf.mxu2 }
 0x8a2   :  { %v1768_v31 = vpop.f32.mrf.mxu0 }
 0x8a3   :  { %v1814_v51 = vadd.f32 %v1813_v41, %v1768_v31  ;;  %v5029_v41 = vpop.eup %5028 }
 0x8a4   :  { %vm1845_vm14 = vweird.f32 %v5029_v41 }
 0x8a5   :  { %v6289_v55 = vadd.f32 %v6000_v52, %v1814_v51  ;;  %v1505_v6 = vpop.f32.mrf.mxu2  ;;  %v1589_v51 = vor.u32 1.1754944e-38, %v1588_v14  ;;  %vm1846_vm1 = vmor %vm1844_vm15, %vm1845_vm14 }
 0x8a7   :  { %1907 = vrot.lane.b32.xlu1 %v6289_v55, %s5398_s19  ;;  %v6310_v32 = vsel %vm1587_vm9, %v1589_v51, %v1585_v10 }
 0x8a8   :  { %v1551_v50 = vpop.f32.mrf.mxu3 }
 0x8a9   :  { %v1552_v13 = vadd.f32 %v1551_v50, %v1502_v58  ;;  %v1840_v50 = vmul.f32 %v5029_v41, %v1835_v29 }
 0x8ab   :  { %v6294_v34 = vadd.f32 %v6269_v54, %v1552_v13 }
 0x8ad   :  { %1645 = vrot.lane.b32.xlu0 %v6294_v34, %s5398_s19 }
 0x8b1   :  { %v1771_v30 = vpop.f32.mrf.mxu0 }
 0x8b2   :  { %v1817_v20 = vadd.f32 %v1816_v39, %v1771_v30  ;;  %v5031_v39 = vpop.eup %5030  ;;  %v1841_v30 = vsub.f32 1.0, %v1840_v50 }
 0x8b4   :  { %v6300_v28 = vadd.f32 %v6000_v52, %v1817_v20  ;;  %v1855_v52 = vmul.f32 %v5027_v36, %v1836_v21  ;;  %v1574_v20 = vadd.f32 1.0, %v5031_v39  ;;  %v1848_v21 = vand.u32 2147483647, %v1835_v29 }
 0x8b6   :  { %1909 = vrot.lane.b32.xlu0 %v6300_v28, %s5398_s19  ;;  %v1856_v35 = vsub.f32 1.0, %v1855_v52  ;;  %5032 = vrcp.f32 %v1574_v20  ;;  %vm1849_vm2 = vcmp.eq.f32.partialorder %v1848_v21, 8.507059e+37  ;;  %vm1597_vm4 = vweird.f32 %v1574_v20 }
 0x8b7   :  { %v1554_v7 = vpop.f32.mrf.mxu3  ;;  %v1601_v29 = vand.u32 2147483647, %v1574_v20 }
 0x8b8   :  { %v1555_v27 = vadd.f32 %v1554_v7, %v1505_v6  ;;  %v1857_v31 = vmul.f32 %v5027_v36, %v1856_v35  ;;  %v1842_v7 = vmul.f32 %v5029_v41, %v1841_v30  ;;  %v4765_v30 = vmul.f32 -1.442695, %v6294_v34 }
 0x8b9   :  { %vm1602_vm6 = vcmp.eq.f32.partialorder %v1601_v29, 8.507059e+37 }
 0x8ba   :  { %v6305_v19 = vadd.f32 %v6269_v54, %v1555_v27  ;;  %v1858_v38 = vadd.f32 %v5027_v36, %v1857_v31  ;;  %v1843_v12 = vadd.f32 %v5029_v41, %v1842_v7  ;;  %v4778_v7 = vmul.f32 -1.442695, %v6300_v28 }
 0x8bc   :  { %1647 = vrot.lane.b32.xlu2 %v6305_v19, %s5398_s19  ;;  %v1862_v61 = vsel %vm1861_vm12, %v5027_v36, %v1858_v38  ;;  %v5033_v52 = vpop.eup %5032  ;;  %v1847_v36 = vsel %vm1846_vm1, %v5029_v41, %v1843_v12  ;;  %v4766_v50 = vmul.f32 -1.442695, %v6305_v19  ;;  %v4777_v38 = vmul.f32 -1.442695, %v6289_v55 }
 0x8bd   :  { %v6314_v44 = vsel %vm1864_vm13, %v1866_v49, %v1862_v61  ;;  %v6318_v57 = vsel %vm1849_vm2, %v1851_v37, %v1847_v36  ;;  %v1593_v14 = vmul.f32 %v5033_v52, %v1574_v20  ;;  %vm1598_vm3 = vweird.f32 %v5033_v52 }
 0x8be   :  { %vm1599_vm5 = vmor %vm1597_vm4, %vm1598_vm3  ;;  %5034 = vpow2.f32 %v4766_v50 }
 0x8bf   :  { %v1594_v10 = vsub.f32 1.0, %v1593_v14  ;;  %5036 = vpow2.f32 %v4777_v38 }
 0x8c0   :  { %5038 = vpow2.f32 %v4765_v30 }
 0x8c1   :  { %v1595_v31 = vmul.f32 %v5033_v52, %v1594_v10 }
 0x8c3   :  { %v1596_v51 = vadd.f32 %v5033_v52, %v1595_v31 }
 0x8c4   :  { %v5035_v61 = vpop.eup %5034 }
 0x8c5   :  { %v1600_v41 = vsel %vm1599_vm5, %v5033_v52, %v1596_v51  ;;  %v1576_v49 = vadd.f32 1.0, %v5035_v61 }
 0x8c7   :  { %v1642_v58 = vpop.permute.xlu2 %1641  ;;  %5040 = vrcp.f32 %v1576_v49  ;;  %v1633_v50 = vand.u32 2147483648, %v1576_v49  ;;  %vm1627_vm8 = vweird.f32 %v1576_v49 }
 0x8c8   :  { %v1653_v13 = vmul.f32 %v1642_v58, %v6310_v32  ;;  %v1603_v58 = vand.u32 2147483648, %v1574_v20  ;;  %v5037_v20 = vpop.eup %5036 }
 0x8c9   :  { %v1634_v61 = vor.u32 1.1754944e-38, %v1633_v50 }
 0x8ca   :  { %1661 = vrot.lane.b32.xlu1 %v1653_v13, %s5399_s20  ;;  %v1604_v13 = vor.u32 1.1754944e-38, %v1603_v58 }
 0x8cc   :  { %v6324_v39 = vsel %vm1602_vm6, %v1604_v13, %v1600_v41  ;;  %v1631_v13 = vand.u32 2147483647, %v1576_v49 }
 0x8ce   :  { %vm1632_vm12 = vcmp.eq.f32.partialorder %v1631_v13, 8.507059e+37 }
 0x8cf   :  { %v1906_v6 = vpop.permute.xlu2 %1905 }
 0x8d0   :  { %v1916_v27 = vmul.f32 %v1906_v6, %v6314_v44  ;;  %v1837_v6 = vadd.f32 1.0, %v5037_v20 }
 0x8d2   :  { %1925 = vrot.lane.b32.xlu1 %v1916_v27, %s5399_s20  ;;  %v5039_v27 = vpop.eup %5038  ;;  %5042 = vrcp.f32 %v1837_v6  ;;  %v1880_v30 = vand.u32 2147483648, %v1837_v6  ;;  %vm1874_vm11 = vweird.f32 %v1837_v6  ;;  %v1878_v20 = vand.u32 2147483647, %v1837_v6 }
 0x8d3   :  { %v1575_v12 = vadd.f32 1.0, %v5039_v27  ;;  %5044 = vpow2.f32 %v4778_v7  ;;  %v5041_v17 = vpop.eup %5040 }
 0x8d4   :  { %v1623_v52 = vmul.f32 %v5041_v17, %v1576_v49  ;;  %vm1628_vm7 = vweird.f32 %v5041_v17  ;;  %v1881_v49 = vor.u32 1.1754944e-38, %v1880_v30  ;;  %vm1879_vm14 = vcmp.eq.f32.partialorder %v1878_v20, 8.507059e+37 }
 0x8d5   :  { %5046 = vrcp.f32 %v1575_v12  ;;  %vm1629_vm9 = vmor %vm1627_vm8, %vm1628_vm7  ;;  %vm1612_vm1 = vweird.f32 %v1575_v12 }
 0x8d8   :  { %v5043_v21 = vpop.eup %5042 }
 0x8d9   :  { %v5045_v36 = vpop.eup %5044  ;;  %v1870_v37 = vmul.f32 %v5043_v21, %v1837_v6  ;;  %vm1875_vm10 = vweird.f32 %v5043_v21  ;;  %v1618_v6 = vand.u32 2147483648, %v1575_v12 }
 0x8da   :  { %v1904_v35 = vpop.permute.xlu0 %1903  ;;  %v1838_v14 = vadd.f32 1.0, %v5045_v36  ;;  %vm1876_vm13 = vmor %vm1874_vm11, %vm1875_vm10 }
 0x8db   :  { %v1915_v40 = vmul.f32 %v1904_v35, %v6318_v57  ;;  %v1624_v35 = vsub.f32 1.0, %v1623_v52  ;;  %v1871_v10 = vsub.f32 1.0, %v1870_v37  ;;  %v1619_v50 = vor.u32 1.1754944e-38, %v1618_v6 }
 0x8dc   :  { %5048 = vrcp.f32 %v1838_v14  ;;  %vm1889_vm5 = vweird.f32 %v1838_v14  ;;  %v1893_v20 = vand.u32 2147483647, %v1838_v14 }
 0x8dd   :  { %1923 = vrot.lane.b32.xlu2 %v1915_v40, %s5399_s20  ;;  %v5047_v40 = vpop.eup %5046  ;;  %v1625_v31 = vmul.f32 %v5041_v17, %v1624_v35  ;;  %v1872_v58 = vmul.f32 %v5043_v21, %v1871_v10 }
 0x8de   :  { %v1608_v51 = vmul.f32 %v5047_v40, %v1575_v12  ;;  %vm1613_vm15 = vweird.f32 %v5047_v40  ;;  %vm1894_vm7 = vcmp.eq.f32.partialorder %v1893_v20, 8.507059e+37 }
 0x8df   :  { %v1626_v29 = vadd.f32 %v5041_v17, %v1625_v31  ;;  %vm1614_vm2 = vmor %vm1612_vm1, %vm1613_vm15 }
 0x8e0   :  { %v1609_v41 = vsub.f32 1.0, %v1608_v51 }
 0x8e2   :  { %v5049_v38 = vpop.eup %5048  ;;  %v1610_v7 = vmul.f32 %v5047_v40, %v1609_v41 }
 0x8e3   :  { %v1885_v27 = vmul.f32 %v5049_v38, %v1838_v14  ;;  %vm1890_vm4 = vweird.f32 %v5049_v38 }
 0x8e4   :  { %v1611_v10 = vadd.f32 %v5047_v40, %v1610_v7  ;;  %vm1891_vm6 = vmor %vm1889_vm5, %vm1890_vm4 }
 0x8e5   :  { %v1886_v51 = vsub.f32 1.0, %v1885_v27 }
 0x8e7   :  { %v1887_v41 = vmul.f32 %v5049_v38, %v1886_v51 }
 0x8e9   :  { %v1888_v30 = vadd.f32 %v5049_v38, %v1887_v41 }
 0x8ed   :  { %v1644_v25 = vpop.permute.xlu1 %1643 }
 0x8ee   :  { %v1654_v0 = vmul.f32 %v1644_v25, %v6324_v39  ;;  %v1873_v25 = vadd.f32 %v5043_v21, %v1872_v58 }
 0x8f0   :  { %1663 = vrot.lane.b32.xlu0 %v1654_v0, %s5399_s20  ;;  %v1630_v0 = vsel %vm1629_vm9, %v5041_v17, %v1626_v29  ;;  %v1877_v37 = vsel %vm1876_vm13, %v5043_v21, %v1873_v25  ;;  %v1616_v29 = vand.u32 2147483647, %v1575_v12  ;;  %v1615_v21 = vsel %vm1614_vm2, %v5047_v40, %v1611_v10 }
 0x8f1   :  { %v6330_v52 = vsel %vm1632_vm12, %v1634_v61, %v1630_v0  ;;  %v6334_v17 = vsel %vm1879_vm14, %v1881_v49, %v1877_v37  ;;  %v1895_v61 = vand.u32 2147483648, %v1838_v14  ;;  %v1892_v12 = vsel %vm1891_vm6, %v5049_v38, %v1888_v30 }
 0x8f2   :  { %vm1617_vm3 = vcmp.eq.f32.partialorder %v1616_v29, 8.507059e+37 }
 0x8f3   :  { %v6338_v25 = vsel %vm1617_vm3, %v1619_v50, %v1615_v21  ;;  %v1896_v7 = vor.u32 1.1754944e-38, %v1895_v61 }
 0x8f5   :  { %v6342_v40 = vsel %vm1894_vm7, %v1896_v7, %v1892_v12 }
 0x916   :  { %v1648_v36 = vpop.permute.xlu2 %1647 }
 0x917   :  { %v1656_v35 = vmul.f32 %v1648_v36, %v6330_v52 }
 0x919   :  { %1667 = vrot.lane.b32.xlu1 %v1656_v35, %s5399_s20  ;;  %v1908_v31 = vpop.permute.xlu1 %1907 }
 0x91a   :  { %v1917_v58 = vmul.f32 %v1908_v31, %v6334_v17 }
 0x91c   :  { %1927 = vrot.lane.b32.xlu0 %v1917_v58, %s5399_s20 }
 0x91f   :  { %v1646_v13 = vpop.permute.xlu0 %1645 }
 0x920   :  { %v1655_v0 = vmul.f32 %v1646_v13, %v6338_v25 }
 0x922   :  { %1665 = vrot.lane.b32.xlu2 %v1655_v0, %s5399_s20 }
 0x928   :  { %v1910_v27 = vpop.permute.xlu0 %1909 }
 0x929   :  { %v1918_v36 = vmul.f32 %v1910_v27, %v6342_v40 }
 0x92b   :  { %1929 = vrot.lane.b32.xlu2 %v1918_v36, %s5399_s20 }
 0x937   :  { %v1924_v37 = vpop.permute.xlu2 %1923 }
 0x938   :  { %v1935_v35 = vadd.f32 %v1924_v37, %v6262_v3  ;;  %v1705_v37 = vmul.f32 %v6310_v32, %v6116_v46 }
 0x93a   :  { %5050 = vtanh.f32 %v1935_v35 }
 0x93c   :  { %v1662_v49 = vpop.permute.xlu1 %1661 }
 0x93d   :  { %v1673_v10 = vadd.f32 %v1662_v49, %v6272_v60 }
 0x93f   :  { %5052 = vtanh.f32 %v1673_v10  ;;  %v1968_v10 = vmul.f32 %v6314_v44, %v6123_v33  ;;  %v1945_v33 = vsub.f32 1.0, %v6334_v17 }
 0x940   :  { %v5051_v14 = vpop.eup %5050 }
 0x941   :  { %1951 = vrot.lane.b32.xlu1 %v5051_v14, %s5400_s21 }
 0x944   :  { %v1926_v38 = vpop.permute.xlu1 %1925 }
 0x945   :  { %v5053_v31 = vpop.eup %5052  ;;  %v1936_v6 = vadd.f32 %v1926_v38, %v6277_v63 }
 0x946   :  { %1689 = vrot.lane.b32.xlu0 %v5053_v31, %s5400_s21 }
 0x947   :  { %5054 = vtanh.f32 %v1936_v6  ;;  %v1706_v6 = vmul.f32 %v6324_v39, %v6130_v11 }
 0x94d   :  { %v5055_v51 = vpop.eup %5054 }
 0x94e   :  { %1953 = vrot.lane.b32.xlu0 %v5055_v51, %s5400_s21 }
 0x962   :  { %v1664_v58 = vpop.permute.xlu0 %1663 }
 0x963   :  { %v1674_v3 = vadd.f32 %v1664_v58, %v6282_v4 }
 0x965   :  { %5056 = vtanh.f32 %v1674_v3  ;;  %v1969_v3 = vmul.f32 %v6334_v17, %v6137_v22  ;;  %v1946_v22 = vsub.f32 1.0, %v6342_v40 }
 0x96b   :  { %v5057_v29 = vpop.eup %5056 }
 0x96c   :  { %1691 = vrot.lane.b32.xlu2 %v5057_v29, %s5400_s21 }
 0x97c   :  { %v1666_v60 = vpop.permute.xlu2 %1665 }
 0x97d   :  { %v1675_v21 = vadd.f32 %v1666_v60, %v6294_v34 }
 0x97f   :  { %5058 = vtanh.f32 %v1675_v21 }
 0x985   :  { %v5059_v50 = vpop.eup %5058  ;;  %v1930_v41 = vpop.permute.xlu2 %1929 }
 0x986   :  { %v1938_v63 = vadd.f32 %v1930_v41, %v6300_v28  ;;  %1693 = vrot.lane.b32.xlu1 %v5059_v50, %s5400_s21  ;;  %v1943_v28 = vsub.f32 1.0, %v6318_v57  ;;  %v1707_v50 = vmul.f32 %v6338_v25, %v6144_v43 }
 0x988   :  { %5060 = vtanh.f32 %v1938_v63 }
 0x98b   :  { %v1668_v13 = vpop.permute.xlu1 %1667 }
 0x98c   :  { %v1676_v0 = vadd.f32 %v1668_v13, %v6305_v19  ;;  %v1967_v19 = vmul.f32 %v6318_v57, %v6109_v5  ;;  %v1944_v5 = vsub.f32 1.0, %v6314_v44  ;;  %v1970_v13 = vmul.f32 %v6342_v40, %v6151_v56 }
 0x98e   :  { %v5061_v30 = vpop.eup %5060  ;;  %5062 = vtanh.f32 %v1676_v0  ;;  %v1928_v4 = vpop.permute.xlu0 %1927 }
 0x98f   :  { %v1937_v61 = vadd.f32 %v1928_v4, %v6289_v55  ;;  %1957 = vrot.lane.b32.xlu1 %v5061_v30, %s5400_s21  ;;  %v1681_v55 = vsub.f32 1.0, %v6310_v32  ;;  %v1682_v32 = vsub.f32 1.0, %v6324_v39  ;;  %v1683_v39 = vsub.f32 1.0, %v6338_v25 }
 0x990   :  { %v1684_v25 = vsub.f32 1.0, %v6330_v52 }
 0x991   :  { %5064 = vtanh.f32 %v1937_v61  ;;  %v1708_v61 = vmul.f32 %v6330_v52, %v6158_v62  ;;  %v6429_v52 = vld [vmem:[%s7802_s3 + $0x38] sm:$0xff] }
 0x994   :  { %v5063_v34 = vpop.eup %5062 }
 0x995   :  { %1695 = vrot.lane.b32.xlu0 %v5063_v34, %s5400_s21 }
 0x997   :  { %v5065_v20 = vpop.eup %5064 }
 0x998   :  { %1955 = vrot.lane.b32.xlu2 %v5065_v20, %s5400_s21 }
 0x9b3   :  { %v1952_v12 = vpop.permute.xlu1 %1951 }
 0x9b4   :  { %v1963_v7 = vmul.f32 %v1952_v12, %v1943_v28  ;;  %v2319_v12 = vpop.f32.mrf.mxu1 }
 0x9b6   :  { %v6365_v27 = vadd.f32 %v1967_v19, %v1963_v7 }
 0x9b8   :  { %2028 = vrot.lane.b32.xlu0 %v6365_v27, %s5400_s21  ;;  %v1690_v36 = vpop.permute.xlu0 %1689 }
 0x9b9   :  { %v1701_v35 = vmul.f32 %v1690_v36, %v1681_v55  ;;  %v6465_v55 = vld [vmem:[%s7802_s3 + $0x80] ss:$0 sm:$0xff] }
 0x9bb   :  { %v6372_v49 = vadd.f32 %v1705_v37, %v1701_v35 }
 0x9bd   :  { %1979 = vrot.lane.b32.xlu2 %v6372_v49, %s5400_s21 }
 0x9c0   :  { %v1954_v57 = vpop.permute.xlu0 %1953 }
 0x9c1   :  { %v1964_v14 = vmul.f32 %v1954_v57, %v1944_v5 }
 0x9c3   :  { %v6379_v38 = vadd.f32 %v1968_v10, %v1964_v14  ;;  %v2322_v14 = vpop.f32.mrf.mxu1 }
 0x9c5   :  { %2030 = vrot.lane.b32.xlu2 %v6379_v38, %s5400_s21 }
 0x9c6   :  { %v1692_v31 = vpop.permute.xlu2 %1691 }
 0x9c7   :  { %v1702_v51 = vmul.f32 %v1692_v31, %v1682_v32 }
 0x9c9   :  { %v6386_v58 = vadd.f32 %v1706_v6, %v1702_v51 }
 0x9cb   :  { %7829 = vst [vmem:[#allocation8_spill] sm:$0xff] %v6386_v58  ;;  %1981 = vrot.lane.b32.xlu1 %v6386_v58, %s5400_s21 }
 0x9f2   :  { %v1956_v44 = vpop.permute.xlu2 %1955 }
 0x9f3   :  { %v1965_v29 = vmul.f32 %v1956_v44, %v1945_v33 }
 0x9f5   :  { %v6393_v60 = vadd.f32 %v1969_v3, %v1965_v29 }
 0x9f7   :  { %2032 = vrot.lane.b32.xlu1 %v6393_v60, %s5400_s21 }
 0x9f8   :  { %v1694_v21 = vpop.permute.xlu1 %1693 }
 0x9f9   :  { %v1703_v41 = vmul.f32 %v1694_v21, %v1683_v39  ;;  %v2325_v39 = vpop.f32.mrf.mxu1 }
 0x9fb   :  { %v6400_v63 = vadd.f32 %v1707_v50, %v1703_v41 }
 0x9fd   :  { %7830 = vst [vmem:[#allocation9_spill] sm:$0xff] %v6400_v63  ;;  %1983 = vrot.lane.b32.xlu0 %v6400_v63, %s5400_s21 }
 0xa01   :  { %v1958_v17 = vpop.permute.xlu1 %1957 }
 0xa02   :  { %v1966_v0 = vmul.f32 %v1958_v17, %v1946_v22 }
 0xa04   :  { %v6407_v30 = vadd.f32 %v1970_v13, %v1966_v0 }
 0xa06   :  { %2034 = vrot.lane.b32.xlu0 %v6407_v30, %s5400_s21 }
 0xa07   :  { %v1696_v4 = vpop.permute.xlu0 %1695 }
 0xa08   :  { %v1704_v34 = vmul.f32 %v1696_v4, %v1684_v25 }
 0xa0a   :  { %v6414_v20 = vadd.f32 %v1708_v61, %v1704_v34 }
 0xa0c   :  { %7831 = vst [vmem:[#allocation10_spill] sm:$0xff] %v6414_v20  ;;  %1985 = vrot.lane.b32.xlu2 %v6414_v20, %s5400_s21 }
 0xa17   :  { %v1980_v28 = vpop.permute.xlu2 %1979 }
 0xa18   :  { %4779 = vmatmul.msk.f32.vlgmr.msra.gmra.mxu2 %vm32_vm0, %v1980_v28 }
 0xa19   :  { %3035 = vmatpush.msra.mxu2 %v6172_v16  ;;  %v6436_v16 = vld [vmem:[%s7802_s3 + $0x30] sm:$0xff] }
 0xa1b   :  { %3036 = vmatpush.msra.mxu2 %v6179_v15  ;;  %v6443_v15 = vld [vmem:[%s7802_s3 + $0x28] sm:$0xff] }
 0xa1d   :  { %3037 = vmatpush.msra.mxu2 %v6185_v53 }
 0xa1f   :  { %3038 = vmatpush.msra.mxu2 %v6191_v2  ;;  %v2031_v53 = vpop.permute.xlu2 %2030  ;;  %v6450_v2 = vld [vmem:[%s7802_s3 + $0x20] sm:$0xff] }
 0xa2a   :  { %v2029_v56 = vpop.permute.xlu0 %2028 }
 0xa2b   :  { %4783 = vmatmul.msk.f32.vlgmr.msra.gmra.mxu3 %vm32_vm0, %v2029_v56  ;;  %4791 = vmatmul.msk.f32.vlgmr.msrb.gmra.mxu0 %vm32_vm0, %v2029_v56 }
 0xa2c   :  { %3084 = vmatpush.msra.mxu3 %v6209_v26  ;;  %3301 = vmatpush.msrb.mxu0 %v6429_v52 }
 0xa2e   :  { %3085 = vmatpush.msra.mxu3 %v6218_v1  ;;  %3302 = vmatpush.msrb.mxu0 %v6436_v16 }
 0xa30   :  { %3086 = vmatpush.msra.mxu3 %v6226_v59  ;;  %3303 = vmatpush.msrb.mxu0 %v6443_v15 }
 0xa32   :  { %3087 = vmatpush.msra.mxu3 %v6236_v9  ;;  %3304 = vmatpush.msrb.mxu0 %v6450_v2 }
 0xa33   :  { %4784 = vmatmul.msk.f32.gmra.mxu3 %vm32_vm0, %v2031_v53  ;;  %4792 = vmatmul.msk.f32.gmra.mxu0 %vm32_vm0, %v2031_v53  ;;  %v2328_v53 = vpop.f32.mrf.mxu1 }
 0xa3d   :  { %v1982_v26 = vpop.permute.xlu1 %1981 }
 0xa3e   :  { %4780 = vmatmul.msk.f32.gmra.mxu2 %vm32_vm0, %v1982_v26 }
 0xa66   :  { %v1986_v9 = vpop.permute.xlu2 %1985 }
 0xa69   :  { %v2033_v1 = vpop.permute.xlu1 %2032 }
 0xa6a   :  { %4785 = vmatmul.msk.f32.gmra.mxu3 %vm32_vm0, %v2033_v1  ;;  %4793 = vmatmul.msk.f32.gmra.mxu0 %vm32_vm0, %v2033_v1 }
 0xa6f   :  { %v1984_v59 = vpop.permute.xlu0 %1983 }
 0xa70   :  { %4781 = vmatmul.msk.f32.gmra.mxu2 %vm32_vm0, %v1984_v59 }
 0xa78   :  { %v2035_v40 = vpop.permute.xlu0 %2034  ;;  %4782 = vmatmul.msk.f32.gmra.mxu2 %vm32_vm0, %v1986_v9 }
 0xa79   :  { %4786 = vmatmul.msk.f32.gmra.mxu3 %vm32_vm0, %v2035_v40  ;;  %4794 = vmatmul.msk.f32.gmra.mxu0 %vm32_vm0, %v2035_v40 }
 0xa9b   :  { %v2012_v37 = vpop.f32.mrf.mxu2 }
 0xaa8   :  { %v2278_v19 = vpop.f32.mrf.mxu0 }
 0xaa9   :  { %v2320_v7 = vadd.f32 %v2319_v12, %v2278_v19 }
 0xaab   :  { %v6468_v36 = vadd.f32 %v6465_v55, %v2320_v7 }
 0xaad   :  { %2415 = vrot.lane.b32.xlu2 %v6468_v36, %s5398_s19  ;;  %v4799_v3 = vmul.f32 -1.442695, %v6468_v36 }
 0xaae   :  { %v2061_v35 = vpop.f32.mrf.mxu3 }
 0xaaf   :  { %v2062_v5 = vadd.f32 %v2061_v35, %v2012_v37  ;;  %5066 = vpow2.f32 %v4799_v3 }
 0xab0   :  { %v2281_v10 = vpop.f32.mrf.mxu0 }
 0xab1   :  { %v6473_v57 = vadd.f32 %v6269_v54, %v2062_v5  ;;  %v2323_v32 = vadd.f32 %v2322_v14, %v2281_v10 }
 0xab3   :  { %2157 = vrot.lane.b32.xlu1 %v6473_v57, %s5398_s19  ;;  %v6478_v31 = vadd.f32 %v6465_v55, %v2323_v32  ;;  %v4787_v28 = vmul.f32 -1.442695, %v6473_v57 }
 0xab5   :  { %v5067_v29 = vpop.eup %5066  ;;  %v4800_v7 = vmul.f32 -1.442695, %v6478_v31 }
 0xab6   :  { %v2064_v6 = vpop.f32.mrf.mxu3  ;;  %v2347_v21 = vadd.f32 1.0, %v5067_v29 }
 0xab8   :  { %5068 = vrcp.f32 %v2347_v21  ;;  %v2362_v35 = vand.u32 2147483648, %v2347_v21  ;;  %vm2356_vm9 = vweird.f32 %v2347_v21  ;;  %v2360_v10 = vand.u32 2147483647, %v2347_v21 }
 0xab9   :  { %5070 = vpow2.f32 %v4787_v28 }
 0xaba   :  { %5072 = vpow2.f32 %v4800_v7  ;;  %vm2361_vm11 = vcmp.eq.f32.partialorder %v2360_v10, 8.507059e+37 }
 0xabb   :  { %2417 = vrot.lane.b32.xlu1 %v6478_v31, %s5398_s19 }
 0xabe   :  { %v5069_v17 = vpop.eup %5068 }
 0xabf   :  { %v2352_v4 = vmul.f32 %v5069_v17, %v2347_v21  ;;  %vm2357_vm8 = vweird.f32 %v5069_v17  ;;  %v5071_v5 = vpop.eup %5070 }
 0xac0   :  { %vm2358_vm10 = vmor %vm2356_vm9, %vm2357_vm8  ;;  %v2089_v32 = vadd.f32 1.0, %v5071_v5  ;;  %v5073_v3 = vpop.eup %5072 }
 0xac1   :  { %v2015_v51 = vpop.f32.mrf.mxu2  ;;  %v2353_v56 = vsub.f32 1.0, %v2352_v4 }
 0xac2   :  { %v2065_v33 = vadd.f32 %v2064_v6, %v2015_v51  ;;  %5074 = vrcp.f32 %v2089_v32  ;;  %vm2098_vm13 = vweird.f32 %v2089_v32 }
 0xac3   :  { %v2354_v9 = vmul.f32 %v5069_v17, %v2353_v56  ;;  %v2104_v56 = vand.u32 2147483648, %v2089_v32 }
 0xac4   :  { %v6483_v44 = vadd.f32 %v6269_v54, %v2065_v33 }
 0xac5   :  { %v2355_v37 = vadd.f32 %v5069_v17, %v2354_v9  ;;  %v2105_v9 = vor.u32 1.1754944e-38, %v2104_v56 }
 0xac6   :  { %2159 = vrot.lane.b32.xlu0 %v6483_v44, %s5398_s19  ;;  %v4788_v29 = vmul.f32 -1.442695, %v6483_v44 }
 0xac7   :  { %v2359_v14 = vsel %vm2358_vm10, %v5069_v17, %v2355_v37 }
 0xac8   :  { %5076 = vpow2.f32 %v4788_v29 }
 0xae7   :  { %v2284_v50 = vpop.f32.mrf.mxu0 }
 0xae8   :  { %v2326_v41 = vadd.f32 %v2325_v39, %v2284_v50  ;;  %v2348_v39 = vadd.f32 1.0, %v5073_v3  ;;  %v5075_v50 = vpop.eup %5074 }
 0xae9   :  { %v2094_v21 = vmul.f32 %v5075_v50, %v2089_v32  ;;  %vm2099_vm12 = vweird.f32 %v5075_v50 }
 0xaea   :  { %v6489_v22 = vadd.f32 %v6465_v55, %v2326_v41  ;;  %5078 = vrcp.f32 %v2348_v39  ;;  %v5077_v41 = vpop.eup %5076  ;;  %vm2100_vm14 = vmor %vm2098_vm13, %vm2099_vm12  ;;  %vm2371_vm2 = vweird.f32 %v2348_v39 }
 0xaeb   :  { %v2095_v17 = vsub.f32 1.0, %v2094_v21 }
 0xaec   :  { %2419 = vrot.lane.b32.xlu0 %v6489_v22, %s5398_s19 }
 0xaed   :  { %v2067_v13 = vpop.f32.mrf.mxu3 }
 0xaf3   :  { %v2018_v0 = vpop.f32.mrf.mxu2 }
 0xaf4   :  { %v2068_v25 = vadd.f32 %v2067_v13, %v2018_v0  ;;  %v5079_v13 = vpop.eup %5078  ;;  %v2090_v0 = vadd.f32 1.0, %v5077_v41 }
 0xaf5   :  { %v2367_v4 = vmul.f32 %v5079_v13, %v2348_v39  ;;  %vm2372_vm1 = vweird.f32 %v5079_v13 }
 0xaf6   :  { %v6494_v61 = vadd.f32 %v6269_v54, %v2068_v25  ;;  %v2287_v34 = vpop.f32.mrf.mxu0  ;;  %v2096_v25 = vmul.f32 %v5075_v50, %v2095_v17  ;;  %5080 = vrcp.f32 %v2090_v0  ;;  %vm2373_vm3 = vmor %vm2371_vm2, %vm2372_vm1  ;;  %vm2113_vm6 = vweird.f32 %v2090_v0 }
 0xaf7   :  { %v2329_v26 = vadd.f32 %v2328_v53, %v2287_v34  ;;  %v2368_v28 = vsub.f32 1.0, %v2367_v4  ;;  %v2102_v53 = vand.u32 2147483647, %v2089_v32  ;;  %v2375_v32 = vand.u32 2147483647, %v2348_v39 }
 0xaf8   :  { %2161 = vrot.lane.b32.xlu2 %v6494_v61, %s5398_s19  ;;  %v2097_v34 = vadd.f32 %v5075_v50, %v2096_v25  ;;  %v4801_v25 = vmul.f32 -1.442695, %v6489_v22 }
 0xaf9   :  { %v6500_v12 = vadd.f32 %v6465_v55, %v2329_v26  ;;  %vm2103_vm15 = vcmp.eq.f32.partialorder %v2102_v53, 8.507059e+37  ;;  %vm2376_vm4 = vcmp.eq.f32.partialorder %v2375_v32, 8.507059e+37 }
 0xafb   :  { %v2021_v1 = vpop.f32.mrf.mxu2  ;;  %v4802_v3 = vmul.f32 -1.442695, %v6500_v12 }
 0xafc   :  { %v2070_v59 = vpop.f32.mrf.mxu3  ;;  %v5081_v26 = vpop.eup %5080 }
 0xafd   :  { %v2071_v40 = vadd.f32 %v2070_v59, %v2021_v1  ;;  %v2101_v1 = vsel %vm2100_vm14, %v5075_v50, %v2097_v34  ;;  %v2369_v59 = vmul.f32 %v5079_v13, %v2368_v28  ;;  %vm2114_vm5 = vweird.f32 %v5081_v26 }
 0xafe   :  { %v6516_v37 = vsel %vm2103_vm15, %v2105_v9, %v2101_v1  ;;  %v2117_v34 = vand.u32 2147483647, %v2090_v0  ;;  %vm2115_vm7 = vmor %vm2113_vm6, %vm2114_vm5 }
 0xaff   :  { %v6503_v19 = vadd.f32 %v6269_v54, %v2071_v40  ;;  %v2363_v54 = vor.u32 1.1754944e-38, %v2362_v35  ;;  %v4789_v40 = vmul.f32 -1.442695, %v6494_v61  ;;  %v2109_v35 = vmul.f32 %v5081_v26, %v2090_v0 }
 0xb00   :  { %2421 = vrot.lane.b32.xlu2 %v6500_v12, %s5398_s19  ;;  %v2370_v10 = vadd.f32 %v5079_v13, %v2369_v59  ;;  %vm2118_vm8 = vcmp.eq.f32.partialorder %v2117_v34, 8.507059e+37 }
 0xb01   :  { %2163 = vrot.lane.b32.xlu1 %v6503_v19, %s5398_s19  ;;  %v6510_v6 = vsel %vm2361_vm11, %v2363_v54, %v2359_v14  ;;  %v2377_v14 = vand.u32 2147483648, %v2348_v39  ;;  %5082 = vpow2.f32 %v4789_v40  ;;  %v2110_v54 = vsub.f32 1.0, %v2109_v35 }
 0xb02   :  { %5084 = vpow2.f32 %v4802_v3 }
 0xb03   :  { %v2111_v21 = vmul.f32 %v5081_v26, %v2110_v54  ;;  %5086 = vpow2.f32 %v4801_v25 }
 0xb05   :  { %v2112_v39 = vadd.f32 %v5081_v26, %v2111_v21 }
 0xb07   :  { %v2416_v51 = vpop.permute.xlu2 %2415  ;;  %v5083_v17 = vpop.eup %5082  ;;  %v2116_v28 = vsel %vm2115_vm7, %v5081_v26, %v2112_v39 }
 0xb08   :  { %v2427_v33 = vmul.f32 %v2416_v51, %v6510_v6  ;;  %v2374_v51 = vsel %vm2373_vm3, %v5079_v13, %v2370_v10  ;;  %v2091_v4 = vadd.f32 1.0, %v5083_v17  ;;  %v2119_v13 = vand.u32 2147483648, %v2090_v0  ;;  %v5085_v53 = vpop.eup %5084 }
 0xb09   :  { %v5087_v40 = vpop.eup %5086 }
 0xb0a   :  { %2435 = vrot.lane.b32.xlu1 %v2427_v33, %s5399_s20  ;;  %v2378_v33 = vor.u32 1.1754944e-38, %v2377_v14  ;;  %5088 = vrcp.f32 %v2091_v4  ;;  %v2120_v56 = vor.u32 1.1754944e-38, %v2119_v13  ;;  %v4790_v14 = vmul.f32 -1.442695, %v6503_v19 }
 0xb0b   :  { %v2134_v21 = vand.u32 2147483648, %v2091_v4  ;;  %vm2128_vm10 = vweird.f32 %v2091_v4 }
 0xb0c   :  { %v6521_v50 = vsel %vm2376_vm4, %v2378_v33, %v2374_v51  ;;  %v6526_v59 = vsel %vm2118_vm8, %v2120_v56, %v2116_v28 }
 0xb0d   :  { %v2135_v34 = vor.u32 1.1754944e-38, %v2134_v21 }
 0xb10   :  { %v5089_v35 = vpop.eup %5088 }
 0xb11   :  { %v2124_v0 = vmul.f32 %v5089_v35, %v2091_v4  ;;  %vm2129_vm9 = vweird.f32 %v5089_v35 }
 0xb12   :  { %vm2130_vm11 = vmor %vm2128_vm10, %vm2129_vm9 }
 0xb13   :  { %v2125_v10 = vsub.f32 1.0, %v2124_v0 }
 0xb15   :  { %v2126_v54 = vmul.f32 %v5089_v35, %v2125_v10 }
 0xb17   :  { %v2127_v3 = vadd.f32 %v5089_v35, %v2126_v54 }
 0xb19   :  { %v2131_v25 = vsel %vm2130_vm11, %v5089_v35, %v2127_v3 }
 0xb25   :  { %v2158_v7 = vpop.permute.xlu1 %2157 }
 0xb26   :  { %v2169_v5 = vmul.f32 %v2158_v7, %v6516_v37  ;;  %v2350_v7 = vadd.f32 1.0, %v5085_v53 }
 0xb28   :  { %2177 = vrot.lane.b32.xlu0 %v2169_v5, %s5399_s20  ;;  %v2349_v5 = vadd.f32 1.0, %v5087_v40  ;;  %5090 = vrcp.f32 %v2350_v7  ;;  %v2407_v0 = vand.u32 2147483648, %v2350_v7  ;;  %vm2401_vm14 = vweird.f32 %v2350_v7 }
 0xb2a   :  { %5092 = vrcp.f32 %v2349_v5  ;;  %v2392_v54 = vand.u32 2147483648, %v2349_v5  ;;  %vm2386_vm3 = vweird.f32 %v2349_v5 }
 0xb2b   :  { %5094 = vpow2.f32 %v4790_v14  ;;  %v2408_v14 = vor.u32 1.1754944e-38, %v2407_v0 }
 0xb2d   :  { %v2418_v29 = vpop.permute.xlu1 %2417 }
 0xb2e   :  { %v2428_v41 = vmul.f32 %v2418_v29, %v6521_v50  ;;  %v5091_v26 = vpop.eup %5090 }
 0xb2f   :  { %v2397_v51 = vmul.f32 %v5091_v26, %v2350_v7  ;;  %vm2402_vm13 = vweird.f32 %v5091_v26 }
 0xb30   :  { %2437 = vrot.lane.b32.xlu0 %v2428_v41, %s5399_s20  ;;  %v5093_v32 = vpop.eup %5092  ;;  %v2132_v41 = vand.u32 2147483647, %v2091_v4  ;;  %v2405_v4 = vand.u32 2147483647, %v2350_v7  ;;  %vm2403_vm15 = vmor %vm2401_vm14, %vm2402_vm13 }
 0xb31   :  { %v2382_v33 = vmul.f32 %v5093_v32, %v2349_v5  ;;  %v2398_v29 = vsub.f32 1.0, %v2397_v51  ;;  %v5095_v13 = vpop.eup %5094  ;;  %vm2387_vm1 = vweird.f32 %v5093_v32  ;;  %v2390_v51 = vand.u32 2147483647, %v2349_v5 }
 0xb32   :  { %vm2133_vm12 = vcmp.eq.f32.partialorder %v2132_v41, 8.507059e+37  ;;  %vm2406_vm2 = vcmp.eq.f32.partialorder %v2405_v4, 8.507059e+37  ;;  %vm2388_vm4 = vmor %vm2386_vm3, %vm2387_vm1  ;;  %v2393_v41 = vor.u32 1.1754944e-38, %v2392_v54 }
 0xb33   :  { %v2383_v17 = vsub.f32 1.0, %v2382_v33  ;;  %v2399_v39 = vmul.f32 %v5091_v26, %v2398_v29  ;;  %v6531_v28 = vsel %vm2133_vm12, %v2135_v34, %v2131_v25  ;;  %vm2391_vm5 = vcmp.eq.f32.partialorder %v2390_v51, 8.507059e+37 }
 0xb35   :  { %v2384_v53 = vmul.f32 %v5093_v32, %v2383_v17  ;;  %v2400_v40 = vadd.f32 %v5091_v26, %v2399_v39 }
 0xb37   :  { %v2404_v35 = vsel %vm2403_vm15, %v5091_v26, %v2400_v40  ;;  %v2385_v10 = vadd.f32 %v5093_v32, %v2384_v53 }
 0xb38   :  { %v2160_v1 = vpop.permute.xlu0 %2159  ;;  %v6535_v33 = vsel %vm2406_vm2, %v2408_v14, %v2404_v35 }
 0xb39   :  { %v2170_v9 = vmul.f32 %v2160_v1, %v6526_v59  ;;  %v2092_v1 = vadd.f32 1.0, %v5095_v13  ;;  %v2389_v21 = vsel %vm2388_vm4, %v5093_v32, %v2385_v10 }
 0xb3a   :  { %v6539_v7 = vsel %vm2391_vm5, %v2393_v41, %v2389_v21 }
 0xb3b   :  { %2179 = vrot.lane.b32.xlu2 %v2170_v9, %s5399_s20  ;;  %5096 = vrcp.f32 %v2092_v1  ;;  %vm2143_vm7 = vweird.f32 %v2092_v1  ;;  %v2147_v32 = vand.u32 2147483647, %v2092_v1 }
 0xb3d   :  { %vm2148_vm9 = vcmp.eq.f32.partialorder %v2147_v32, 8.507059e+37 }
 0xb41   :  { %v5097_v17 = vpop.eup %5096 }
 0xb42   :  { %v2139_v39 = vmul.f32 %v5097_v17, %v2092_v1  ;;  %vm2144_vm6 = vweird.f32 %v5097_v17 }
 0xb43   :  { %vm2145_vm8 = vmor %vm2143_vm7, %vm2144_vm6 }
 0xb44   :  { %v2140_v5 = vsub.f32 1.0, %v2139_v39 }
 0xb46   :  { %v2141_v13 = vmul.f32 %v5097_v17, %v2140_v5 }
 0xb48   :  { %v2142_v34 = vadd.f32 %v5097_v17, %v2141_v13 }
 0xb4a   :  { %v2146_v53 = vsel %vm2145_vm8, %v5097_v17, %v2142_v34 }
 0xb52   :  { %v2162_v56 = vpop.permute.xlu2 %2161 }
 0xb53   :  { %v2171_v9 = vmul.f32 %v2162_v56, %v6531_v28  ;;  %v2149_v56 = vand.u32 2147483648, %v2092_v1 }
 0xb55   :  { %2181 = vrot.lane.b32.xlu1 %v2171_v9, %s5399_s20  ;;  %v2150_v9 = vor.u32 1.1754944e-38, %v2149_v56 }
 0xb57   :  { %v6543_v0 = vsel %vm2148_vm9, %v2150_v9, %v2146_v53  ;;  %v2479_v53 = vmul.f32 %v6510_v6, %v6365_v27  ;;  %v2456_v27 = vsub.f32 1.0, %v6521_v50 }
 0xb5a   :  { %v2422_v3 = vpop.permute.xlu2 %2421 }
 0xb5b   :  { %v2430_v29 = vmul.f32 %v2422_v3, %v6535_v33 }
 0xb5d   :  { %2441 = vrot.lane.b32.xlu1 %v2430_v29, %s5399_s20 }
 0xb5e   :  { %v2420_v26 = vpop.permute.xlu0 %2419 }
 0xb5f   :  { %v2429_v25 = vmul.f32 %v2420_v26, %v6539_v7 }
 0xb61   :  { %2439 = vrot.lane.b32.xlu2 %v2429_v25, %s5399_s20 }
 0xb73   :  { %v2164_v40 = vpop.permute.xlu1 %2163 }
 0xb74   :  { %v2172_v4 = vmul.f32 %v2164_v40, %v6543_v0  ;;  %v2197_v40 = vsub.f32 1.0, %v6516_v37 }
 0xb76   :  { %2183 = vrot.lane.b32.xlu0 %v2172_v4, %s5399_s20 }
 0xb7c   :  { %v2436_v35 = vpop.permute.xlu1 %2435 }
 0xb7d   :  { %v2447_v10 = vadd.f32 %v2436_v35, %v6468_v36  ;;  %v2221_v35 = vmul.f32 %v6516_v37, %v6372_v49  ;;  %v2198_v37 = vsub.f32 1.0, %v6526_v59 }
 0xb7f   :  { %5098 = vtanh.f32 %v2447_v10 }
 0xb85   :  { %v5099_v14 = vpop.eup %5098 }
 0xb86   :  { %2463 = vrot.lane.b32.xlu0 %v5099_v14, %s5400_s21 }
 0xb95   :  { %v2180_v54 = vpop.permute.xlu2 %2179 }
 0xb96   :  { %v2190_v1 = vadd.f32 %v2180_v54, %v6483_v44  ;;  %v2480_v54 = vmul.f32 %v6521_v50, %v6379_v38  ;;  %v2457_v38 = vsub.f32 1.0, %v6539_v7 }
 0xb98   :  { %5100 = vtanh.f32 %v2190_v1 }
 0xb9a   :  { %v2178_v51 = vpop.permute.xlu0 %2177 }
 0xb9b   :  { %v2189_v3 = vadd.f32 %v2178_v51, %v6473_v57 }
 0xb9d   :  { %5102 = vtanh.f32 %v2189_v3 }
 0xb9e   :  { %v5101_v29 = vpop.eup %5100 }
 0xb9f   :  { %2207 = vrot.lane.b32.xlu1 %v5101_v29, %s5400_s21  ;;  %v2222_v29 = vmul.f32 %v6526_v59, %v6386_v58  ;;  %v2199_v59 = vsub.f32 1.0, %v6531_v28 }
 0xba2   :  { %v2438_v21 = vpop.permute.xlu0 %2437 }
 0xba3   :  { %v5103_v41 = vpop.eup %5102  ;;  %v2448_v17 = vadd.f32 %v2438_v21, %v6478_v31 }
 0xba4   :  { %2205 = vrot.lane.b32.xlu2 %v5103_v41, %s5400_s21 }
 0xba5   :  { %5104 = vtanh.f32 %v2448_v17  ;;  %v2481_v17 = vmul.f32 %v6539_v7, %v6393_v60  ;;  %v2458_v60 = vsub.f32 1.0, %v6535_v33 }
 0xbab   :  { %v5105_v36 = vpop.eup %5104 }
 0xbac   :  { %2465 = vrot.lane.b32.xlu2 %v5105_v36, %s5400_s21 }
 0xbbb   :  { %v2440_v26 = vpop.permute.xlu2 %2439 }
 0xbbc   :  { %v2449_v44 = vadd.f32 %v2440_v26, %v6489_v22 }
 0xbbe   :  { %5106 = vtanh.f32 %v2449_v44 }
 0xbc4   :  { %v5107_v25 = vpop.eup %5106 }
 0xbc5   :  { %2467 = vrot.lane.b32.xlu1 %v5107_v25, %s5400_s21  ;;  %v2223_v25 = vmul.f32 %v6531_v28, %v6400_v63 }
 0xbc7   :  { %v2182_v57 = vpop.permute.xlu1 %2181 }
 0xbc8   :  { %v2191_v39 = vadd.f32 %v2182_v57, %v6494_v61 }
 0xbca   :  { %5108 = vtanh.f32 %v2191_v39 }
 0xbcf   :  { %v2442_v5 = vpop.permute.xlu1 %2441 }
 0xbd0   :  { %v5109_v13 = vpop.eup %5108  ;;  %v2450_v31 = vadd.f32 %v2442_v5, %v6500_v12  ;;  %v2455_v12 = vsub.f32 1.0, %v6510_v6  ;;  %v2200_v5 = vsub.f32 1.0, %v6543_v0 }
 0xbd1   :  { %2209 = vrot.lane.b32.xlu0 %v5109_v13, %s5400_s21  ;;  %v2482_v13 = vmul.f32 %v6535_v33, %v6407_v30  ;;  %v5378_v30 = vld [vmem:[%s7802_s3 + $0x18] sm:$0xff] }
 0xbd2   :  { %5110 = vtanh.f32 %v2450_v31 }
 0xbd8   :  { %v5111_v34 = vpop.eup %5110 }
 0xbd9   :  { %2469 = vrot.lane.b32.xlu0 %v5111_v34, %s5400_s21 }
 0xbe1   :  { %2802 = vrot.lane.b32.xlu0 %v6200_v42, %s5400_s21 }
 0xbe8   :  { %v2184_v22 = vpop.permute.xlu0 %2183 }
 0xbe9   :  { %v2192_v56 = vadd.f32 %v2184_v22, %v6503_v19  ;;  %2804 = vrot.lane.b32.xlu0 %v6229_v24, %s5400_s21  ;;  %v2224_v22 = vmul.f32 %v6543_v0, %v6414_v20  ;;  %v5379_v0 = vld [vmem:[%s7802_s3 + $0x10] sm:$0xff] }
 0xbeb   :  { %5112 = vtanh.f32 %v2192_v56 }
 0xbf1   :  { %v5113_v61 = vpop.eup %5112  ;;  %2806 = vrot.lane.b32.xlu0 %v6244_v47, %s5400_s21 }
 0xbf2   :  { %2211 = vrot.lane.b32.xlu2 %v5113_v61, %s5400_s21 }
 0xbf8   :  { %v2464_v32 = vpop.permute.xlu0 %2463 }
 0xbf9   :  { %v2475_v9 = vmul.f32 %v2464_v32, %v2455_v12  ;;  %2808 = vrot.lane.b32.xlu0 %v6251_v45, %s5400_s21  ;;  %v6640_v32 = vld [vmem:[%s7802_s3 + $0x58] sm:$0xff] }
 0xbfb   :  { %v6574_v19 = vadd.f32 %v2479_v53, %v2475_v9  ;;  %v5381_v53 = vld [vmem:[%s7802_s3 + $0x8] sm:$0xff] }
 0xbfd   :  { %2540 = vrot.lane.b32.xlu2 %v6574_v19, %s5400_s21 }
 0xbfe   :  { %v2206_v4 = vpop.permute.xlu2 %2205 }
 0xbff   :  { %v2217_v10 = vmul.f32 %v2206_v4, %v2197_v40  ;;  %v6649_v40 = vld [vmem:[%s7802_s3 + $0x50] sm:$0xff]  ;;  %v5384_v4 = vld [vmem:[%s7802_s3] sm:$0xff] }
 0xc01   :  { %v6581_v14 = vadd.f32 %v2221_v35, %v2217_v10 }
 0xc03   :  { %2491 = vrot.lane.b32.xlu1 %v6581_v14, %s5400_s21 }
 0xc06   :  { %v2466_v6 = vpop.permute.xlu2 %2465 }
 0xc07   :  { %v2476_v1 = vmul.f32 %v2466_v6, %v2456_v27  ;;  %v6679_v6 = vld [vmem:[%s7802_s3 + $0x78] sm:$0xff] }
 0xc09   :  { %v6588_v51 = vadd.f32 %v2480_v54, %v2476_v1  ;;  %v6691_v54 = vld [vmem:[%s7802_s3 + $0x68] sm:$0xff]  ;;  %v6697_v1 = vld [vmem:[%s7802_s3 + $0x60] sm:$0xff] }
 0xc0b   :  { %2542 = vrot.lane.b32.xlu2 %v6588_v51, %s5400_s21 }
 0xc11   :  { %v2208_v3 = vpop.permute.xlu1 %2207 }
 0xc12   :  { %v2218_v21 = vmul.f32 %v2208_v3, %v2198_v37 }
 0xc14   :  { %v6595_v41 = vadd.f32 %v2222_v29, %v2218_v21 }
 0xc16   :  { %2493 = vrot.lane.b32.xlu1 %v6595_v41, %s5400_s21 }
 0xc37   :  { %v2468_v50 = vpop.permute.xlu1 %2467 }
 0xc38   :  { %v2477_v36 = vmul.f32 %v2468_v50, %v2457_v38 }
 0xc3a   :  { %v6602_v26 = vadd.f32 %v2481_v17, %v2477_v36 }
 0xc3c   :  { %2544 = vrot.lane.b32.xlu2 %v6602_v26, %s5400_s21 }
 0xc43   :  { %v2210_v44 = vpop.permute.xlu0 %2209 }
 0xc44   :  { %v2219_v57 = vmul.f32 %v2210_v44, %v2199_v59 }
 0xc46   :  { %v6609_v39 = vadd.f32 %v2223_v25, %v2219_v57 }
 0xc48   :  { %7832 = vst [vmem:[#allocation11_spill] sm:$0xff] %v6609_v39  ;;  %2495 = vrot.lane.b32.xlu1 %v6609_v39, %s5400_s21 }
 0xc4b   :  { %v2470_v7 = vpop.permute.xlu0 %2469 }
 0xc4c   :  { %v2478_v31 = vmul.f32 %v2470_v7, %v2458_v60  ;;  %v2212_v34 = vpop.permute.xlu2 %2211  ;;  %v6715_v60 = vld [vmem:[%s7802_s3 + $0x88] ss:$0 sm:$0xff] }
 0xc4d   :  { %v2220_v28 = vmul.f32 %v2212_v34, %v2200_v5 }
 0xc4e   :  { %v6619_v56 = vadd.f32 %v2482_v13, %v2478_v31 }
 0xc4f   :  { %v6621_v61 = vadd.f32 %v2224_v22, %v2220_v28 }
 0xc50   :  { %2546 = vrot.lane.b32.xlu2 %v6619_v56, %s5400_s21 }
 0xc51   :  { %7833 = vst [vmem:[#allocation12_spill] sm:$0xff] %v6621_v61  ;;  %2497 = vrot.lane.b32.xlu1 %v6621_v61, %s5400_s21 }
 0xc53   :  { %v2803_v12 = vpop.permute.xlu0 %2802 }
 0xc54   :  { %4819 = vmatmul.msk.f32.vlgmr.msra.gmra.mxu1 %vm32_vm0, %v2803_v12 }
 0xc55   :  { %3862 = vmatpush.msra.mxu1 %v5378_v30 }
 0xc57   :  { %v2541_v33 = vpop.permute.xlu2 %2540  ;;  %3863 = vmatpush.msra.mxu1 %v5379_v0 }
 0xc58   :  { %4807 = vmatmul.msk.f32.vlgmr.msrb.gmra.mxu3 %vm32_vm0, %v2541_v33  ;;  %4815 = vmatmul.msk.f32.vlgmr.msra.gmra.mxu0 %vm32_vm0, %v2541_v33 }
 0xc59   :  { %3817 = vmatpush.msra.mxu0 %v6429_v52  ;;  %3600 = vmatpush.msrb.mxu3 %v6640_v32  ;;  %v6657_v52 = vld [vmem:[%s7802_s3 + $0x48] sm:$0xff] }
 0xc5a   :  { %3864 = vmatpush.msra.mxu1 %v5381_v53 }
 0xc5b   :  { %v2805_v9 = vpop.permute.xlu0 %2804  ;;  %3601 = vmatpush.msrb.mxu3 %v6649_v40  ;;  %3818 = vmatpush.msra.mxu0 %v6436_v16  ;;  %v6667_v16 = vld [vmem:[%s7802_s3 + $0x40] sm:$0xff] }
 0xc5c   :  { %4820 = vmatmul.msk.f32.gmra.mxu1 %vm32_vm0, %v2805_v9 }
 0xc5d   :  { %3602 = vmatpush.msrb.mxu3 %v6657_v52  ;;  %3819 = vmatpush.msra.mxu0 %v6443_v15 }
 0xc5e   :  { %3865 = vmatpush.msra.mxu1 %v5384_v4 }
 0xc5f   :  { %3603 = vmatpush.msrb.mxu3 %v6667_v16  ;;  %3820 = vmatpush.msra.mxu0 %v6450_v2  ;;  %v6685_v2 = vld [vmem:[%s7802_s3 + $0x70] sm:$0xff] }
 0xc63   :  { %v2807_v35 = vpop.permute.xlu0 %2806 }
 0xc64   :  { %4821 = vmatmul.msk.f32.gmra.mxu1 %vm32_vm0, %v2807_v35 }
 0xc65   :  { %v2543_v10 = vpop.permute.xlu2 %2542 }
 0xc66   :  { %4808 = vmatmul.msk.f32.gmra.mxu3 %vm32_vm0, %v2543_v10  ;;  %4816 = vmatmul.msk.f32.gmra.mxu0 %vm32_vm0, %v2543_v10 }
 0xc6b   :  { %v2809_v15 = vpop.permute.xlu0 %2808 }
 0xc6c   :  { %4822 = vmatmul.msk.f32.gmra.mxu1 %vm32_vm0, %v2809_v15 }
 0xc75   :  { %v2492_v27 = vpop.permute.xlu1 %2491 }
 0xc76   :  { %4803 = vmatmul.msk.f32.vlgmr.msrb.gmra.mxu2 %vm32_vm0, %v2492_v27 }
 0xc77   :  { %3551 = vmatpush.msrb.mxu2 %v6679_v6 }
 0xc79   :  { %3552 = vmatpush.msrb.mxu2 %v6685_v2 }
 0xc7b   :  { %3553 = vmatpush.msrb.mxu2 %v6691_v54 }
 0xc7d   :  { %3554 = vmatpush.msrb.mxu2 %v6697_v1 }
 0xc88   :  { %v2494_v37 = vpop.permute.xlu1 %2493 }
 0xc89   :  { %4804 = vmatmul.msk.f32.gmra.mxu2 %vm32_vm0, %v2494_v37 }
 0xc96   :  { %v2545_v3 = vpop.permute.xlu2 %2544 }
 0xc97   :  { %4809 = vmatmul.msk.f32.gmra.mxu3 %vm32_vm0, %v2545_v3  ;;  %4817 = vmatmul.msk.f32.gmra.mxu0 %vm32_vm0, %v2545_v3 }
 0xcaa   :  { %v2547_v29 = vpop.permute.xlu2 %2546 }
 0xcab   :  { %4810 = vmatmul.msk.f32.gmra.mxu3 %vm32_vm0, %v2547_v29  ;;  %4818 = vmatmul.msk.f32.gmra.mxu0 %vm32_vm0, %v2547_v29 }
 0xcba   :  { %v2496_v21 = vpop.permute.xlu1 %2495 }
 0xcbb   :  { %4805 = vmatmul.msk.f32.gmra.mxu2 %vm32_vm0, %v2496_v21 }
 0xcc3   :  { %v2498_v38 = vpop.permute.xlu1 %2497 }
 0xcc4   :  { %4806 = vmatmul.msk.f32.gmra.mxu2 %vm32_vm0, %v2498_v38 }
 0xcd1   :  { %v2835_v50 = vpop.f32.mrf.mxu1 }
 0xcd5   :  { %v2790_v17 = vpop.f32.mrf.mxu0 }
 0xcd6   :  { %v2836_v36 = vadd.f32 %v2835_v50, %v2790_v17 }
 0xcd8   :  { %v6708_v59 = vadd.f32 %v6465_v55, %v2836_v36 }
 0xcd9   :  { %v2838_v13 = vpop.f32.mrf.mxu1 }
 0xcda   :  { %2931 = vrot.lane.b32.xlu2 %v6708_v59, %s5398_s19  ;;  %v4823_v4 = vmul.f32 -1.442695, %v6708_v59 }
 0xcdb   :  { %v2573_v44 = vpop.f32.mrf.mxu3 }
 0xcdc   :  { %5114 = vpow2.f32 %v4823_v4 }
 0xce1   :  { %v2841_v33 = vpop.f32.mrf.mxu1 }
 0xce2   :  { %v5115_v35 = vpop.eup %5114 }
 0xce3   :  { %v2793_v5 = vpop.f32.mrf.mxu0  ;;  %v2863_v10 = vadd.f32 1.0, %v5115_v35 }
 0xce4   :  { %v2839_v31 = vadd.f32 %v2838_v13, %v2793_v5 }
 0xce5   :  { %5116 = vrcp.f32 %v2863_v10  ;;  %vm2872_vm11 = vweird.f32 %v2863_v10 }
 0xce6   :  { %v6723_v34 = vadd.f32 %v6465_v55, %v2839_v31 }
 0xce9   :  { %v2576_v22 = vpop.f32.mrf.mxu3  ;;  %v2844_v36 = vpop.f32.mrf.mxu1 }
 0xceb   :  { %v5117_v15 = vpop.eup %5116 }
 0xcec   :  { %v2868_v37 = vmul.f32 %v5117_v15, %v2863_v10  ;;  %vm2873_vm10 = vweird.f32 %v5117_v15 }
 0xced   :  { %vm2874_vm12 = vmor %vm2872_vm11, %vm2873_vm10 }
 0xcee   :  { %v2869_v50 = vsub.f32 1.0, %v2868_v37 }
 0xcf9   :  { %v2524_v25 = vpop.f32.mrf.mxu2 }
 0xcfa   :  { %v2574_v57 = vadd.f32 %v2573_v44, %v2524_v25  ;;  %v2870_v25 = vmul.f32 %v5117_v15, %v2869_v50 }
 0xcfc   :  { %v6718_v7 = vadd.f32 %v6715_v60, %v2574_v57 }
 0xcfe   :  { %2669 = vrot.lane.b32.xlu1 %v6718_v7, %s5398_s19  ;;  %v4811_v17 = vmul.f32 -1.442695, %v6718_v7 }
 0xd00   :  { %5118 = vpow2.f32 %v4811_v17 }
 0xd06   :  { %2933 = vrot.lane.b32.xlu1 %v6723_v34, %s5398_s19 }
 0xd0c   :  { %v2527_v28 = vpop.f32.mrf.mxu2 }
 0xd0d   :  { %v2577_v12 = vadd.f32 %v2576_v22, %v2527_v28  ;;  %v2871_v22 = vadd.f32 %v5117_v15, %v2870_v25 }
 0xd0f   :  { %v6728_v30 = vadd.f32 %v6715_v60, %v2577_v12  ;;  %v4824_v12 = vmul.f32 -1.442695, %v6723_v34 }
 0xd11   :  { %2671 = vrot.lane.b32.xlu0 %v6728_v30, %s5398_s19  ;;  %5120 = vpow2.f32 %v4824_v12 }
 0xd14   :  { %v2796_v0 = vpop.f32.mrf.mxu0 }
 0xd15   :  { %v2842_v53 = vadd.f32 %v2841_v33, %v2796_v0  ;;  %v2878_v33 = vand.u32 2147483648, %v2863_v10  ;;  %v2876_v0 = vand.u32 2147483647, %v2863_v10  ;;  %v4812_v10 = vmul.f32 -1.442695, %v6728_v30 }
 0xd17   :  { %v6733_v9 = vadd.f32 %v6465_v55, %v2842_v53  ;;  %v5119_v53 = vpop.eup %5118  ;;  %v2879_v4 = vor.u32 1.1754944e-38, %v2878_v33  ;;  %vm2877_vm13 = vcmp.eq.f32.partialorder %v2876_v0, 8.507059e+37 }
 0xd19   :  { %2935 = vrot.lane.b32.xlu0 %v6733_v9, %s5398_s19  ;;  %v4825_v17 = vmul.f32 -1.442695, %v6733_v9 }
 0xd1a   :  { %v2579_v27 = vpop.f32.mrf.mxu3 }
 0xd28   :  { %v2799_v38 = vpop.f32.mrf.mxu0 }
 0xd29   :  { %v2845_v44 = vadd.f32 %v2844_v36, %v2799_v38 }
 0xd2b   :  { %v6745_v31 = vadd.f32 %v6465_v55, %v2845_v44  ;;  %v2875_v55 = vsel %vm2874_vm12, %v5117_v15, %v2871_v22 }
 0xd2c   :  { %v6755_v37 = vsel %vm2877_vm13, %v2879_v4, %v2875_v55 }
 0xd2e   :  { %v2582_v57 = vpop.f32.mrf.mxu3 }
 0xd34   :  { %v2932_v35 = vpop.permute.xlu2 %2931 }
 0xd3e   :  { %v2530_v3 = vpop.f32.mrf.mxu2 }
 0xd3f   :  { %v2580_v29 = vadd.f32 %v2579_v27, %v2530_v3  ;;  %v2601_v27 = vadd.f32 1.0, %v5119_v53  ;;  %v2943_v3 = vmul.f32 %v2932_v35, %v6755_v37 }
 0xd41   :  { %v6739_v21 = vadd.f32 %v6715_v60, %v2580_v29  ;;  %5122 = vrcp.f32 %v2601_v27  ;;  %v5121_v29 = vpop.eup %5120  ;;  %v2616_v0 = vand.u32 2147483648, %v2601_v27  ;;  %vm2610_vm15 = vweird.f32 %v2601_v27 }
 0xd42   :  { %v2864_v38 = vadd.f32 1.0, %v5121_v29  ;;  %5124 = vpow2.f32 %v4812_v10  ;;  %v2614_v55 = vand.u32 2147483647, %v2601_v27 }
 0xd43   :  { %2673 = vrot.lane.b32.xlu2 %v6739_v21, %s5398_s19  ;;  %v2617_v29 = vor.u32 1.1754944e-38, %v2616_v0  ;;  %v4813_v10 = vmul.f32 -1.442695, %v6739_v21  ;;  %v4826_v0 = vmul.f32 -1.442695, %v6745_v31 }
 0xd44   :  { %5126 = vrcp.f32 %v2864_v38  ;;  %vm2615_vm2 = vcmp.eq.f32.partialorder %v2614_v55, 8.507059e+37  ;;  %vm2887_vm4 = vweird.f32 %v2864_v38 }
 0xd45   :  { %5128 = vpow2.f32 %v4825_v17 }
 0xd47   :  { %v2533_v5 = vpop.f32.mrf.mxu2  ;;  %v5123_v50 = vpop.eup %5122 }
 0xd48   :  { %v2583_v13 = vadd.f32 %v2582_v57, %v2533_v5  ;;  %v2606_v15 = vmul.f32 %v5123_v50, %v2601_v27  ;;  %v5125_v36 = vpop.eup %5124  ;;  %vm2611_vm14 = vweird.f32 %v5123_v50  ;;  %v2891_v27 = vand.u32 2147483647, %v2864_v38 }
 0xd49   :  { %v2602_v57 = vadd.f32 1.0, %v5125_v36  ;;  %vm2612_vm1 = vmor %vm2610_vm15, %vm2611_vm14 }
 0xd4a   :  { %v6748_v28 = vadd.f32 %v6715_v60, %v2583_v13  ;;  %v2607_v44 = vsub.f32 1.0, %v2606_v15  ;;  %v5127_v25 = vpop.eup %5126  ;;  %vm2892_vm6 = vcmp.eq.f32.partialorder %v2891_v27, 8.507059e+37 }
 0xd4b   :  { %2937 = vrot.lane.b32.xlu2 %v6745_v31, %s5398_s19  ;;  %v2883_v13 = vmul.f32 %v5127_v25, %v2864_v38  ;;  %5130 = vrcp.f32 %v2602_v57  ;;  %v5129_v22 = vpop.eup %5128  ;;  %vm2888_vm3 = vweird.f32 %v5127_v25  ;;  %vm2625_vm8 = vweird.f32 %v2602_v57 }
 0xd4c   :  { %2675 = vrot.lane.b32.xlu1 %v6748_v28, %s5398_s19  ;;  %v2608_v5 = vmul.f32 %v5123_v50, %v2607_v44  ;;  %v6761_v53 = vadd.f32 1.0, %v5129_v22  ;;  %vm2889_vm5 = vmor %vm2887_vm4, %vm2888_vm3 }
 0xd4d   :  { %v2884_v33 = vsub.f32 1.0, %v2883_v13  ;;  %v2893_v13 = vand.u32 2147483648, %v2864_v38 }
 0xd4e   :  { %v2609_v12 = vadd.f32 %v5123_v50, %v2608_v5  ;;  %5132 = vrcp.f32 %v6761_v53  ;;  %vm2902_vm12 = vweird.f32 %v6761_v53 }
 0xd4f   :  { %5134 = vpow2.f32 %v4813_v10 }
 0xd50   :  { %v2613_v35 = vsel %vm2612_vm1, %v5123_v50, %v2609_v12  ;;  %5136 = vpow2.f32 %v4826_v0 }
 0xd51   :  { %v5131_v4 = vpop.eup %5130  ;;  %v6765_v17 = vsel %vm2615_vm2, %v2617_v29, %v2613_v35 }
 0xd52   :  { %v2621_v36 = vmul.f32 %v5131_v4, %v2602_v57  ;;  %vm2626_vm7 = vweird.f32 %v5131_v4 }
 0xd53   :  { %vm2627_vm9 = vmor %vm2625_vm8, %vm2626_vm7 }
 0xd54   :  { %2951 = vrot.lane.b32.xlu1 %v2943_v3, %s5399_s20  ;;  %v2885_v3 = vmul.f32 %v5127_v25, %v2884_v33  ;;  %v2622_v50 = vsub.f32 1.0, %v2621_v36  ;;  %v5133_v22 = vpop.eup %5132  ;;  %v2894_v33 = vor.u32 1.1754944e-38, %v2893_v13  ;;  %v2631_v36 = vand.u32 2147483648, %v2602_v57 }
 0xd55   :  { %vm2903_vm11 = vweird.f32 %v5133_v22 }
 0xd56   :  { %v2886_v5 = vadd.f32 %v5127_v25, %v2885_v3  ;;  %v2623_v29 = vmul.f32 %v5131_v4, %v2622_v50  ;;  %v2898_v3 = vmul.f32 %v5133_v22, %v6761_v53  ;;  %v2632_v50 = vor.u32 1.1754944e-38, %v2631_v36  ;;  %vm2904_vm13 = vmor %vm2902_vm12, %vm2903_vm11 }
 0xd58   :  { %v2890_v12 = vsel %vm2889_vm5, %v5127_v25, %v2886_v5  ;;  %v2624_v38 = vadd.f32 %v5131_v4, %v2623_v29  ;;  %v2899_v10 = vsub.f32 1.0, %v2898_v3  ;;  %v2629_v5 = vand.u32 2147483647, %v2602_v57 }
 0xd59   :  { %v6770_v35 = vsel %vm2892_vm6, %v2894_v33, %v2890_v12  ;;  %v2908_v3 = vand.u32 2147483648, %v6761_v53  ;;  %v2906_v57 = vand.u32 2147483647, %v6761_v53 }
 0xd5a   :  { %v2628_v13 = vsel %vm2627_vm9, %v5131_v4, %v2624_v38  ;;  %v2900_v27 = vmul.f32 %v5133_v22, %v2899_v10  ;;  %vm2630_vm10 = vcmp.eq.f32.partialorder %v2629_v5, 8.507059e+37 }
 0xd5b   :  { %v2909_v38 = vor.u32 1.1754944e-38, %v2908_v3  ;;  %vm2907_vm14 = vcmp.eq.f32.partialorder %v2906_v57, 8.507059e+37 }
 0xd5c   :  { %v2901_v0 = vadd.f32 %v5133_v22, %v2900_v27 }
 0xd70   :  { %v2670_v15 = vpop.permute.xlu1 %2669 }
 0xd71   :  { %v2681_v44 = vmul.f32 %v2670_v15, %v6765_v17 }
 0xd73   :  { %2689 = vrot.lane.b32.xlu0 %v2681_v44, %s5399_s20  ;;  %v5135_v44 = vpop.eup %5134 }
 0xd74   :  { %v2603_v25 = vadd.f32 1.0, %v5135_v44  ;;  %v5137_v12 = vpop.eup %5136  ;;  %v2905_v44 = vsel %vm2904_vm13, %v5133_v22, %v2901_v0 }
 0xd75   :  { %v2866_v29 = vadd.f32 1.0, %v5137_v12  ;;  %v6782_v5 = vsel %vm2907_vm14, %v2909_v38, %v2905_v44  ;;  %v4814_v12 = vmul.f32 -1.442695, %v6748_v28 }
 0xd76   :  { %5138 = vrcp.f32 %v2603_v25  ;;  %v2646_v0 = vand.u32 2147483648, %v2603_v25  ;;  %vm2640_vm1 = vweird.f32 %v2603_v25  ;;  %v2644_v3 = vand.u32 2147483647, %v2603_v25 }
 0xd77   :  { %5140 = vrcp.f32 %v2866_v29  ;;  %vm2917_vm5 = vweird.f32 %v2866_v29 }
 0xd78   :  { %v2934_v55 = vpop.permute.xlu1 %2933  ;;  %5142 = vpow2.f32 %v4814_v12  ;;  %vm2645_vm3 = vcmp.eq.f32.partialorder %v2644_v3, 8.507059e+37  ;;  %v2923_v12 = vand.u32 2147483648, %v2866_v29 }
 0xd79   :  { %v2944_v15 = vmul.f32 %v2934_v55, %v6770_v35  ;;  %v6775_v55 = vsel %vm2630_vm10, %v2632_v50, %v2628_v13 }
 0xd7b   :  { %2953 = vrot.lane.b32.xlu0 %v2944_v15, %s5399_s20 }
 0xd7c   :  { %v5139_v4 = vpop.eup %5138 }
 0xd7d   :  { %v2636_v10 = vmul.f32 %v5139_v4, %v2603_v25  ;;  %v5141_v50 = vpop.eup %5140  ;;  %vm2641_vm15 = vweird.f32 %v5139_v4 }
 0xd7e   :  { %v2913_v53 = vmul.f32 %v5141_v50, %v2866_v29  ;;  %vm2642_vm2 = vmor %vm2640_vm1, %vm2641_vm15  ;;  %v5143_v38 = vpop.eup %5142  ;;  %vm2918_vm4 = vweird.f32 %v5141_v50 }
 0xd7f   :  { %v2637_v27 = vsub.f32 1.0, %v2636_v10  ;;  %v2604_v20 = vadd.f32 1.0, %v5143_v38  ;;  %vm2919_vm6 = vmor %vm2917_vm5, %vm2918_vm4 }
 0xd80   :  { %v2914_v22 = vsub.f32 1.0, %v2913_v53 }
 0xd81   :  { %5144 = vrcp.f32 %v2604_v20  ;;  %vm2655_vm9 = vweird.f32 %v2604_v20 }
 0xd82   :  { %v2915_v44 = vmul.f32 %v5141_v50, %v2914_v22 }
 0xd83   :  { %v2672_v33 = vpop.permute.xlu0 %2671 }
 0xd84   :  { %v2682_v15 = vmul.f32 %v2672_v33, %v6775_v55  ;;  %v2638_v33 = vmul.f32 %v5139_v4, %v2637_v27  ;;  %v2916_v58 = vadd.f32 %v5141_v50, %v2915_v44 }
 0xd86   :  { %2691 = vrot.lane.b32.xlu2 %v2682_v15, %s5399_s20  ;;  %v2639_v15 = vadd.f32 %v5139_v4, %v2638_v33  ;;  %v2921_v33 = vand.u32 2147483647, %v2866_v29  ;;  %v2920_v25 = vsel %vm2919_vm6, %v5141_v50, %v2916_v58  ;;  %v2659_v29 = vand.u32 2147483647, %v2604_v20 }
 0xd88   :  { %v2643_v57 = vsel %vm2642_vm2, %v5139_v4, %v2639_v15  ;;  %v2924_v4 = vor.u32 1.1754944e-38, %v2923_v12  ;;  %vm2922_vm7 = vcmp.eq.f32.partialorder %v2921_v33, 8.507059e+37  ;;  %vm2660_vm11 = vcmp.eq.f32.partialorder %v2659_v29, 8.507059e+37 }
 0xd8a   :  { %v6791_v53 = vsel %vm2922_vm7, %v2924_v4, %v2920_v25 }
 0xd8b   :  { %v2936_v36 = vpop.permute.xlu0 %2935 }
 0xd8c   :  { %v2945_v13 = vmul.f32 %v2936_v36, %v6782_v5  ;;  %v2647_v36 = vor.u32 1.1754944e-38, %v2646_v0  ;;  %v5145_v0 = vpop.eup %5144 }
 0xd8d   :  { %v2651_v3 = vmul.f32 %v5145_v0, %v2604_v20  ;;  %vm2656_vm8 = vweird.f32 %v5145_v0 }
 0xd8e   :  { %2955 = vrot.lane.b32.xlu2 %v2945_v13, %s5399_s20  ;;  %v6787_v13 = vsel %vm2645_vm3, %v2647_v36, %v2643_v57  ;;  %v2661_v36 = vand.u32 2147483648, %v2604_v20  ;;  %vm2657_vm10 = vmor %vm2655_vm9, %vm2656_vm8 }
 0xd8f   :  { %v2652_v57 = vsub.f32 1.0, %v2651_v3 }
 0xd90   :  { %v2662_v50 = vor.u32 1.1754944e-38, %v2661_v36 }
 0xd91   :  { %v2653_v44 = vmul.f32 %v5145_v0, %v2652_v57 }
 0xd93   :  { %v2654_v38 = vadd.f32 %v5145_v0, %v2653_v44 }
 0xd95   :  { %v2658_v58 = vsel %vm2657_vm10, %v5145_v0, %v2654_v38 }
 0xd9d   :  { %v2674_v10 = vpop.permute.xlu2 %2673 }
 0xd9e   :  { %v2683_v27 = vmul.f32 %v2674_v10, %v6787_v13 }
 0xda0   :  { %2693 = vrot.lane.b32.xlu1 %v2683_v27, %s5399_s20  ;;  %v6795_v27 = vsel %vm2660_vm11, %v2662_v50, %v2658_v58 }
 0xda5   :  { %v2938_v15 = vpop.permute.xlu2 %2937 }
 0xda6   :  { %v2946_v22 = vmul.f32 %v2938_v15, %v6791_v53 }
 0xda8   :  { %2957 = vrot.lane.b32.xlu1 %v2946_v22, %s5399_s20 }
 0xdbe   :  { %v2676_v10 = vpop.permute.xlu1 %2675 }
 0xdbf   :  { %v2684_v12 = vmul.f32 %v2676_v10, %v6795_v27 }
 0xdc1   :  { %2695 = vrot.lane.b32.xlu0 %v2684_v12, %s5399_s20 }
 0xdc6   :  { %v2952_v33 = vpop.permute.xlu1 %2951 }
 0xdc7   :  { %v2963_v25 = vadd.f32 %v2952_v33, %v6708_v59 }
 0xdc9   :  { %5146 = vtanh.f32 %v2963_v25 }
 0xdcf   :  { %v5147_v4 = vpop.eup %5146 }
 0xdd0   :  { %2979 = vrot.lane.b32.xlu0 %v5147_v4, %s5400_s21  ;;  %v2995_v4 = vmul.f32 %v6755_v37, %v6574_v19  ;;  %v2972_v19 = vsub.f32 1.0, %v6770_v35 }
 0xde0   :  { %v2692_v15 = vpop.permute.xlu2 %2691 }
 0xde1   :  { %v2702_v20 = vadd.f32 %v2692_v15, %v6728_v30 }
 0xde3   :  { %5148 = vtanh.f32 %v2702_v20  ;;  %v2709_v20 = vsub.f32 1.0, %v6765_v17 }
 0xde5   :  { %v2690_v22 = vpop.permute.xlu0 %2689 }
 0xde6   :  { %v2701_v0 = vadd.f32 %v2690_v22, %v6718_v7 }
 0xde8   :  { %5150 = vtanh.f32 %v2701_v0  ;;  %v2956_v3 = vpop.permute.xlu2 %2955  ;;  %v2733_v0 = vmul.f32 %v6765_v17, %v6581_v14  ;;  %v2710_v17 = vsub.f32 1.0, %v6775_v55 }
 0xde9   :  { %v5149_v57 = vpop.eup %5148  ;;  %v2965_v44 = vadd.f32 %v2956_v3, %v6733_v9 }
 0xdea   :  { %2719 = vrot.lane.b32.xlu1 %v5149_v57, %s5400_s21 }
 0xdeb   :  { %5152 = vtanh.f32 %v2965_v44  ;;  %v2996_v44 = vmul.f32 %v6770_v35, %v6588_v51  ;;  %v2973_v51 = vsub.f32 1.0, %v6782_v5 }
 0xded   :  { %v2954_v59 = vpop.permute.xlu0 %2953 }
 0xdee   :  { %v5151_v38 = vpop.eup %5150  ;;  %v2964_v36 = vadd.f32 %v2954_v59, %v6723_v34 }
 0xdef   :  { %2717 = vrot.lane.b32.xlu2 %v5151_v38, %s5400_s21 }
 0xdf0   :  { %5154 = vtanh.f32 %v2964_v36 }
 0xdf1   :  { %v5153_v30 = vpop.eup %5152 }
 0xdf2   :  { %2983 = vrot.lane.b32.xlu1 %v5153_v30, %s5400_s21  ;;  %v2734_v30 = vmul.f32 %v6775_v55, %v6595_v41  ;;  %v2711_v55 = vsub.f32 1.0, %v6787_v13 }
 0xdf6   :  { %v5155_v29 = vpop.eup %5154 }
 0xdf7   :  { %2981 = vrot.lane.b32.xlu2 %v5155_v29, %s5400_s21 }
 0xe12   :  { %v2694_v7 = vpop.permute.xlu1 %2693 }
 0xe13   :  { %v2703_v58 = vadd.f32 %v2694_v7, %v6739_v21 }
 0xe15   :  { %5156 = vtanh.f32 %v2703_v58  ;;  %v2997_v58 = vmul.f32 %v6782_v5, %v6602_v26  ;;  %v2974_v26 = vsub.f32 1.0, %v6791_v53 }
 0xe1a   :  { %v2958_v9 = vpop.permute.xlu1 %2957 }
 0xe1b   :  { %v5157_v50 = vpop.eup %5156  ;;  %v2966_v10 = vadd.f32 %v2958_v9, %v6745_v31  ;;  %v2971_v31 = vsub.f32 1.0, %v6755_v37 }
 0xe1c   :  { %2721 = vrot.lane.b32.xlu0 %v5157_v50, %s5400_s21 }
 0xe1d   :  { %5158 = vtanh.f32 %v2966_v10 }
 0xe23   :  { %v5159_v34 = vpop.eup %5158 }
 0xe24   :  { %2985 = vrot.lane.b32.xlu0 %v5159_v34, %s5400_s21  ;;  %v2735_v34 = vmul.f32 %v6787_v13, %v6609_v39 }
 0xe2c   :  { %3318 = vrot.lane.b32.xlu0 %v6200_v42, %s5399_s20 }
 0xe33   :  { %v2696_v12 = vpop.permute.xlu0 %2695 }
 0xe34   :  { %v2704_v33 = vadd.f32 %v2696_v12, %v6748_v28  ;;  %3320 = vrot.lane.b32.xlu0 %v6229_v24, %s5399_s20 }
 0xe36   :  { %5160 = vtanh.f32 %v2704_v33 }
 0xe3c   :  { %v5161_v21 = vpop.eup %5160  ;;  %3322 = vrot.lane.b32.xlu0 %v6244_v47, %s5399_s20 }
 0xe3d   :  { %2723 = vrot.lane.b32.xlu2 %v5161_v21, %s5400_s21  ;;  %v2712_v21 = vsub.f32 1.0, %v6795_v27 }
 0xe42   :  { %v2980_v25 = vpop.permute.xlu0 %2979 }
 0xe43   :  { %v2991_v15 = vmul.f32 %v2980_v25, %v2971_v31  ;;  %v2998_v31 = vmul.f32 %v6791_v53, %v6619_v56 }
 0xe44   :  { %3324 = vrot.lane.b32.xlu0 %v6251_v45, %s5399_s20 }
 0xe45   :  { %v6826_v28 = vadd.f32 %v2995_v4, %v2991_v15  ;;  %v2736_v15 = vmul.f32 %v6795_v27, %v6621_v61 }
 0xe47   :  { %3056 = vrot.lane.b32.xlu2 %v6826_v28, %s5400_s21 }
 0xe49   :  { %v2718_v22 = vpop.permute.xlu2 %2717 }
 0xe4a   :  { %v2729_v3 = vmul.f32 %v2718_v22, %v2709_v20 }
 0xe4c   :  { %v6833_v57 = vadd.f32 %v2733_v0, %v2729_v3 }
 0xe4e   :  { %3007 = vrot.lane.b32.xlu1 %v6833_v57, %s5400_s21 }
 0xe51   :  { %v2982_v37 = vpop.permute.xlu2 %2981 }
 0xe52   :  { %v2992_v59 = vmul.f32 %v2982_v37, %v2972_v19 }
 0xe54   :  { %v6840_v38 = vadd.f32 %v2996_v44, %v2992_v59 }
 0xe56   :  { %3058 = vrot.lane.b32.xlu2 %v6840_v38, %s5400_s21 }
 0xe5c   :  { %v2720_v36 = vpop.permute.xlu1 %2719 }
 0xe5d   :  { %v2730_v29 = vmul.f32 %v2720_v36, %v2710_v17 }
 0xe5f   :  { %v6847_v7 = vadd.f32 %v2734_v30, %v2730_v29 }
 0xe61   :  { %3009 = vrot.lane.b32.xlu1 %v6847_v7, %s5400_s21 }
 0xe64   :  { %v2984_v35 = vpop.permute.xlu1 %2983 }
 0xe65   :  { %v2993_v9 = vmul.f32 %v2984_v35, %v2973_v51 }
 0xe67   :  { %v6854_v50 = vadd.f32 %v2997_v58, %v2993_v9 }
 0xe69   :  { %3060 = vrot.lane.b32.xlu2 %v6854_v50, %s5400_s21 }
 0xe8e   :  { %v2722_v10 = vpop.permute.xlu0 %2721 }
 0xe8f   :  { %v2731_v12 = vmul.f32 %v2722_v10, %v2711_v55 }
 0xe91   :  { %v6861_v33 = vadd.f32 %v2735_v34, %v2731_v12 }
 0xe93   :  { %7834 = vst [vmem:[#allocation13_spill] sm:$0xff] %v6861_v33  ;;  %3011 = vrot.lane.b32.xlu1 %v6861_v33, %s5400_s21 }
 0xe96   :  { %v2986_v5 = vpop.permute.xlu0 %2985 }
 0xe97   :  { %v2994_v25 = vmul.f32 %v2986_v5, %v2974_v26  ;;  %v2724_v4 = vpop.permute.xlu2 %2723 }
 0xe98   :  { %v2732_v13 = vmul.f32 %v2724_v4, %v2712_v21 }
 0xe99   :  { %v6871_v20 = vadd.f32 %v2998_v31, %v2994_v25 }
 0xe9a   :  { %v6873_v22 = vadd.f32 %v2736_v15, %v2732_v13 }
 0xe9b   :  { %3062 = vrot.lane.b32.xlu2 %v6871_v20, %s5400_s21 }
 0xe9c   :  { %7835 = vst [vmem:[#allocation14_spill] sm:$0xff] %v6873_v22  ;;  %3013 = vrot.lane.b32.xlu1 %v6873_v22, %s5400_s21 }
 0xe9e   :  { %v3319_v0 = vpop.permute.xlu0 %3318 }
 0xe9f   :  { %4843 = vmatmul.msk.f32.vlgmr.msrb.gmra.mxu1 %vm32_vm0, %v3319_v0 }
 0xea1   :  { %v3057_v56 = vpop.permute.xlu2 %3056 }
 0xea2   :  { %4831 = vmatmul.msk.f32.vlgmr.msra.gmra.mxu3 %vm32_vm0, %v3057_v56  ;;  %4839 = vmatmul.msk.f32.vlgmr.msrb.gmra.mxu0 %vm32_vm0, %v3057_v56 }
 0xea3   :  { %4116 = vmatpush.msra.mxu3 %v6640_v32 }
 0xea5   :  { %4117 = vmatpush.msra.mxu3 %v6649_v40 }
 0xea6   :  { %v3321_v53 = vpop.permute.xlu0 %3320 }
 0xea7   :  { %4844 = vmatmul.msk.f32.gmra.mxu1 %vm32_vm0, %v3321_v53  ;;  %4118 = vmatpush.msra.mxu3 %v6657_v52 }
 0xea9   :  { %4119 = vmatpush.msra.mxu3 %v6667_v16 }
 0xeae   :  { %v3323_v27 = vpop.permute.xlu0 %3322 }
 0xeaf   :  { %4845 = vmatmul.msk.f32.gmra.mxu1 %vm32_vm0, %v3323_v27 }
 0xeb0   :  { %v3059_v3 = vpop.permute.xlu2 %3058 }
 0xeb1   :  { %4832 = vmatmul.msk.f32.gmra.mxu3 %vm32_vm0, %v3059_v3  ;;  %4840 = vmatmul.msk.f32.gmra.mxu0 %vm32_vm0, %v3059_v3 }
 0xeb6   :  { %v3325_v19 = vpop.permute.xlu0 %3324 }
 0xeb7   :  { %4846 = vmatmul.msk.f32.gmra.mxu1 %vm32_vm0, %v3325_v19 }
 0xec0   :  { %v3008_v32 = vpop.permute.xlu1 %3007 }
 0xec1   :  { %4827 = vmatmul.msk.f32.vlgmr.msra.gmra.mxu2 %vm32_vm0, %v3008_v32 }
 0xec2   :  { %4067 = vmatpush.msra.mxu2 %v6679_v6 }
 0xec3   :  { %v3061_v40 = vpop.permute.xlu2 %3060 }
 0xec4   :  { %4833 = vmatmul.msk.f32.gmra.mxu3 %vm32_vm0, %v3061_v40  ;;  %4841 = vmatmul.msk.f32.gmra.mxu0 %vm32_vm0, %v3061_v40 }
 0xec5   :  { %4068 = vmatpush.msra.mxu2 %v6685_v2 }
 0xec7   :  { %4069 = vmatpush.msra.mxu2 %v6691_v54  ;;  %v6906_v54 = vld [vmem:[%s7802_s3 + $0x80] ss:$0 sm:$0xff] }
 0xec9   :  { %4070 = vmatpush.msra.mxu2 %v6697_v1 }
 0xed3   :  { %v3010_v52 = vpop.permute.xlu1 %3009 }
 0xed4   :  { %4828 = vmatmul.msk.f32.gmra.mxu2 %vm32_vm0, %v3010_v52 }
 0xef5   :  { %v3063_v16 = vpop.permute.xlu2 %3062 }
 0xef6   :  { %4834 = vmatmul.msk.f32.gmra.mxu3 %vm32_vm0, %v3063_v16  ;;  %4842 = vmatmul.msk.f32.gmra.mxu0 %vm32_vm0, %v3063_v16 }
 0xf05   :  { %v3012_v6 = vpop.permute.xlu1 %3011 }
 0xf06   :  { %4829 = vmatmul.msk.f32.gmra.mxu2 %vm32_vm0, %v3012_v6 }
 0xf0e   :  { %v3014_v37 = vpop.permute.xlu1 %3013 }
 0xf0f   :  { %4830 = vmatmul.msk.f32.gmra.mxu2 %vm32_vm0, %v3014_v37 }
 0xf1c   :  { %v3351_v44 = vpop.f32.mrf.mxu1 }
 0xf1f   :  { %v3306_v2 = vpop.f32.mrf.mxu0 }
 0xf20   :  { %v3352_v59 = vadd.f32 %v3351_v44, %v3306_v2 }
 0xf22   :  { %v6909_v1 = vadd.f32 %v6906_v54, %v3352_v59 }
 0xf24   :  { %3447 = vrot.lane.b32.xlu2 %v6909_v1, %s5398_s19  ;;  %v3354_v35 = vpop.f32.mrf.mxu1  ;;  %v4847_v25 = vmul.f32 -1.442695, %v6909_v1 }
 0xf25   :  { %v3089_v17 = vpop.f32.mrf.mxu3 }
 0xf26   :  { %5162 = vpow2.f32 %v4847_v25 }
 0xf2c   :  { %v3357_v5 = vpop.f32.mrf.mxu1  ;;  %v5163_v4 = vpop.eup %5162 }
 0xf2d   :  { %v3379_v15 = vadd.f32 1.0, %v5163_v4 }
 0xf2e   :  { %v3309_v51 = vpop.f32.mrf.mxu0 }
 0xf2f   :  { %v3355_v58 = vadd.f32 %v3354_v35, %v3309_v51  ;;  %5164 = vrcp.f32 %v3379_v15  ;;  %v3394_v51 = vand.u32 2147483648, %v3379_v15  ;;  %vm3388_vm13 = vweird.f32 %v3379_v15 }
 0xf30   :  { %v3392_v35 = vand.u32 2147483647, %v3379_v15 }
 0xf31   :  { %v6919_v9 = vadd.f32 %v6906_v54, %v3355_v58 }
 0xf32   :  { %vm3393_vm15 = vcmp.eq.f32.partialorder %v3392_v35, 8.507059e+37 }
 0xf34   :  { %v3092_v55 = vpop.f32.mrf.mxu3  ;;  %v3360_v52 = vpop.f32.mrf.mxu1 }
 0xf35   :  { %v5165_v13 = vpop.eup %5164 }
 0xf36   :  { %v3384_v56 = vmul.f32 %v5165_v13, %v3379_v15  ;;  %vm3389_vm12 = vweird.f32 %v5165_v13 }
 0xf37   :  { %vm3390_vm14 = vmor %vm3388_vm13, %vm3389_vm12 }
 0xf38   :  { %v3385_v32 = vsub.f32 1.0, %v3384_v56 }
 0xf3a   :  { %v3386_v6 = vmul.f32 %v5165_v13, %v3385_v32 }
 0xf41   :  { %v3312_v26 = vpop.f32.mrf.mxu0 }
 0xf42   :  { %v3358_v21 = vadd.f32 %v3357_v5, %v3312_v26 }
 0xf44   :  { %v3040_v36 = vpop.f32.mrf.mxu2  ;;  %v6929_v31 = vadd.f32 %v6906_v54, %v3358_v21 }
 0xf45   :  { %v3090_v30 = vadd.f32 %v3089_v17, %v3040_v36  ;;  %v3387_v17 = vadd.f32 %v5165_v13, %v3386_v6 }
 0xf47   :  { %v6914_v29 = vadd.f32 %v6715_v60, %v3090_v30  ;;  %v3095_v0 = vpop.f32.mrf.mxu3  ;;  %v4848_v30 = vmul.f32 -1.442695, %v6919_v9 }
 0xf49   :  { %3185 = vrot.lane.b32.xlu1 %v6914_v29, %s5398_s19  ;;  %v4835_v40 = vmul.f32 -1.442695, %v6914_v29 }
 0xf4b   :  { %5166 = vpow2.f32 %v4835_v40 }
 0xf4c   :  { %5168 = vpow2.f32 %v4848_v30 }
 0xf51   :  { %3449 = vrot.lane.b32.xlu1 %v6919_v9, %s5398_s19  ;;  %v5167_v58 = vpop.eup %5166 }
 0xf52   :  { %v3117_v26 = vadd.f32 1.0, %v5167_v58  ;;  %v5169_v21 = vpop.eup %5168 }
 0xf53   :  { %v3380_v4 = vadd.f32 1.0, %v5169_v21 }
 0xf54   :  { %5170 = vrcp.f32 %v3117_v26  ;;  %vm3126_vm2 = vweird.f32 %v3117_v26 }
 0xf55   :  { %vm3403_vm6 = vweird.f32 %v3380_v4 }
 0xf57   :  { %v3043_v10 = vpop.f32.mrf.mxu2 }
 0xf58   :  { %v3093_v34 = vadd.f32 %v3092_v55, %v3043_v10  ;;  %v3391_v55 = vsel %vm3390_vm14, %v5165_v13, %v3387_v17  ;;  %v3395_v10 = vor.u32 1.1754944e-38, %v3394_v51 }
 0xf5a   :  { %v6924_v12 = vadd.f32 %v6715_v60, %v3093_v34  ;;  %v5171_v15 = vpop.eup %5170 }
 0xf5b   :  { %v3122_v13 = vmul.f32 %v5171_v15, %v3117_v26  ;;  %vm3127_vm1 = vweird.f32 %v5171_v15 }
 0xf5c   :  { %3187 = vrot.lane.b32.xlu0 %v6924_v12, %s5398_s19  ;;  %v4836_v25 = vmul.f32 -1.442695, %v6924_v12  ;;  %vm3128_vm3 = vmor %vm3126_vm2, %vm3127_vm1 }
 0xf5e   :  { %5172 = vpow2.f32 %v4836_v25  ;;  %v3409_v25 = vand.u32 2147483648, %v3380_v4 }
 0xf5f   :  { %5174 = vrcp.f32 %v3380_v4 }
 0xf64   :  { %3451 = vrot.lane.b32.xlu0 %v6929_v31, %s5398_s19  ;;  %v5173_v56 = vpop.eup %5172 }
 0xf73   :  { %v3315_v19 = vpop.f32.mrf.mxu0 }
 0xf74   :  { %v3361_v16 = vadd.f32 %v3360_v52, %v3315_v19  ;;  %v3118_v19 = vadd.f32 1.0, %v5173_v56  ;;  %v3410_v56 = vor.u32 1.1754944e-38, %v3409_v25 }
 0xf76   :  { %v6941_v59 = vadd.f32 %v6906_v54, %v3361_v16  ;;  %vm3141_vm10 = vweird.f32 %v3118_v19 }
 0xf79   :  { %v3098_v37 = vpop.f32.mrf.mxu3 }
 0xf7e   :  { %v3448_v34 = vpop.permute.xlu2 %3447 }
 0xf89   :  { %v3046_v53 = vpop.f32.mrf.mxu2 }
 0xf8a   :  { %v3096_v27 = vadd.f32 %v3095_v0, %v3046_v53  ;;  %v4849_v0 = vmul.f32 -1.442695, %v6929_v31  ;;  %v3123_v53 = vsub.f32 1.0, %v3122_v13 }
 0xf8c   :  { %v6935_v3 = vadd.f32 %v6715_v60, %v3096_v27  ;;  %v5175_v27 = vpop.eup %5174  ;;  %5176 = vpow2.f32 %v4849_v0  ;;  %v3124_v32 = vmul.f32 %v5171_v15, %v3123_v53  ;;  %v4850_v53 = vmul.f32 -1.442695, %v6941_v59 }
 0xf8d   :  { %v3399_v40 = vmul.f32 %v5175_v27, %v3380_v4  ;;  %5178 = vrcp.f32 %v3118_v19  ;;  %vm3404_vm5 = vweird.f32 %v5175_v27 }
 0xf8e   :  { %3189 = vrot.lane.b32.xlu2 %v6935_v3, %s5398_s19  ;;  %v3125_v16 = vadd.f32 %v5171_v15, %v3124_v32  ;;  %v4837_v58 = vmul.f32 -1.442695, %v6935_v3  ;;  %vm3405_vm7 = vmor %vm3403_vm6, %vm3404_vm5 }
 0xf8f   :  { %v3400_v6 = vsub.f32 1.0, %v3399_v40 }
 0xf90   :  { %v3129_v30 = vsel %vm3128_vm3, %v5171_v15, %v3125_v16 }
 0xf91   :  { %v3401_v51 = vmul.f32 %v5175_v27, %v3400_v6 }
 0xf92   :  { %v3049_v44 = vpop.f32.mrf.mxu2  ;;  %v5177_v52 = vpop.eup %5176 }
 0xf93   :  { %v3099_v2 = vadd.f32 %v3098_v37, %v3049_v44  ;;  %v3132_v37 = vand.u32 2147483648, %v3117_v26  ;;  %v6957_v44 = vadd.f32 1.0, %v5177_v52  ;;  %v5179_v17 = vpop.eup %5178  ;;  %v3402_v21 = vadd.f32 %v5175_v27, %v3401_v51 }
 0xf94   :  { %vm3142_vm9 = vweird.f32 %v5179_v17  ;;  %v3145_v51 = vand.u32 2147483647, %v3118_v19 }
 0xf95   :  { %v6944_v36 = vadd.f32 %v6715_v60, %v3099_v2  ;;  %v6951_v60 = vsel %vm3393_vm15, %v3395_v10, %v3391_v55  ;;  %v3130_v2 = vand.u32 2147483647, %v3117_v26  ;;  %v3133_v35 = vor.u32 1.1754944e-38, %v3132_v37  ;;  %vm3143_vm11 = vmor %vm3141_vm10, %vm3142_vm9 }
 0xf96   :  { %3453 = vrot.lane.b32.xlu2 %v6941_v59, %s5398_s19  ;;  %v3459_v5 = vmul.f32 %v3448_v34, %v6951_v60  ;;  %5180 = vrcp.f32 %v6957_v44  ;;  %v3137_v34 = vmul.f32 %v5179_v17, %v3118_v19  ;;  %v3407_v26 = vand.u32 2147483647, %v3380_v4 }
 0xf97   :  { %3191 = vrot.lane.b32.xlu1 %v6944_v36, %s5398_s19  ;;  %vm3131_vm4 = vcmp.eq.f32.partialorder %v3130_v2, 8.507059e+37  ;;  %5182 = vpow2.f32 %v4837_v58  ;;  %v3406_v0 = vsel %vm3405_vm7, %v5175_v27, %v3402_v21  ;;  %vm3146_vm12 = vcmp.eq.f32.partialorder %v3145_v51, 8.507059e+37 }
 0xf98   :  { %v6961_v10 = vsel %vm3131_vm4, %v3133_v35, %v3129_v30  ;;  %v3138_v15 = vsub.f32 1.0, %v3137_v34  ;;  %vm3408_vm8 = vcmp.eq.f32.partialorder %v3407_v26, 8.507059e+37  ;;  %5184 = vpow2.f32 %v4850_v53 }
 0xf99   :  { %v6966_v40 = vsel %vm3408_vm8, %v3410_v56, %v3406_v0  ;;  %v3147_v30 = vand.u32 2147483648, %v3118_v19  ;;  %v3424_v0 = vand.u32 2147483648, %v6957_v44  ;;  %vm3418_vm14 = vweird.f32 %v6957_v44 }
 0xf9a   :  { %v3139_v52 = vmul.f32 %v5179_v17, %v3138_v15  ;;  %v3422_v19 = vand.u32 2147483647, %v6957_v44 }
 0xf9b   :  { %v3425_v53 = vor.u32 1.1754944e-38, %v3424_v0 }
 0xf9c   :  { %v5181_v13 = vpop.eup %5180  ;;  %v3140_v4 = vadd.f32 %v5179_v17, %v3139_v52  ;;  %vm3423_vm1 = vcmp.eq.f32.partialorder %v3422_v19, 8.507059e+37 }
 0xf9d   :  { %v3414_v16 = vmul.f32 %v5181_v13, %v6957_v44  ;;  %v5183_v37 = vpop.eup %5182  ;;  %vm3419_vm13 = vweird.f32 %v5181_v13 }
 0xf9e   :  { %v3119_v27 = vadd.f32 1.0, %v5183_v37  ;;  %v3144_v35 = vsel %vm3143_vm11, %v5179_v17, %v3140_v4  ;;  %v5185_v34 = vpop.eup %5184  ;;  %vm3420_vm15 = vmor %vm3418_vm14, %vm3419_vm13 }
 0xf9f   :  { %3467 = vrot.lane.b32.xlu1 %v3459_v5, %s5399_s20  ;;  %v3415_v2 = vsub.f32 1.0, %v3414_v16  ;;  %v3382_v15 = vadd.f32 1.0, %v5185_v34 }
 0xfa0   :  { %5186 = vrcp.f32 %v3119_v27  ;;  %vm3156_vm3 = vweird.f32 %v3119_v27 }
 0xfa1   :  { %v3416_v58 = vmul.f32 %v5181_v13, %v3415_v2  ;;  %5188 = vrcp.f32 %v3382_v15  ;;  %v4838_v2 = vmul.f32 -1.442695, %v6944_v36  ;;  %vm3433_vm7 = vweird.f32 %v3382_v15 }
 0xfa3   :  { %v3417_v26 = vadd.f32 %v5181_v13, %v3416_v58  ;;  %5190 = vpow2.f32 %v4838_v2  ;;  %v3160_v58 = vand.u32 2147483647, %v3119_v27 }
 0xfa5   :  { %v3421_v56 = vsel %vm3420_vm15, %v5181_v13, %v3417_v26  ;;  %vm3161_vm5 = vcmp.eq.f32.partialorder %v3160_v58, 8.507059e+37 }
 0xfa6   :  { %v5187_v17 = vpop.eup %5186  ;;  %v6978_v16 = vsel %vm3423_vm1, %v3425_v53, %v3421_v56 }
 0xfa7   :  { %v5189_v4 = vpop.eup %5188  ;;  %vm3157_vm2 = vweird.f32 %v5187_v17 }
 0xfa8   :  { %v3429_v44 = vmul.f32 %v5189_v4, %v3382_v15  ;;  %vm3158_vm4 = vmor %vm3156_vm3, %vm3157_vm2  ;;  %vm3434_vm6 = vweird.f32 %v5189_v4 }
 0xfa9   :  { %vm3435_vm8 = vmor %vm3433_vm7, %vm3434_vm6 }
 0xfaa   :  { %v3430_v13 = vsub.f32 1.0, %v3429_v44 }
 0xfac   :  { %v3431_v34 = vmul.f32 %v5189_v4, %v3430_v13 }
 0xfae   :  { %v3432_v53 = vadd.f32 %v5189_v4, %v3431_v34 }
 0xfbb   :  { %v3186_v55 = vpop.permute.xlu1 %3185 }
 0xfbc   :  { %v3197_v5 = vmul.f32 %v3186_v55, %v6961_v10  ;;  %v3148_v55 = vor.u32 1.1754944e-38, %v3147_v30 }
 0xfbe   :  { %3205 = vrot.lane.b32.xlu0 %v3197_v5, %s5399_s20  ;;  %v6971_v21 = vsel %vm3146_vm12, %v3148_v55, %v3144_v35  ;;  %v3162_v35 = vand.u32 2147483648, %v3119_v27 }
 0xfc3   :  { %v3450_v32 = vpop.permute.xlu1 %3449 }
 0xfc4   :  { %v3460_v6 = vmul.f32 %v3450_v32, %v6966_v40  ;;  %v3152_v32 = vmul.f32 %v5187_v17, %v3119_v27  ;;  %v3436_v27 = vsel %vm3435_vm8, %v5189_v4, %v3432_v53 }
 0xfc6   :  { %3469 = vrot.lane.b32.xlu0 %v3460_v6, %s5399_s20  ;;  %v3153_v37 = vsub.f32 1.0, %v3152_v32  ;;  %v3439_v32 = vand.u32 2147483648, %v3382_v15 }
 0xfc8   :  { %v3154_v30 = vmul.f32 %v5187_v17, %v3153_v37 }
 0xfca   :  { %v3155_v51 = vadd.f32 %v5187_v17, %v3154_v30 }
 0xfcc   :  { %v3159_v55 = vsel %vm3158_vm4, %v5187_v17, %v3155_v51  ;;  %v3440_v17 = vor.u32 1.1754944e-38, %v3439_v32 }
 0xfce   :  { %v3188_v5 = vpop.permute.xlu0 %3187 }
 0xfcf   :  { %v3198_v25 = vmul.f32 %v3188_v5, %v6971_v21  ;;  %v5191_v5 = vpop.eup %5190 }
 0xfd0   :  { %v3120_v19 = vadd.f32 1.0, %v5191_v5 }
 0xfd1   :  { %3207 = vrot.lane.b32.xlu2 %v3198_v25, %s5399_s20  ;;  %v3163_v25 = vor.u32 1.1754944e-38, %v3162_v35 }
 0xfd2   :  { %5192 = vrcp.f32 %v3120_v19  ;;  %v3177_v58 = vand.u32 2147483648, %v3120_v19  ;;  %vm3171_vm11 = vweird.f32 %v3120_v19 }
 0xfd3   :  { %v6983_v26 = vsel %vm3161_vm5, %v3163_v25, %v3159_v55 }
 0xfd4   :  { %v3178_v55 = vor.u32 1.1754944e-38, %v3177_v58 }
 0xfd6   :  { %v3452_v52 = vpop.permute.xlu0 %3451 }
 0xfd7   :  { %v3461_v6 = vmul.f32 %v3452_v52, %v6978_v16  ;;  %v3437_v52 = vand.u32 2147483647, %v3382_v15  ;;  %v3175_v15 = vand.u32 2147483647, %v3120_v19 }
 0xfd8   :  { %v5193_v30 = vpop.eup %5192 }
 0xfd9   :  { %3471 = vrot.lane.b32.xlu2 %v3461_v6, %s5399_s20  ;;  %vm3438_vm9 = vcmp.eq.f32.partialorder %v3437_v52, 8.507059e+37  ;;  %v3167_v44 = vmul.f32 %v5193_v30, %v3120_v19  ;;  %vm3172_vm10 = vweird.f32 %v5193_v30  ;;  %vm3176_vm13 = vcmp.eq.f32.partialorder %v3175_v15, 8.507059e+37 }
 0xfda   :  { %v6987_v6 = vsel %vm3438_vm9, %v3440_v17, %v3436_v27  ;;  %vm3173_vm12 = vmor %vm3171_vm11, %vm3172_vm10 }
 0xfdb   :  { %v3168_v51 = vsub.f32 1.0, %v3167_v44 }
 0xfdd   :  { %v3169_v13 = vmul.f32 %v5193_v30, %v3168_v51 }
 0xfdf   :  { %v3170_v35 = vadd.f32 %v5193_v30, %v3169_v13 }
 0xfe1   :  { %v3174_v4 = vsel %vm3173_vm12, %v5193_v30, %v3170_v35 }
 0xfe2   :  { %v6991_v5 = vsel %vm3176_vm13, %v3178_v55, %v3174_v4 }
 0xfe8   :  { %v3190_v0 = vpop.permute.xlu2 %3189 }
 0xfe9   :  { %v3199_v56 = vmul.f32 %v3190_v0, %v6983_v26 }
 0xfeb   :  { %3209 = vrot.lane.b32.xlu1 %v3199_v56, %s5399_s20 }
 0xff0   :  { %v3454_v37 = vpop.permute.xlu2 %3453 }
 0xff1   :  { %v3462_v2 = vmul.f32 %v3454_v37, %v6987_v6 }
 0xff3   :  { %3473 = vrot.lane.b32.xlu1 %v3462_v2, %s5399_s20 }
0x1009   :  { %v3192_v34 = vpop.permute.xlu1 %3191 }
0x100a   :  { %v3200_v25 = vmul.f32 %v3192_v34, %v6991_v5  ;;  %v3511_v34 = vmul.f32 %v6951_v60, %v6826_v28  ;;  %v3488_v28 = vsub.f32 1.0, %v6966_v40 }
0x100c   :  { %3211 = vrot.lane.b32.xlu0 %v3200_v25, %s5399_s20  ;;  %v3249_v25 = vmul.f32 %v6961_v10, %v6833_v57 }
0x1011   :  { %v3468_v0 = vpop.permute.xlu1 %3467 }
0x1012   :  { %v3479_v56 = vadd.f32 %v3468_v0, %v6909_v1 }
0x1014   :  { %5194 = vtanh.f32 %v3479_v56 }
0x101a   :  { %v5195_v53 = vpop.eup %5194 }
0x101b   :  { %3495 = vrot.lane.b32.xlu0 %v5195_v53, %s5400_s21 }
0x102b   :  { %v3208_v32 = vpop.permute.xlu2 %3207 }
0x102c   :  { %v3218_v19 = vadd.f32 %v3208_v32, %v6924_v12 }
0x102e   :  { %5196 = vtanh.f32 %v3218_v19 }
0x1030   :  { %v3206_v52 = vpop.permute.xlu0 %3205 }
0x1031   :  { %v3217_v27 = vadd.f32 %v3206_v52, %v6914_v29  ;;  %v3250_v52 = vmul.f32 %v6971_v21, %v6847_v7 }
0x1033   :  { %5198 = vtanh.f32 %v3217_v27  ;;  %v3472_v17 = vpop.permute.xlu2 %3471 }
0x1034   :  { %v5197_v37 = vpop.eup %5196  ;;  %v3481_v2 = vadd.f32 %v3472_v17, %v6929_v31 }
0x1035   :  { %3235 = vrot.lane.b32.xlu1 %v5197_v37, %s5400_s21  ;;  %v3513_v37 = vmul.f32 %v6978_v16, %v6854_v50  ;;  %v3490_v50 = vsub.f32 1.0, %v6987_v6 }
0x1036   :  { %5200 = vtanh.f32 %v3481_v2 }
0x1038   :  { %v3470_v1 = vpop.permute.xlu0 %3469 }
0x1039   :  { %v5199_v30 = vpop.eup %5198  ;;  %v3480_v44 = vadd.f32 %v3470_v1, %v6919_v9 }
0x103a   :  { %3233 = vrot.lane.b32.xlu2 %v5199_v30, %s5400_s21 }
0x103b   :  { %5202 = vtanh.f32 %v3480_v44  ;;  %v3251_v44 = vmul.f32 %v6983_v26, %v6861_v33 }
0x103c   :  { %v5201_v12 = vpop.eup %5200 }
0x103d   :  { %3499 = vrot.lane.b32.xlu1 %v5201_v12, %s5400_s21 }
0x1041   :  { %v5203_v51 = vpop.eup %5202 }
0x1042   :  { %3497 = vrot.lane.b32.xlu2 %v5203_v51, %s5400_s21 }
0x105d   :  { %v3210_v29 = vpop.permute.xlu1 %3209 }
0x105e   :  { %v3219_v13 = vadd.f32 %v3210_v29, %v6935_v3  ;;  %v3228_v29 = vsub.f32 1.0, %v6991_v5 }
0x1060   :  { %5204 = vtanh.f32 %v3219_v13  ;;  %v3514_v13 = vmul.f32 %v6987_v6, %v6871_v20 }
0x1065   :  { %v3474_v31 = vpop.permute.xlu1 %3473 }
0x1066   :  { %v5205_v35 = vpop.eup %5204  ;;  %v3482_v58 = vadd.f32 %v3474_v31, %v6941_v59  ;;  %v3487_v59 = vsub.f32 1.0, %v6951_v60  ;;  %v3512_v60 = vmul.f32 %v6966_v40, %v6840_v38  ;;  %v3489_v38 = vsub.f32 1.0, %v6978_v16 }
0x1067   :  { %3237 = vrot.lane.b32.xlu0 %v5205_v35, %s5400_s21 }
0x1068   :  { %5206 = vtanh.f32 %v3482_v58  ;;  %v3252_v58 = vmul.f32 %v6991_v5, %v6873_v22 }
0x106e   :  { %v5207_v9 = vpop.eup %5206 }
0x106f   :  { %3501 = vrot.lane.b32.xlu0 %v5207_v9, %s5400_s21 }
0x1077   :  { %3834 = vrot.lane.b32.xlu0 %v6200_v42, %s5398_s19 }
0x107e   :  { %v3212_v15 = vpop.permute.xlu0 %3211 }
0x107f   :  { %v3220_v4 = vadd.f32 %v3212_v15, %v6944_v36  ;;  %3836 = vrot.lane.b32.xlu0 %v6229_v24, %s5398_s19  ;;  %v3225_v24 = vsub.f32 1.0, %v6961_v10  ;;  %v3226_v10 = vsub.f32 1.0, %v6971_v21  ;;  %v3227_v21 = vsub.f32 1.0, %v6983_v26 }
0x1081   :  { %5208 = vtanh.f32 %v3220_v4 }
0x1087   :  { %v5209_v3 = vpop.eup %5208  ;;  %3838 = vrot.lane.b32.xlu0 %v6244_v47, %s5398_s19 }
0x1088   :  { %3239 = vrot.lane.b32.xlu2 %v5209_v3, %s5400_s21 }
0x108d   :  { %v3496_v55 = vpop.permute.xlu0 %3495 }
0x108e   :  { %v3507_v42 = vmul.f32 %v3496_v55, %v3487_v59 }
0x108f   :  { %3840 = vrot.lane.b32.xlu0 %v6251_v45, %s5398_s19 }
0x1090   :  { %v7022_v36 = vadd.f32 %v3511_v34, %v3507_v42 }
0x1092   :  { %3572 = vrot.lane.b32.xlu2 %v7022_v36, %s5400_s21 }
0x1094   :  { %v3234_v47 = vpop.permute.xlu2 %3233 }
0x1095   :  { %v3245_v0 = vmul.f32 %v3234_v47, %v3225_v24 }
0x1097   :  { %v7029_v56 = vadd.f32 %v3249_v25, %v3245_v0 }
0x1099   :  { %3523 = vrot.lane.b32.xlu1 %v7029_v56, %s5400_s21 }
0x109c   :  { %v3498_v45 = vpop.permute.xlu2 %3497 }
0x109d   :  { %v3508_v53 = vmul.f32 %v3498_v45, %v3488_v28 }
0x109f   :  { %v7036_v32 = vadd.f32 %v3512_v60, %v3508_v53 }
0x10a1   :  { %3574 = vrot.lane.b32.xlu2 %v7036_v32, %s5400_s21 }
0x10a7   :  { %v3236_v19 = vpop.permute.xlu1 %3235 }
0x10a8   :  { %v3246_v27 = vmul.f32 %v3236_v19, %v3226_v10 }
0x10aa   :  { %v7043_v17 = vadd.f32 %v3250_v52, %v3246_v27 }
0x10ac   :  { %3525 = vrot.lane.b32.xlu1 %v7043_v17, %s5400_s21 }
0x10af   :  { %v3500_v40 = vpop.permute.xlu1 %3499 }
0x10b0   :  { %v3509_v2 = vmul.f32 %v3500_v40, %v3489_v38 }
0x10b2   :  { %v7050_v1 = vadd.f32 %v3513_v37, %v3509_v2 }
0x10b4   :  { %3576 = vrot.lane.b32.xlu2 %v7050_v1, %s5400_s21 }
0x10d9   :  { %v3238_v30 = vpop.permute.xlu0 %3237 }
0x10da   :  { %v3247_v12 = vmul.f32 %v3238_v30, %v3227_v21 }
0x10dc   :  { %v7057_v51 = vadd.f32 %v3251_v44, %v3247_v12  ;;  %v7109_v44 = vld [vmem:[%s7802_s3 + $0x88] ss:$0 sm:$0xff] }
0x10de   :  { %7836 = vst [vmem:[#allocation15_spill] sm:$0xff] %v7057_v51  ;;  %3527 = vrot.lane.b32.xlu1 %v7057_v51, %s5400_s21 }
0x10e1   :  { %v3502_v16 = vpop.permute.xlu0 %3501 }
0x10e2   :  { %v3510_v31 = vmul.f32 %v3502_v16, %v3490_v50  ;;  %v3240_v35 = vpop.permute.xlu2 %3239  ;;  %v4895_v50 = vld [vmem:[%s7804_s4] ss:$0 sm:$0xff] }
0x10e3   :  { %v3248_v26 = vmul.f32 %v3240_v35, %v3228_v29 }
0x10e4   :  { %v7067_v9 = vadd.f32 %v3514_v13, %v3510_v31 }
0x10e5   :  { %v7069_v15 = vadd.f32 %v3252_v58, %v3248_v26 }
0x10e6   :  { %3578 = vrot.lane.b32.xlu2 %v7067_v9, %s5400_s21 }
0x10e7   :  { %7837 = vst [vmem:[#allocation16_spill] sm:$0xff] %v7069_v15  ;;  %3529 = vrot.lane.b32.xlu1 %v7069_v15, %s5400_s21 }
0x10e9   :  { %v3835_v4 = vpop.permute.xlu0 %3834 }
0x10ea   :  { %4867 = vmatmul.msk.f32.vlgmr.msra.gmra.mxu1 %vm32_vm0, %v3835_v4 }
0x10ec   :  { %v3573_v20 = vpop.permute.xlu2 %3572 }
0x10ed   :  { %4855 = vmatmul.msk.f32.vlgmr.msrb.gmra.mxu3 %vm32_vm0, %v3573_v20  ;;  %4863 = vmatmul.msk.f32.vlgmr.msra.gmra.mxu0 %vm32_vm0, %v3573_v20 }
0x10f1   :  { %v3837_v6 = vpop.permute.xlu0 %3836 }
0x10f2   :  { %4868 = vmatmul.msk.f32.gmra.mxu1 %vm32_vm0, %v3837_v6 }
0x10f9   :  { %v3839_v5 = vpop.permute.xlu0 %3838 }
0x10fa   :  { %4869 = vmatmul.msk.f32.gmra.mxu1 %vm32_vm0, %v3839_v5 }
0x10fb   :  { %v3575_v3 = vpop.permute.xlu2 %3574 }
0x10fc   :  { %4856 = vmatmul.msk.f32.gmra.mxu3 %vm32_vm0, %v3575_v3  ;;  %4864 = vmatmul.msk.f32.gmra.mxu0 %vm32_vm0, %v3575_v3 }
0x1101   :  { %v3841_v59 = vpop.permute.xlu0 %3840 }
0x1102   :  { %4870 = vmatmul.msk.f32.gmra.mxu1 %vm32_vm0, %v3841_v59 }
0x110b   :  { %v3524_v55 = vpop.permute.xlu1 %3523 }
0x110c   :  { %4851 = vmatmul.msk.f32.vlgmr.msrb.gmra.mxu2 %vm32_vm0, %v3524_v55 }
0x110e   :  { %v3577_v34 = vpop.permute.xlu2 %3576 }
0x110f   :  { %4857 = vmatmul.msk.f32.gmra.mxu3 %vm32_vm0, %v3577_v34  ;;  %4865 = vmatmul.msk.f32.gmra.mxu0 %vm32_vm0, %v3577_v34 }
0x111e   :  { %v3526_v42 = vpop.permute.xlu1 %3525 }
0x111f   :  { %4852 = vmatmul.msk.f32.gmra.mxu2 %vm32_vm0, %v3526_v42 }
0x1140   :  { %v3579_v24 = vpop.permute.xlu2 %3578 }
0x1141   :  { %4858 = vmatmul.msk.f32.gmra.mxu3 %vm32_vm0, %v3579_v24  ;;  %4866 = vmatmul.msk.f32.gmra.mxu0 %vm32_vm0, %v3579_v24 }
0x1150   :  { %v3528_v47 = vpop.permute.xlu1 %3527 }
0x1151   :  { %4853 = vmatmul.msk.f32.gmra.mxu2 %vm32_vm0, %v3528_v47 }
0x1159   :  { %v3530_v25 = vpop.permute.xlu1 %3529 }
0x115a   :  { %4854 = vmatmul.msk.f32.gmra.mxu2 %vm32_vm0, %v3530_v25 }
0x1167   :  { %v3867_v0 = vpop.f32.mrf.mxu1 }
0x116a   :  { %v3822_v28 = vpop.f32.mrf.mxu0 }
0x116b   :  { %v3868_v45 = vadd.f32 %v3867_v0, %v3822_v28 }
0x116d   :  { %v7092_v60 = vadd.f32 %v6906_v54, %v3868_v45 }
0x116f   :  { %3963 = vrot.lane.b32.xlu2 %v7092_v60, %s5398_s19  ;;  %v3870_v53 = vpop.f32.mrf.mxu1  ;;  %v4871_v35 = vmul.f32 -1.442695, %v7092_v60 }
0x1170   :  { %v3605_v37 = vpop.f32.mrf.mxu3 }
0x1171   :  { %5210 = vpow2.f32 %v4871_v35 }
0x1177   :  { %v3873_v27 = vpop.f32.mrf.mxu1  ;;  %v5211_v4 = vpop.eup %5210 }
0x1178   :  { %v7130_v3 = vadd.f32 1.0, %v5211_v4 }
0x1179   :  { %v3825_v10 = vpop.f32.mrf.mxu0 }
0x117a   :  { %v3871_v19 = vadd.f32 %v3870_v53, %v3825_v10  ;;  %vm3904_vm14 = vweird.f32 %v7130_v3 }
0x117c   :  { %v7097_v52 = vadd.f32 %v6906_v54, %v3871_v19 }
0x117e   :  { %3965 = vrot.lane.b32.xlu1 %v7097_v52, %s5398_s19  ;;  %v4872_v58 = vmul.f32 -1.442695, %v7097_v52 }
0x117f   :  { %v3876_v16 = vpop.f32.mrf.mxu1  ;;  %v3608_v42 = vpop.f32.mrf.mxu3 }
0x1180   :  { %5212 = vpow2.f32 %v4872_v58 }
0x1186   :  { %v5213_v6 = vpop.eup %5212 }
0x118c   :  { %v3828_v38 = vpop.f32.mrf.mxu0 }
0x118d   :  { %v3874_v40 = vadd.f32 %v3873_v27, %v3828_v38 }
0x118f   :  { %v7102_v2 = vadd.f32 %v6906_v54, %v3874_v40  ;;  %v3556_v21 = vpop.f32.mrf.mxu2 }
0x1190   :  { %v3606_v30 = vadd.f32 %v3605_v37, %v3556_v21 }
0x1191   :  { %3967 = vrot.lane.b32.xlu0 %v7102_v2, %s5398_s19  ;;  %v4873_v5 = vmul.f32 -1.442695, %v7102_v2 }
0x1192   :  { %v7112_v12 = vadd.f32 %v7109_v44, %v3606_v30  ;;  %v3611_v27 = vpop.f32.mrf.mxu3 }
0x1194   :  { %3701 = vrot.lane.b32.xlu1 %v7112_v12, %s5398_s19  ;;  %v4859_v26 = vmul.f32 -1.442695, %v7112_v12 }
0x1196   :  { %5214 = vpow2.f32 %v4859_v26 }
0x119c   :  { %678 = vrot.lane.b32.xlu1 %v4895_v50, %s5398_s19  ;;  %v5215_v34 = vpop.eup %5214 }
0x119d   :  { %v7138_v25 = vadd.f32 1.0, %v5215_v34 }
0x119f   :  { %vm3642_vm7 = vweird.f32 %v7138_v25 }
0x11a2   :  { %v3559_v59 = vpop.f32.mrf.mxu2 }
0x11a3   :  { %v3609_v34 = vadd.f32 %v3608_v42, %v3559_v59 }
0x11a5   :  { %v7190_v42 = vadd.f32 %v7109_v44, %v3609_v34 }
0x11be   :  { %v3831_v29 = vpop.f32.mrf.mxu0 }
0x11bf   :  { %v3877_v13 = vadd.f32 %v3876_v16, %v3831_v29 }
0x11c1   :  { %v7121_v31 = vadd.f32 %v6906_v54, %v3877_v13  ;;  %v7132_v54 = vadd.f32 1.0, %v5213_v6 }
0x11c3   :  { %3969 = vrot.lane.b32.xlu2 %v7121_v31, %s5398_s19  ;;  %v4874_v20 = vmul.f32 -1.442695, %v7121_v31  ;;  %vm3919_vm3 = vweird.f32 %v7132_v54 }
0x11c4   :  { %v3614_v4 = vpop.f32.mrf.mxu3 }
0x11c5   :  { %5216 = vpow2.f32 %v4874_v20 }
0x11c6   :  { %5218 = vpow2.f32 %v4873_v5 }
0x11c7   :  { %5220 = vrcp.f32 %v7130_v3 }
0x11c8   :  { %5222 = vrcp.f32 %v7132_v54 }
0x11c9   :  { %5224 = vrcp.f32 %v7138_v25 }
0x11cb   :  { %v5217_v24 = vpop.eup %5216 }
0x11cc   :  { %v5219_v47 = vpop.eup %5218  ;;  %v7142_v28 = vadd.f32 1.0, %v5217_v24 }
0x11cd   :  { %v7140_v0 = vpop.eup %5220  ;;  %v7148_v19 = vadd.f32 1.0, %v5219_v47 }
0x11ce   :  { %v7146_v10 = vpop.eup %5222  ;;  %5226 = vrcp.f32 %v7142_v28  ;;  %v3900_v38 = vmul.f32 %v7140_v0, %v7130_v3  ;;  %vm3905_vm15 = vweird.f32 %v7140_v0  ;;  %vm3949_vm12 = vweird.f32 %v7142_v28 }
0x11cf   :  { %v3915_v40 = vmul.f32 %v7146_v10, %v7132_v54  ;;  %5228 = vrcp.f32 %v7148_v19  ;;  %v7159_v50 = vpop.eup %5224  ;;  %vm3920_vm1 = vweird.f32 %v7146_v10  ;;  %vm7196_vm2 = vmor %vm3904_vm14, %vm3905_vm15  ;;  %vm3934_vm13 = vweird.f32 %v7148_v19 }
0x11d0   :  { %v3901_v37 = vsub.f32 1.0, %v3900_v38  ;;  %v3638_v5 = vmul.f32 %v7159_v50, %v7138_v25  ;;  %vm7204_vm4 = vmor %vm3919_vm3, %vm3920_vm1  ;;  %vm3643_vm8 = vweird.f32 %v7159_v50 }
0x11d1   :  { %v3916_v21 = vsub.f32 1.0, %v3915_v40  ;;  %v3908_v40 = vand.u32 2147483647, %v7130_v3  ;;  %vm7242_vm11 = vmor %vm3642_vm7, %vm3643_vm8 }
0x11d2   :  { %v3902_v20 = vmul.f32 %v7140_v0, %v3901_v37  ;;  %v3910_v37 = vand.u32 2147483648, %v7130_v3  ;;  %v3639_v59 = vsub.f32 1.0, %v3638_v5  ;;  %v3923_v3 = vand.u32 2147483647, %v7132_v54 }
0x11d3   :  { %v3917_v6 = vmul.f32 %v7146_v10, %v3916_v21  ;;  %vm3909_vm5 = vcmp.eq.f32.partialorder %v3908_v40, 8.507059e+37 }
0x11d4   :  { %v3562_v45 = vpop.f32.mrf.mxu2  ;;  %v7167_v35 = vpop.eup %5226  ;;  %v3903_v21 = vadd.f32 %v7140_v0, %v3902_v20  ;;  %vm3924_vm6 = vcmp.eq.f32.partialorder %v3923_v3, 8.507059e+37 }
0x11d5   :  { %v7169_v26 = vpop.eup %5228  ;;  %v3945_v47 = vmul.f32 %v7167_v35, %v7142_v28  ;;  %vm3950_vm9 = vweird.f32 %v7167_v35 }
0x11d6   :  { %v3930_v38 = vmul.f32 %v7169_v26, %v7148_v19  ;;  %v3907_v34 = vsel %vm7196_vm2, %v7140_v0, %v3903_v21  ;;  %vm3935_vm10 = vweird.f32 %v7169_v26  ;;  %vm7253_vm14 = vmor %vm3949_vm12, %vm3950_vm9 }
0x11d7   :  { %vm3936_vm15 = vmor %vm3934_vm13, %vm3935_vm10 }
0x11d8   :  { %v3931_v20 = vsub.f32 1.0, %v3930_v38 }
0x11dd   :  { %v3565_v58 = vpop.f32.mrf.mxu2 }
0x11de   :  { %v3615_v24 = vadd.f32 %v3614_v4, %v3565_v58  ;;  %v3946_v58 = vsub.f32 1.0, %v3945_v47  ;;  %v3911_v47 = vor.u32 1.1754944e-38, %v3910_v37  ;;  %v3648_v37 = vand.u32 2147483648, %v7138_v25 }
0x11e0   :  { %v7222_v4 = vsel %vm3909_vm5, %v3911_v47, %v3907_v34  ;;  %v3649_v3 = vor.u32 1.1754944e-38, %v3648_v37  ;;  %v4860_v37 = vmul.f32 -1.442695, %v7190_v42 }
0x11f0   :  { %v7134_v55 = vpop.permute.xlu1 %3965 }
0x1206   :  { %v7144_v53 = vpop.permute.xlu1 %3701 }
0x120e   :  { %v7157_v30 = vpop.permute.xlu1 %678 }
0x120f   :  { %v683_v16 = vmul.f32 %v7157_v30, %v5908_v18  ;;  %v682_v29 = vmul.f32 %v7157_v30, %v5893_v23  ;;  %v681_v13 = vmul.f32 %v7157_v30, %v5882_v8  ;;  %v3947_v18 = vmul.f32 %v7167_v35, %v3946_v58 }
0x1210   :  { %v3612_v23 = vadd.f32 %v3611_v27, %v3562_v45  ;;  %v3932_v8 = vmul.f32 %v7169_v26, %v3931_v20 }
0x1211   :  { %693 = vrot.lane.b32.xlu1 %v683_v16, %s5400_s21  ;;  %691 = vrot.lane.b32.xlu0 %v682_v29, %s5400_s21  ;;  %v3918_v16 = vadd.f32 %v7146_v10, %v3917_v6  ;;  %v7193_v29 = vadd.f32 %v7109_v44, %v3615_v24  ;;  %v684_v6 = vmul.f32 %v7157_v30, %v5917_v48  ;;  %v3964_v48 = vpop.permute.xlu2 %3963 }
0x1212   :  { %689 = vrot.lane.b32.xlu2 %v681_v13, %s5400_s21  ;;  %v3925_v13 = vand.u32 2147483648, %v7132_v54  ;;  %v3640_v24 = vmul.f32 %v7159_v50, %v3639_v59  ;;  %v3975_v21 = vmul.f32 %v3964_v48, %v7222_v4  ;;  %v3948_v27 = vadd.f32 %v7167_v35, %v3947_v18 }
0x1213   :  { %v3922_v54 = vsel %vm7204_vm4, %v7146_v10, %v3918_v16  ;;  %v7236_v40 = vadd.f32 %v7109_v44, %v3612_v23  ;;  %v3933_v16 = vadd.f32 %v7169_v26, %v3932_v8  ;;  %v3955_v59 = vand.u32 2147483648, %v7142_v28 }
0x1214   :  { %v3926_v38 = vor.u32 1.1754944e-38, %v3925_v13  ;;  %v3641_v10 = vadd.f32 %v7159_v50, %v3640_v24  ;;  %v3940_v13 = vand.u32 2147483648, %v7148_v19  ;;  %v3953_v18 = vand.u32 2147483647, %v7142_v28 }
0x1215   :  { %v3938_v8 = vand.u32 2147483647, %v7148_v19  ;;  %v3952_v28 = vsel %vm7253_vm14, %v7167_v35, %v3948_v27  ;;  %v3937_v58 = vsel %vm3936_vm15, %v7169_v26, %v3933_v16  ;;  %v3956_v19 = vor.u32 1.1754944e-38, %v3955_v59 }
0x1216   :  { %v7224_v0 = vsel %vm3924_vm6, %v3926_v38, %v3922_v54  ;;  %v3941_v5 = vor.u32 1.1754944e-38, %v3940_v13  ;;  %vm3954_vm2 = vcmp.eq.f32.partialorder %v3953_v18, 8.507059e+37  ;;  %v4861_v47 = vmul.f32 -1.442695, %v7236_v40 }
0x1217   :  { %v3976_v45 = vmul.f32 %v7134_v55, %v7224_v0  ;;  %v3646_v55 = vand.u32 2147483647, %v7138_v25  ;;  %v3645_v25 = vsel %vm7242_vm11, %v7159_v50, %v3641_v10  ;;  %vm3939_vm3 = vcmp.eq.f32.partialorder %v3938_v8, 8.507059e+37 }
0x1218   :  { %v7268_v54 = vsel %vm3954_vm2, %v3956_v19, %v3952_v28  ;;  %v7270_v24 = vsel %vm3939_vm3, %v3941_v5, %v3937_v58  ;;  %5230 = vpow2.f32 %v4861_v47 }
0x1219   :  { %3703 = vrot.lane.b32.xlu0 %v7190_v42, %s5398_s19  ;;  %3707 = vrot.lane.b32.xlu1 %v7193_v29, %s5398_s19  ;;  %vm3647_vm1 = vcmp.eq.f32.partialorder %v3646_v55, 8.507059e+37 }
0x121a   :  { %695 = vrot.lane.b32.xlu2 %v684_v6, %s5400_s21  ;;  %v3968_v6 = vpop.permute.xlu0 %3967  ;;  %v7266_v34 = vsel %vm3647_vm1, %v3649_v3, %v3645_v25 }
0x121b   :  { %v3713_v50 = vmul.f32 %v7144_v53, %v7266_v34  ;;  %v3977_v26 = vmul.f32 %v3968_v6, %v7270_v24 }
0x121d   :  { %v3970_v20 = vpop.permute.xlu2 %3969 }
0x121e   :  { %v3978_v35 = vmul.f32 %v3970_v20, %v7268_v54  ;;  %v5231_v38 = vpop.eup %5230 }
0x121f   :  { %v3635_v10 = vadd.f32 1.0, %v5231_v38 }
0x1221   :  { %3985 = vrot.lane.b32.xlu0 %v3976_v45, %s5399_s20  ;;  %3983 = vrot.lane.b32.xlu1 %v3975_v21, %s5399_s20  ;;  %v4862_v21 = vmul.f32 -1.442695, %v7193_v29  ;;  %5232 = vrcp.f32 %v3635_v10  ;;  %v3678_v3 = vand.u32 2147483648, %v3635_v10  ;;  %vm3672_vm5 = vweird.f32 %v3635_v10 }
0x1222   :  { %3705 = vrot.lane.b32.xlu2 %v7236_v40, %s5398_s19  ;;  %5234 = vpow2.f32 %v4860_v37  ;;  %v3676_v19 = vand.u32 2147483647, %v3635_v10 }
0x1223   :  { %5236 = vpow2.f32 %v4862_v21 }
0x1224   :  { %vm3677_vm7 = vcmp.eq.f32.partialorder %v3676_v19, 8.507059e+37 }
0x1227   :  { %v5233_v53 = vpop.eup %5232 }
0x1228   :  { %v5235_v45 = vpop.eup %5234  ;;  %v3668_v16 = vmul.f32 %v5233_v53, %v3635_v10  ;;  %vm3673_vm4 = vweird.f32 %v5233_v53 }
0x1229   :  { %3721 = vrot.lane.b32.xlu0 %v3713_v50, %s5399_s20  ;;  %3989 = vrot.lane.b32.xlu1 %v3978_v35, %s5399_s20  ;;  %v5237_v27 = vpop.eup %5236  ;;  %v3634_v59 = vadd.f32 1.0, %v5235_v45  ;;  %vm3674_vm6 = vmor %vm3672_vm5, %vm3673_vm4  ;;  %v3679_v50 = vor.u32 1.1754944e-38, %v3678_v3 }
0x122a   :  { %3987 = vrot.lane.b32.xlu2 %v3977_v26, %s5399_s20  ;;  %v3636_v13 = vadd.f32 1.0, %v5237_v27  ;;  %v3669_v18 = vsub.f32 1.0, %v3668_v16 }
0x122b   :  { %5238 = vrcp.f32 %v3634_v59  ;;  %vm3657_vm10 = vweird.f32 %v3634_v59 }
0x122c   :  { %5240 = vrcp.f32 %v3636_v13  ;;  %v3670_v8 = vmul.f32 %v5233_v53, %v3669_v18  ;;  %v3663_v18 = vand.u32 2147483648, %v3634_v59  ;;  %vm3687_vm12 = vweird.f32 %v3636_v13 }
0x122d   :  { %v3691_v3 = vand.u32 2147483647, %v3636_v13 }
0x122e   :  { %v3671_v58 = vadd.f32 %v5233_v53, %v3670_v8  ;;  %v3693_v8 = vand.u32 2147483648, %v3636_v13 }
0x122f   :  { %vm3692_vm15 = vcmp.eq.f32.partialorder %v3691_v3, 8.507059e+37 }
0x1230   :  { %v3675_v5 = vsel %vm3674_vm6, %v5233_v53, %v3671_v58  ;;  %v3661_v58 = vand.u32 2147483647, %v3634_v59 }
0x1231   :  { %v5239_v23 = vpop.eup %5238  ;;  %v7285_v35 = vsel %vm3677_vm7, %v3679_v50, %v3675_v5  ;;  %v3694_v5 = vor.u32 1.1754944e-38, %v3693_v8 }
0x1232   :  { %v5241_v28 = vpop.eup %5240  ;;  %v3653_v20 = vmul.f32 %v5239_v23, %v3634_v59  ;;  %vm3658_vm8 = vweird.f32 %v5239_v23  ;;  %vm3662_vm14 = vcmp.eq.f32.partialorder %v3661_v58, 8.507059e+37 }
0x1233   :  { %v3683_v6 = vmul.f32 %v5241_v28, %v3636_v13  ;;  %vm3688_vm9 = vweird.f32 %v5241_v28  ;;  %vm3659_vm11 = vmor %vm3657_vm10, %vm3658_vm8 }
0x1234   :  { %v3654_v47 = vsub.f32 1.0, %v3653_v20  ;;  %vm3689_vm13 = vmor %vm3687_vm12, %vm3688_vm9 }
0x1235   :  { %v3684_v38 = vsub.f32 1.0, %v3683_v6  ;;  %v3664_v6 = vor.u32 1.1754944e-38, %v3663_v18 }
0x1236   :  { %v3655_v21 = vmul.f32 %v5239_v23, %v3654_v47 }
0x1237   :  { %v3685_v45 = vmul.f32 %v5241_v28, %v3684_v38 }
0x1238   :  { %v3656_v53 = vadd.f32 %v5239_v23, %v3655_v21 }
0x123a   :  { %v3660_v19 = vsel %vm3659_vm11, %v5239_v23, %v3656_v53 }
0x123b   :  { %v7294_v50 = vsel %vm3662_vm14, %v3664_v6, %v3660_v19  ;;  %v4004_v19 = vsub.f32 1.0, %v7224_v0  ;;  %v4028_v6 = vmul.f32 %v7224_v0, %v7036_v32  ;;  %v4029_v32 = vmul.f32 %v7270_v24, %v7050_v1 }
0x123c   :  { %v4027_v1 = vmul.f32 %v7222_v4, %v7022_v36 }
0x126c   :  { %v690_v48 = vpop.permute.xlu2 %689 }
0x126d   :  { %v701_v55 = vsel %vm32_vm0, %v690_v48, 0.0  ;;  %v3686_v48 = vadd.f32 %v5241_v28, %v3685_v45 }
0x126e   :  { %702 = vadd.xlane.f32.xlu0 %v701_v55 }
0x126f   :  { %v3690_v20 = vsel %vm3689_vm13, %v5241_v28, %v3686_v48 }
0x1274   :  { %v7283_v25 = vpop.permute.xlu2 %695 }
0x127c   :  { %v3706_v26 = vpop.permute.xlu2 %3705 }
0x127d   :  { %v3715_v37 = vmul.f32 %v3706_v26, %v7285_v35 }
0x127f   :  { %3725 = vrot.lane.b32.xlu1 %v3715_v37, %s5399_s20 }
0x1283   :  { %v7289_v27 = vpop.permute.xlu1 %693  ;;  %v7291_v10 = vpop.permute.xlu0 %691 }
0x1284   :  { %v3988_v16 = vpop.permute.xlu2 %3987  ;;  %v707_v36 = vsel %vm32_vm0, %v7289_v27, 0.0 }
0x1285   :  { %v3997_v55 = vadd.f32 %v3988_v16, %v7102_v2  ;;  %v7296_v2 = vsel %vm3692_vm15, %v3694_v5, %v3690_v20 }
0x1287   :  { %5242 = vtanh.f32 %v3997_v55 }
0x128b   :  { %v3704_v26 = vpop.permute.xlu0 %3703  ;;  %v3708_v47 = vpop.permute.xlu1 %3707 }
0x128c   :  { %v3714_v38 = vmul.f32 %v3704_v26, %v7294_v50  ;;  %v3716_v59 = vmul.f32 %v3708_v47, %v7296_v2 }
0x128d   :  { %v5243_v37 = vpop.eup %5242 }
0x128e   :  { %4015 = vrot.lane.b32.xlu1 %v5243_v37, %s5400_s21  ;;  %3723 = vrot.lane.b32.xlu2 %v3714_v38, %s5399_s20 }
0x128f   :  { %3727 = vrot.lane.b32.xlu0 %v3716_v59, %s5399_s20 }
0x1293   :  { %v3986_v13 = vpop.permute.xlu0 %3985  ;;  %v3984_v23 = vpop.permute.xlu1 %3983 }
0x1294   :  { %v3996_v28 = vadd.f32 %v3986_v13, %v7097_v52  ;;  %v3995_v21 = vadd.f32 %v3984_v23, %v7092_v60  ;;  %v3765_v13 = vmul.f32 %v7266_v34, %v7029_v56 }
0x1296   :  { %5244 = vtanh.f32 %v3996_v28 }
0x1297   :  { %5246 = vtanh.f32 %v3995_v21 }
0x129b   :  { %v3722_v45 = vpop.permute.xlu0 %3721  ;;  %v3990_v16 = vpop.permute.xlu1 %3989 }
0x129c   :  { %v5245_v53 = vpop.eup %5244  ;;  %v3733_v48 = vadd.f32 %v3722_v45, %v7112_v12  ;;  %v3998_v55 = vadd.f32 %v3990_v16, %v7121_v31 }
0x129d   :  { %v5247_v18 = vpop.eup %5246  ;;  %4013 = vrot.lane.b32.xlu2 %v5245_v53, %s5400_s21 }
0x129e   :  { %5248 = vtanh.f32 %v3733_v48  ;;  %4011 = vrot.lane.b32.xlu0 %v5247_v18, %s5400_s21 }
0x129f   :  { %5250 = vtanh.f32 %v3998_v55 }
0x12a4   :  { %v5249_v8 = vpop.eup %5248 }
0x12a5   :  { %v5251_v52 = vpop.eup %5250  ;;  %3749 = vrot.lane.b32.xlu2 %v5249_v8, %s5400_s21  ;;  %v4030_v8 = vmul.f32 %v7268_v54, %v7067_v9  ;;  %v1198_v9 = vmul.f32 %v6130_v11, %v7157_v30 }
0x12a6   :  { %4017 = vrot.lane.b32.xlu0 %v5251_v52, %s5400_s21 }
0x12e1   :  { %v7317_v26 = vpop.xlane.xlu0 %702 }
0x12e8   :  { %v3724_v60 = vpop.permute.xlu2 %3723 }
0x12e9   :  { %v3734_v58 = vadd.f32 %v3724_v60, %v7190_v42  ;;  %v3741_v42 = vsub.f32 1.0, %v7266_v34  ;;  %v4003_v34 = vsub.f32 1.0, %v7222_v4  ;;  %v1199_v4 = vmul.f32 %v6144_v43, %v7157_v30 }
0x12eb   :  { %5252 = vtanh.f32 %v3734_v58  ;;  %v704_v58 = vsel %vm32_vm0, %v7291_v10, 0.0  ;;  %v3744_v10 = vsub.f32 1.0, %v7296_v2 }
0x12f1   :  { %v5253_v12 = vpop.eup %5252  ;;  %v3726_v3 = vpop.permute.xlu1 %3725 }
0x12f2   :  { %v3735_v31 = vadd.f32 %v3726_v3, %v7236_v40  ;;  %3751 = vrot.lane.b32.xlu1 %v5253_v12, %s5400_s21  ;;  %v4005_v40 = vsub.f32 1.0, %v7270_v24  ;;  %v3766_v3 = vmul.f32 %v7294_v50, %v7043_v17 }
0x12f4   :  { %5254 = vtanh.f32 %v3735_v31 }
0x12f7   :  { %v4014_v20 = vpop.permute.xlu2 %4013 }
0x12f8   :  { %v4024_v5 = vmul.f32 %v4014_v20, %v4004_v19  ;;  %v3768_v19 = vmul.f32 %v7296_v2, %v7069_v15 }
0x12fa   :  { %v5255_v47 = vpop.eup %5254  ;;  %v4032_v38 = vadd.f32 %v4028_v6, %v4024_v5 }
0x12fb   :  { %3753 = vrot.lane.b32.xlu0 %v5255_v47, %s5400_s21  ;;  %v3743_v47 = vsub.f32 1.0, %v7285_v35 }
0x12fc   :  { %4090 = vrot.lane.b32.xlu1 %v4032_v38, %s5400_s21 }
0x12ff   :  { %v3750_v59 = vpop.permute.xlu2 %3749 }
0x1300   :  { %v4016_v37 = vpop.permute.xlu1 %4015  ;;  %v3761_v23 = vmul.f32 %v3750_v59, %v3741_v42 }
0x1301   :  { %v4025_v0 = vmul.f32 %v4016_v37, %v4005_v40  ;;  %v3728_v28 = vpop.permute.xlu0 %3727  ;;  %v1713_v37 = vmul.f32 %v6372_v49, %v7157_v30 }
0x1302   :  { %v7327_v21 = vadd.f32 %v3765_v13, %v3761_v23  ;;  %v3736_v45 = vadd.f32 %v3728_v28, %v7193_v29  ;;  %v4006_v29 = vsub.f32 1.0, %v7268_v54  ;;  %v3742_v54 = vsub.f32 1.0, %v7294_v50 }
0x1303   :  { %v4033_v16 = vadd.f32 %v4029_v32, %v4025_v0  ;;  %v3767_v50 = vmul.f32 %v7285_v35, %v7057_v51  ;;  %v1715_v35 = vmul.f32 %v6400_v63, %v7157_v30  ;;  %v2229_v32 = vmul.f32 %v6581_v14, %v7157_v30 }
0x1304   :  { %5256 = vtanh.f32 %v3736_v45  ;;  %4039 = vrot.lane.b32.xlu1 %v7327_v21, %s5400_s21  ;;  %v2231_v28 = vmul.f32 %v6609_v39, %v7157_v30  ;;  %v2741_v45 = vmul.f32 %v6833_v57, %v7157_v30 }
0x1305   :  { %4092 = vrot.lane.b32.xlu0 %v4033_v16, %s5400_s21  ;;  %v710_v16 = vsel %vm32_vm0, %v7283_v25, 0.0  ;;  %v3260_v25 = vmul.f32 %v7069_v15, %v7157_v30 }
0x130a   :  { %v5257_v53 = vpop.eup %5256 }
0x130b   :  { %3755 = vrot.lane.b32.xlu2 %v5257_v53, %s5400_s21  ;;  %v2744_v53 = vmul.f32 %v6873_v22, %v7157_v30 }
0x1310   :  { %v4012_v48 = vpop.permute.xlu0 %4011 }
0x1311   :  { %v4023_v24 = vmul.f32 %v4012_v48, %v4003_v34  ;;  %v3258_v34 = vmul.f32 %v7043_v17, %v7157_v30  ;;  %v1197_v48 = vmul.f32 %v6116_v46, %v7157_v30 }
0x1313   :  { %v4031_v55 = vadd.f32 %v4027_v1, %v4023_v24  ;;  %v1200_v1 = vmul.f32 %v6158_v62, %v7157_v30 }
0x1315   :  { %4088 = vrot.lane.b32.xlu2 %v4031_v55, %s5400_s21  ;;  %v7846_v55 = vld [vmem:[#allocation8_spill] sm:$0xff] }
0x1318   :  { %v4018_v18 = vpop.permute.xlu0 %4017 }
0x1319   :  { %v4026_v52 = vmul.f32 %v4018_v18, %v4006_v29  ;;  %v1714_v29 = vmul.f32 %v7846_v55, %v7157_v30  ;;  %v7847_v18 = vld [vmem:[#allocation10_spill] sm:$0xff] }
0x131b   :  { %v4034_v60 = vadd.f32 %v4030_v8, %v4026_v52  ;;  %v1716_v8 = vmul.f32 %v7847_v18, %v7157_v30  ;;  %v2230_v52 = vmul.f32 %v6595_v41, %v7157_v30 }
0x131d   :  { %4094 = vrot.lane.b32.xlu2 %v4034_v60, %s5400_s21 }
0x132e   :  { %705 = vadd.xlane.f32.xlu1 %v704_v58  ;;  %v2232_v58 = vmul.f32 %v6621_v61, %v7157_v30 }
0x1346   :  { %708 = vadd.xlane.f32.xlu2 %v707_v36 }
0x1347   :  { %1209 = vrot.lane.b32.xlu1 %v1199_v4, %s5400_s21 }
0x135e   :  { %1207 = vrot.lane.b32.xlu2 %v1198_v9, %s5400_s21  ;;  %v2742_v9 = vmul.f32 %v6847_v7, %v7157_v30 }
0x1364   :  { %v3752_v12 = vpop.permute.xlu1 %3751 }
0x1365   :  { %v3762_v27 = vmul.f32 %v3752_v12, %v3742_v54  ;;  %v3756_v31 = vpop.permute.xlu2 %3755 }
0x1366   :  { %v3764_v20 = vmul.f32 %v3756_v31, %v3744_v10 }
0x1367   :  { %v7358_v6 = vadd.f32 %v3766_v3, %v3762_v27  ;;  %v3257_v27 = vmul.f32 %v7029_v56, %v7157_v30 }
0x1368   :  { %v7360_v5 = vadd.f32 %v3768_v19, %v3764_v20 }
0x1369   :  { %4041 = vrot.lane.b32.xlu0 %v7358_v6, %s5400_s21 }
0x136a   :  { %4045 = vrot.lane.b32.xlu1 %v7360_v5, %s5400_s21 }
0x136d   :  { %v3754_v38 = vpop.permute.xlu0 %3753 }
0x136e   :  { %v3763_v42 = vmul.f32 %v3754_v38, %v3743_v47  ;;  %v4091_v40 = vpop.permute.xlu1 %4090  ;;  %v3259_v47 = vmul.f32 %v7057_v51, %v7157_v30  ;;  %v3773_v38 = vmul.f32 %v7327_v21, %v7157_v30 }
0x136f   :  { %v4089_v2 = vpop.permute.xlu2 %4088 }
0x1370   :  { %v7369_v59 = vadd.f32 %v3767_v50, %v3763_v42  ;;  %4879 = vmatmul.msk.f32.vlgmr.msra.gmra.mxu3 %vm32_vm0, %v4089_v2 }
0x1372   :  { %4043 = vrot.lane.b32.xlu2 %v7369_v59, %s5400_s21  ;;  %1721 = vrot.lane.b32.xlu1 %v1713_v37, %s5400_s21  ;;  %v3775_v24 = vmul.f32 %v7369_v59, %v7157_v30 }
0x1376   :  { %v4040_v13 = vpop.permute.xlu1 %4039 }
0x1377   :  { %4875 = vmatmul.msk.f32.vlgmr.msra.gmra.mxu2 %vm32_vm0, %v4040_v13  ;;  %v4093_v23 = vpop.permute.xlu0 %4092  ;;  %v4095_v0 = vpop.permute.xlu2 %4094 }
0x1378   :  { %4880 = vmatmul.msk.f32.gmra.mxu3 %vm32_vm0, %v4091_v40 }
0x137a   :  { %1725 = vrot.lane.b32.xlu1 %v1715_v35, %s5400_s21 }
0x1380   :  { %4881 = vmatmul.msk.f32.gmra.mxu3 %vm32_vm0, %v4093_v23 }
0x1382   :  { %2237 = vrot.lane.b32.xlu1 %v2229_v32, %s5400_s21 }
0x1388   :  { %4882 = vmatmul.msk.f32.gmra.mxu3 %vm32_vm0, %v4095_v0 }
0x138a   :  { %2241 = vrot.lane.b32.xlu1 %v2231_v28, %s5400_s21  ;;  %v2743_v28 = vmul.f32 %v6861_v33, %v7157_v30 }
0x1392   :  { %2749 = vrot.lane.b32.xlu1 %v2741_v45, %s5400_s21 }
0x1393   :  { %711 = vadd.xlane.f32.xlu0 %v710_v16 }
0x139a   :  { %2755 = vrot.lane.b32.xlu1 %v2744_v53, %s5400_s21 }
0x13a1   :  { %v7422_v60 = vpop.xlane.xlu1 %705 }
0x13a2   :  { %3267 = vrot.lane.b32.xlu1 %v3258_v34, %s5400_s21  ;;  %v3774_v34 = vmul.f32 %v7358_v6, %v7157_v30 }
0x13a7   :  { %1205 = vrot.lane.b32.xlu0 %v1197_v48, %s5400_s21 }
0x13aa   :  { %3271 = vrot.lane.b32.xlu1 %v3260_v25, %s5400_s21  ;;  %v3776_v25 = vmul.f32 %v7360_v5, %v7157_v30 }
0x13af   :  { %1211 = vrot.lane.b32.xlu0 %v1200_v1, %s5400_s21 }
0x13b2   :  { %3785 = vrot.lane.b32.xlu1 %v3775_v24, %s5400_s21 }
0x13b7   :  { %1723 = vrot.lane.b32.xlu0 %v1714_v29, %s5400_s21 }
0x13b9   :  { %v7426_v36 = vpop.xlane.xlu2 %708  ;;  %v1210_v4 = vpop.permute.xlu1 %1209 }
0x13ba   :  { %v1223_v42 = vsel %vm32_vm0, %v1210_v4, 0.0 }
0x13bf   :  { %1727 = vrot.lane.b32.xlu0 %v1716_v8, %s5400_s21 }
0x13c1   :  { %v1208_v54 = vpop.permute.xlu2 %1207 }
0x13c2   :  { %v1220_v12 = vsel %vm32_vm0, %v1208_v54, 0.0 }
0x13c7   :  { %2239 = vrot.lane.b32.xlu0 %v2230_v52, %s5400_s21 }
0x13cc   :  { %v4044_v31 = vpop.permute.xlu2 %4043 }
0x13cf   :  { %2243 = vrot.lane.b32.xlu0 %v2232_v58, %s5400_s21 }
0x13d7   :  { %2751 = vrot.lane.b32.xlu0 %v2742_v9, %s5400_s21 }
0x13db   :  { %v4042_v10 = vpop.permute.xlu0 %4041 }
0x13dc   :  { %v4046_v3 = vpop.permute.xlu1 %4045  ;;  %1221 = vadd.xlane.f32.xlu1 %v1220_v12  ;;  %4876 = vmatmul.msk.f32.gmra.mxu2 %vm32_vm0, %v4042_v10 }
0x13df   :  { %3265 = vrot.lane.b32.xlu0 %v3257_v27, %s5400_s21 }
0x13e4   :  { %v1722_v19 = vpop.permute.xlu1 %1721  ;;  %4877 = vmatmul.msk.f32.gmra.mxu2 %vm32_vm0, %v4044_v31 }
0x13e5   :  { %v1733_v20 = vsel %vm32_vm0, %v1722_v19, 0.0 }
0x13e6   :  { %1734 = vadd.xlane.f32.xlu1 %v1733_v20 }
0x13e7   :  { %3269 = vrot.lane.b32.xlu0 %v3259_v47, %s5400_s21 }
0x13ec   :  { %4878 = vmatmul.msk.f32.gmra.mxu2 %vm32_vm0, %v4046_v3  ;;  %v1726_v13 = vpop.permute.xlu1 %1725 }
0x13ed   :  { %v1739_v27 = vsel %vm32_vm0, %v1726_v13, 0.0 }
0x13ef   :  { %3781 = vrot.lane.b32.xlu0 %v3773_v38, %s5400_s21 }
0x13f3   :  { %v4121_v24 = vpop.f32.mrf.mxu3 }
0x13f4   :  { %v2238_v32 = vpop.permute.xlu1 %2237 }
0x13f5   :  { %v2249_v45 = vsel %vm32_vm0, %v2238_v32, 0.0 }
0x13fa   :  { %v4072_v1 = vpop.f32.mrf.mxu2 }
0x13fb   :  { %v4122_v29 = vadd.f32 %v4121_v24, %v4072_v1  ;;  %v4124_v52 = vpop.f32.mrf.mxu3 }
0x13fc   :  { %v2242_v53 = vpop.permute.xlu1 %2241 }
0x13fd   :  { %v2255_v48 = vsel %vm32_vm0, %v2242_v53, 0.0  ;;  %v7464_v8 = vadd.f32 %v7109_v44, %v4122_v29 }
0x1403   :  { %v4127_v12 = vpop.f32.mrf.mxu3 }
0x1406   :  { %v7446_v50 = vpop.xlane.xlu0 %711 }
0x140b   :  { %v4130_v31 = vpop.f32.mrf.mxu3 }
0x1419   :  { %v1206_v40 = vpop.permute.xlu0 %1205  ;;  %1224 = vadd.xlane.f32.xlu0 %v1223_v42 }
0x141a   :  { %v1217_v2 = vsel %vm32_vm0, %v1206_v40, 0.0 }
0x141b   :  { %1218 = vadd.xlane.f32.xlu2 %v1217_v2 }
0x1421   :  { %v1212_v37 = vpop.permute.xlu0 %1211 }
0x1422   :  { %v1226_v54 = vsel %vm32_vm0, %v1212_v37, 0.0  ;;  %v2750_v37 = vpop.permute.xlu1 %2749 }
0x1429   :  { %v1724_v35 = vpop.permute.xlu0 %1723 }
0x142a   :  { %v1736_v23 = vsel %vm32_vm0, %v1724_v35, 0.0  ;;  %v7492_v32 = vpop.permute.xlu1 %2755 }
0x142b   :  { %1737 = vadd.xlane.f32.xlu0 %v1736_v23 }
0x1431   :  { %v1728_v0 = vpop.permute.xlu0 %1727 }
0x1432   :  { %v1742_v16 = vsel %vm32_vm0, %v1728_v0, 0.0  ;;  %v4883_v0 = vmul.f32 -1.442695, %v7464_v8 }
0x1433   :  { %2753 = vrot.lane.b32.xlu2 %v2743_v28, %s5400_s21  ;;  %2250 = vadd.xlane.f32.xlu0 %v2249_v45  ;;  %v7497_v45 = vpop.permute.xlu1 %3267 }
0x1434   :  { %1743 = vadd.xlane.f32.xlu1 %v1742_v16  ;;  %5258 = vpow2.f32 %v4883_v0 }
0x1439   :  { %v2240_v10 = vpop.permute.xlu0 %2239 }
0x143a   :  { %v2252_v42 = vsel %vm32_vm0, %v2240_v10, 0.0  ;;  %v5259_v53 = vpop.eup %5258 }
0x143b   :  { %3783 = vrot.lane.b32.xlu2 %v3774_v34, %s5400_s21  ;;  %v4149_v34 = vadd.f32 1.0, %v5259_v53 }
0x143c   :  { %2256 = vadd.xlane.f32.xlu1 %v2255_v48  ;;  %v7502_v48 = vpop.permute.xlu1 %3271 }
0x143d   :  { %5260 = vrcp.f32 %v4149_v34  ;;  %vm4158_vm2 = vweird.f32 %v4149_v34  ;;  %v4162_v0 = vand.u32 2147483647, %v4149_v34 }
0x143f   :  { %vm4163_vm4 = vcmp.eq.f32.partialorder %v4162_v0, 8.507059e+37 }
0x1441   :  { %v2244_v19 = vpop.permute.xlu0 %2243 }
0x1442   :  { %v2258_v16 = vsel %vm32_vm0, %v2244_v19, 0.0 }
0x1443   :  { %v5261_v24 = vpop.eup %5260 }
0x1444   :  { %v7507_v29 = vpop.permute.xlu1 %3785  ;;  %vm4159_vm1 = vweird.f32 %v5261_v24 }
0x1445   :  { %vm4160_vm3 = vmor %vm4158_vm2, %vm4159_vm1 }
0x1447   :  { %3787 = vrot.lane.b32.xlu0 %v3776_v25, %s5400_s21 }
0x1449   :  { %v7481_v40 = vpop.permute.xlu0 %2751 }
0x144f   :  { %4217 = vrot.lane.b32.xlu0 %v7464_v8, %s5398_s19  ;;  %v7512_v10 = vpop.xlane.xlu1 %1221 }
0x1451   :  { %v7483_v2 = vpop.permute.xlu0 %3265 }
0x1459   :  { %v7490_v23 = vpop.permute.xlu0 %3269 }
0x145f   :  { %v4075_v58 = vpop.f32.mrf.mxu2 }
0x1460   :  { %v4125_v4 = vadd.f32 %v4124_v52, %v4075_v58  ;;  %v4154_v52 = vmul.f32 %v5261_v24, %v4149_v34 }
0x1461   :  { %v7495_v28 = vpop.permute.xlu0 %3781 }
0x1462   :  { %v7469_v9 = vadd.f32 %v7109_v44, %v4125_v4  ;;  %v4155_v4 = vsub.f32 1.0, %v4154_v52 }
0x1464   :  { %1227 = vadd.xlane.f32.xlu2 %v1226_v54  ;;  %4219 = vrot.lane.b32.xlu1 %v7469_v9, %s5398_s19  ;;  %v4884_v1 = vmul.f32 -1.442695, %v7469_v9 }
0x1466   :  { %5262 = vpow2.f32 %v4884_v1 }
0x1467   :  { %v4078_v3 = vpop.f32.mrf.mxu2 }
0x1468   :  { %v4128_v13 = vadd.f32 %v4127_v12, %v4078_v3  ;;  %v2761_v12 = vsel %vm32_vm0, %v2750_v37, 0.0 }
0x146a   :  { %v7486_v35 = vadd.f32 %v7109_v44, %v4128_v13  ;;  %v7519_v13 = vpop.xlane.xlu1 %1734 }
0x146c   :  { %1740 = vadd.xlane.f32.xlu2 %v1739_v27  ;;  %v5263_v54 = vpop.eup %5262  ;;  %v4156_v27 = vmul.f32 %v5261_v24, %v4155_v4  ;;  %v4885_v4 = vmul.f32 -1.442695, %v7486_v35 }
0x146d   :  { %v4150_v3 = vadd.f32 1.0, %v5263_v54 }
0x146f   :  { %v4081_v20 = vpop.f32.mrf.mxu2  ;;  %5264 = vrcp.f32 %v4150_v3  ;;  %v4179_v39 = vand.u32 2147483648, %v4150_v3  ;;  %vm4173_vm6 = vweird.f32 %v4150_v3  ;;  %v4177_v63 = vand.u32 2147483647, %v4150_v3 }
0x1470   :  { %v4131_v47 = vadd.f32 %v4130_v31, %v4081_v20  ;;  %v4157_v20 = vadd.f32 %v5261_v24, %v4156_v27 }
0x1471   :  { %vm4178_vm8 = vcmp.eq.f32.partialorder %v4177_v63, 8.507059e+37 }
0x1472   :  { %v7476_v38 = vadd.f32 %v7109_v44, %v4131_v47  ;;  %v4161_v37 = vsel %vm4160_vm3, %v5261_v24, %v4157_v20 }
0x1474   :  { %2253 = vadd.xlane.f32.xlu2 %v2252_v42  ;;  %4223 = vrot.lane.b32.xlu0 %v7476_v38, %s5398_s19  ;;  %v4886_v31 = vmul.f32 -1.442695, %v7476_v38  ;;  %v4164_v42 = vand.u32 2147483648, %v4149_v34 }
0x1475   :  { %v5265_v53 = vpop.eup %5264 }
0x1476   :  { %5266 = vpow2.f32 %v4886_v31  ;;  %v4169_v27 = vmul.f32 %v5265_v53, %v4150_v3  ;;  %vm4174_vm5 = vweird.f32 %v5265_v53 }
0x1477   :  { %5268 = vpow2.f32 %v4885_v4  ;;  %vm4175_vm7 = vmor %vm4173_vm6, %vm4174_vm5 }
0x1478   :  { %v4170_v31 = vsub.f32 1.0, %v4169_v27 }
0x147a   :  { %v4171_v20 = vmul.f32 %v5265_v53, %v4170_v31 }
0x148c   :  { %4221 = vrot.lane.b32.xlu2 %v7486_v35, %s5398_s19  ;;  %v7500_v44 = vpop.xlane.xlu0 %1224 }
0x148e   :  { %v7517_v47 = vpop.xlane.xlu2 %1218 }
0x1496   :  { %v7528_v34 = vpop.permute.xlu2 %2753 }
0x149e   :  { %2259 = vadd.xlane.f32.xlu0 %v2258_v16  ;;  %v7504_v25 = vpop.xlane.xlu0 %1737  ;;  %v4165_v16 = vor.u32 1.1754944e-38, %v4164_v42 }
0x14a0   :  { %v7521_v52 = vsel %vm4163_vm4, %v4165_v16, %v4161_v37  ;;  %v7532_v16 = vpop.permute.xlu2 %3783 }
0x14a6   :  { %v7509_v58 = vpop.xlane.xlu0 %2250 }
0x14a7   :  { %v7525_v51 = vpop.xlane.xlu1 %1743 }
0x14af   :  { %v7530_v0 = vpop.xlane.xlu1 %2256 }
0x14b5   :  { %2762 = vadd.xlane.f32.xlu2 %v2761_v12  ;;  %v5267_v12 = vpop.eup %5266 }
0x14b6   :  { %v4152_v24 = vadd.f32 1.0, %v5267_v12  ;;  %v5269_v42 = vpop.eup %5268  ;;  %v4180_v12 = vor.u32 1.1754944e-38, %v4179_v39 }
0x14b7   :  { %v4151_v37 = vadd.f32 1.0, %v5269_v42 }
0x14b8   :  { %5270 = vrcp.f32 %v4152_v24  ;;  %vm4203_vm10 = vweird.f32 %v4152_v24  ;;  %v4207_v63 = vand.u32 2147483647, %v4152_v24 }
0x14b9   :  { %v7515_v19 = vpop.permute.xlu0 %3787  ;;  %5272 = vrcp.f32 %v4151_v37  ;;  %vm4188_vm14 = vweird.f32 %v4151_v37 }
0x14ba   :  { %vm4208_vm12 = vcmp.eq.f32.partialorder %v4207_v63, 8.507059e+37  ;;  %v2764_v63 = vsel %vm32_vm0, %v7481_v40, 0.0 }
0x14be   :  { %v5271_v33 = vpop.eup %5270 }
0x14bf   :  { %v4199_v4 = vmul.f32 %v5271_v33, %v4152_v24  ;;  %vm4204_vm9 = vweird.f32 %v5271_v33 }
0x14c0   :  { %vm4205_vm11 = vmor %vm4203_vm10, %vm4204_vm9 }
0x14c1   :  { %v4218_v1 = vpop.permute.xlu0 %4217  ;;  %v4200_v15 = vsub.f32 1.0, %v4199_v4 }
0x14c2   :  { %v4229_v54 = vmul.f32 %v4218_v1, %v7521_v52  ;;  %v4172_v1 = vadd.f32 %v5265_v53, %v4171_v20  ;;  %v5273_v20 = vpop.eup %5272 }
0x14c3   :  { %v4201_v22 = vmul.f32 %v5271_v33, %v4200_v15  ;;  %v4184_v61 = vmul.f32 %v5273_v20, %v4151_v37  ;;  %vm4189_vm13 = vweird.f32 %v5273_v20 }
0x14c4   :  { %4237 = vrot.lane.b32.xlu1 %v4229_v54, %s5399_s20  ;;  %v4176_v54 = vsel %vm4175_vm7, %v5265_v53, %v4172_v1  ;;  %v4209_v53 = vand.u32 2147483648, %v4152_v24  ;;  %vm4190_vm15 = vmor %vm4188_vm14, %vm4189_vm13 }
0x14c5   :  { %v7534_v27 = vsel %vm4178_vm8, %v4180_v12, %v4176_v54  ;;  %v4202_v18 = vadd.f32 %v5271_v33, %v4201_v22  ;;  %v4185_v39 = vsub.f32 1.0, %v4184_v61  ;;  %v4194_v22 = vand.u32 2147483648, %v4151_v37 }
0x14c6   :  { %v4210_v54 = vor.u32 1.1754944e-38, %v4209_v53  ;;  %v4192_v61 = vand.u32 2147483647, %v4151_v37 }
0x14c7   :  { %v4206_v1 = vsel %vm4205_vm11, %v5271_v33, %v4202_v18  ;;  %v4186_v12 = vmul.f32 %v5273_v20, %v4185_v39  ;;  %v4195_v33 = vor.u32 1.1754944e-38, %v4194_v22  ;;  %v3277_v22 = vsel %vm32_vm0, %v7483_v2, 0.0 }
0x14c8   :  { %v7542_v4 = vsel %vm4208_vm12, %v4210_v54, %v4206_v1  ;;  %vm4193_vm1 = vcmp.eq.f32.partialorder %v4192_v61, 8.507059e+37  ;;  %v4281_v2 = vmul.f32 %v7521_v52, %v7327_v21 }
0x14c9   :  { %v4187_v62 = vadd.f32 %v5273_v20, %v4186_v12 }
0x14cb   :  { %v4191_v24 = vsel %vm4190_vm15, %v5273_v20, %v4187_v62 }
0x14cc   :  { %v4196_v18 = vsel %vm4193_vm1, %v4195_v33, %v4191_v24 }
0x14d6   :  { %v4220_v31 = vpop.permute.xlu1 %4219 }
0x14d7   :  { %v4230_v43 = vmul.f32 %v4220_v31, %v7534_v27  ;;  %v7537_v42 = vpop.xlane.xlu2 %1227 }
0x14d9   :  { %4239 = vrot.lane.b32.xlu2 %v4230_v43, %s5399_s20 }
0x14df   :  { %v7540_v3 = vpop.xlane.xlu2 %1740 }
0x14e6   :  { %v4224_v31 = vpop.permute.xlu0 %4223 }
0x14e7   :  { %v4232_v43 = vmul.f32 %v4224_v31, %v7542_v4  ;;  %v7545_v15 = vpop.xlane.xlu2 %2253 }
0x14e9   :  { %4243 = vrot.lane.b32.xlu2 %v4232_v43, %s5399_s20 }
0x14ef   :  { %v4222_v53 = vpop.permute.xlu2 %4221 }
0x14f0   :  { %v4231_v39 = vmul.f32 %v4222_v53, %v4196_v18 }
0x14f2   :  { %4241 = vrot.lane.b32.xlu1 %v4231_v39, %s5399_s20 }
0x151c   :  { %2765 = vadd.xlane.f32.xlu1 %v2764_v63 }
0x1528   :  { %v7551_v1 = vpop.xlane.xlu2 %2762 }
0x1533   :  { %v4240_v54 = vpop.permute.xlu2 %4239 }
0x1534   :  { %v4250_v12 = vadd.f32 %v4240_v54, %v7469_v9  ;;  %v2770_v9 = vsel %vm32_vm0, %v7492_v32, 0.0  ;;  %v2767_v32 = vsel %vm32_vm0, %v7528_v34, 0.0 }
0x1536   :  { %5274 = vtanh.f32 %v4250_v12  ;;  %v4238_v37 = vpop.permute.xlu1 %4237  ;;  %v4258_v12 = vsub.f32 1.0, %v7534_v27 }
0x1537   :  { %v4249_v62 = vadd.f32 %v4238_v37, %v7464_v8 }
0x1539   :  { %5276 = vtanh.f32 %v4249_v62 }
0x153c   :  { %v5275_v20 = vpop.eup %5274 }
0x153d   :  { %4267 = vrot.lane.b32.xlu1 %v5275_v20, %s5400_s21 }
0x153f   :  { %v5277_v31 = vpop.eup %5276 }
0x1540   :  { %4265 = vrot.lane.b32.xlu2 %v5277_v31, %s5400_s21  ;;  %v3283_v31 = vsel %vm32_vm0, %v7490_v23, 0.0  ;;  %v3799_v23 = vsel %vm32_vm0, %v7507_v29, 0.0  ;;  %v3280_v29 = vsel %vm32_vm0, %v7497_v45, 0.0 }
0x1543   :  { %v4244_v61 = vpop.permute.xlu2 %4243 }
0x1544   :  { %v4252_v8 = vadd.f32 %v4244_v61, %v7476_v38 }
0x1564   :  { %v4242_v43 = vpop.permute.xlu1 %4241 }
0x1565   :  { %v4251_v40 = vadd.f32 %v4242_v43, %v7486_v35  ;;  %v4257_v35 = vsub.f32 1.0, %v7521_v52  ;;  %v4282_v52 = vmul.f32 %v7534_v27, %v7358_v6  ;;  %v7587_v43 = vpop.xlane.xlu0 %2259  ;;  %v4283_v27 = vmul.f32 %v4196_v18, %v7369_v59 }
0x1567   :  { %5278 = vtanh.f32 %v4251_v40  ;;  %3278 = vadd.xlane.f32.xlu1 %v3277_v22  ;;  %v3286_v40 = vsel %vm32_vm0, %v7502_v48, 0.0  ;;  %v4259_v22 = vsub.f32 1.0, %v4196_v18 }
0x1568   :  { %5280 = vtanh.f32 %v4252_v8 }
0x1569   :  { %2771 = vadd.xlane.f32.xlu2 %v2770_v9 }
0x156d   :  { %v5279_v24 = vpop.eup %5278 }
0x156e   :  { %4269 = vrot.lane.b32.xlu0 %v5279_v24, %s5400_s21  ;;  %v5281_v33 = vpop.eup %5280 }
0x1576   :  { %4271 = vrot.lane.b32.xlu0 %v5281_v33, %s5400_s21  ;;  %v4260_v33 = vsub.f32 1.0, %v7542_v4 }
0x158f   :  { %v7575_v54 = vpop.xlane.xlu1 %2765 }
0x159a   :  { %v4266_v53 = vpop.permute.xlu2 %4265 }
0x159b   :  { %v4277_v39 = vmul.f32 %v4266_v53, %v4257_v35  ;;  %v4284_v35 = vmul.f32 %v7542_v4, %v7360_v5  ;;  %v3793_v4 = vsel %vm32_vm0, %v7495_v28, 0.0 }
0x159d   :  { %v7568_v63 = vadd.f32 %v4281_v2, %v4277_v39 }
0x159f   :  { %v4289_v38 = vmul.f32 %v7568_v63, %v7157_v30 }
0x15a0   :  { %2768 = vadd.xlane.f32.xlu0 %v2767_v32  ;;  %v3796_v32 = vsel %vm32_vm0, %v7532_v16, 0.0  ;;  %v4896_v16 = vld [vmem:[%s7804_s4 + $0x8] ss:$0 sm:$0xff] }
0x15a1   :  { %4297 = vrot.lane.b32.xlu2 %v4289_v38, %s5400_s21 }
0x15af   :  { %v4268_v37 = vpop.permute.xlu1 %4267 }
0x15b0   :  { %v4278_v62 = vmul.f32 %v4268_v37, %v4258_v12 }
0x15b2   :  { %v7580_v20 = vadd.f32 %v4282_v52, %v4278_v62 }
0x15b4   :  { %v4290_v34 = vmul.f32 %v7580_v20, %v7157_v30 }
0x15b6   :  { %4299 = vrot.lane.b32.xlu1 %v4290_v34, %s5400_s21 }
0x15ca   :  { %3284 = vadd.xlane.f32.xlu2 %v3283_v31 }
0x15da   :  { %v3279_v37 = vpop.xlane.xlu1 %3278 }
0x15dc   :  { %v7609_v39 = vpop.xlane.xlu2 %2771 }
0x15e0   :  { %v4270_v9 = vpop.permute.xlu0 %4269  ;;  %3287 = vadd.xlane.f32.xlu1 %v3286_v40 }
0x15e1   :  { %v4279_v61 = vmul.f32 %v4270_v9, %v4259_v22  ;;  %v4321_v9 = vmax.f32 %v7317_v26, %v7517_v47 }
0x15e3   :  { %v7592_v8 = vadd.f32 %v4283_v27, %v4279_v61  ;;  %v4325_v27 = vmax.f32 %v4321_v9, %v7519_v13 }
0x15e5   :  { %v4291_v24 = vmul.f32 %v7592_v8, %v7157_v30 }
0x15e7   :  { %4301 = vrot.lane.b32.xlu0 %v4291_v24, %s5400_s21 }
0x15e8   :  { %3800 = vadd.xlane.f32.xlu1 %v3799_v23  ;;  %v4272_v48 = vpop.permute.xlu0 %4271  ;;  %v4329_v23 = vmax.f32 %v4325_v27, %v7509_v58 }
0x15e9   :  { %v4280_v53 = vmul.f32 %v4272_v48, %v4260_v33 }
0x15ea   :  { %v4333_v33 = vmax.f32 %v4329_v23, %v7551_v1 }
0x15eb   :  { %v7602_v18 = vadd.f32 %v4284_v35, %v4280_v53  ;;  %v4322_v53 = vmax.f32 %v7422_v60, %v7512_v10 }
0x15ec   :  { %v4337_v35 = vmax.f32 %v4333_v33, %v3279_v37 }
0x15ed   :  { %v4292_v2 = vmul.f32 %v7602_v18, %v7157_v30  ;;  %v3802_v30 = vsel %vm32_vm0, %v7515_v19, 0.0 }
0x15ef   :  { %4303 = vrot.lane.b32.xlu2 %v4292_v2, %s5400_s21 }
0x15fb   :  { %v4298_v38 = vpop.permute.xlu2 %4297 }
0x15fc   :  { %v4309_v12 = vsel %vm32_vm0, %v4298_v38, 0.0 }
0x1611   :  { %3281 = vadd.xlane.f32.xlu0 %v3280_v29 }
0x1613   :  { %v7626_v19 = vpop.xlane.xlu0 %2768 }
0x1618   :  { %3797 = vadd.xlane.f32.xlu2 %v3796_v32  ;;  %v4326_v32 = vmax.f32 %v4322_v53, %v7504_v25 }
0x1619   :  { %3794 = vadd.xlane.f32.xlu0 %v3793_v4 }
0x1620   :  { %4310 = vadd.xlane.f32.xlu2 %v4309_v12  ;;  %v4330_v12 = vmax.f32 %v4326_v32, %v7545_v15 }
0x1621   :  { %3803 = vadd.xlane.f32.xlu0 %v3802_v30 }
0x1628   :  { %v4300_v45 = vpop.permute.xlu1 %4299 }
0x1629   :  { %v4312_v52 = vsel %vm32_vm0, %v4300_v45, 0.0 }
0x162a   :  { %4313 = vadd.xlane.f32.xlu1 %v4312_v52 }
0x163d   :  { %v7622_v28 = vpop.xlane.xlu2 %3284 }
0x1643   :  { %4600 = vrot.lane.b32.xlu1 %v4896_v16, %s5398_s19 }
0x1649   :  { %v4304_v62 = vpop.permute.xlu2 %4303 }
0x164a   :  { %v4318_v34 = vsel %vm32_vm0, %v4304_v62, 0.0  ;;  %v4334_v62 = vmax.f32 %v4330_v12, %v7575_v54 }
0x164b   :  { %4319 = vadd.xlane.f32.xlu2 %v4318_v34 }
0x1653   :  { %v7634_v61 = vpop.xlane.xlu1 %3287 }
0x1659   :  { %v4302_v31 = vpop.permute.xlu0 %4301 }
0x165a   :  { %v4315_v40 = vsel %vm32_vm0, %v4302_v31, 0.0 }
0x165b   :  { %4316 = vadd.xlane.f32.xlu0 %v4315_v40  ;;  %v7643_v38 = vpop.xlane.xlu1 %3800 }
0x1684   :  { %v7629_v22 = vpop.xlane.xlu0 %3281 }
0x1685   :  { %v4338_v27 = vmax.f32 %v4334_v62, %v7629_v22 }
0x168b   :  { %v7636_v24 = vpop.xlane.xlu2 %3797 }
0x168c   :  { %v3795_v48 = vpop.xlane.xlu0 %3794 }
0x168d   :  { %v4341_v2 = vmax.f32 %v4337_v35, %v3795_v48 }
0x1693   :  { %v4311_v29 = vpop.xlane.xlu2 %4310 }
0x1694   :  { %v4345_v4 = vmax.f32 %v4341_v2, %v4311_v29 }
0x1696   :  { %v4349_v30 = vsub.f32 %v7317_v26, %v4345_v4  ;;  %v4361_v45 = vsub.f32 %v7517_v47, %v4345_v4  ;;  %v4373_v52 = vsub.f32 %v7519_v13, %v4345_v4  ;;  %v4385_v16 = vsub.f32 %v7509_v58, %v4345_v4 }
0x1697   :  { %v4397_v9 = vsub.f32 %v7551_v1, %v4345_v4  ;;  %v4409_v23 = vsub.f32 %v3279_v37, %v4345_v4  ;;  %v4421_v26 = vsub.f32 %v3795_v48, %v4345_v4  ;;  %v4342_v47 = vmax.f32 %v4338_v27, %v7636_v24 }
0x1698   :  { %v4353_v34 = vmul.f32 1.442695, %v4349_v30  ;;  %v4365_v31 = vmul.f32 1.442695, %v4361_v45  ;;  %v4377_v40 = vmul.f32 1.442695, %v4373_v52  ;;  %v4433_v35 = vsub.f32 %v4311_v29, %v4345_v4 }
0x1699   :  { %v4389_v33 = vmul.f32 1.442695, %v4385_v16  ;;  %v4401_v13 = vmul.f32 1.442695, %v4397_v9  ;;  %v4413_v53 = vmul.f32 1.442695, %v4409_v23 }
0x169a   :  { %5282 = vpow2.f32 %v4353_v34  ;;  %v4425_v32 = vmul.f32 1.442695, %v4421_v26  ;;  %v4437_v48 = vmul.f32 1.442695, %v4433_v35 }
0x169b   :  { %5284 = vpow2.f32 %v4365_v31 }
0x169c   :  { %5286 = vpow2.f32 %v4377_v40 }
0x169d   :  { %v4314_v58 = vpop.xlane.xlu1 %4313  ;;  %5288 = vpow2.f32 %v4389_v33 }
0x169e   :  { %v4346_v2 = vmax.f32 %v4342_v47, %v4314_v58  ;;  %5290 = vpow2.f32 %v4401_v13  ;;  %v7848_v47 = vld [vmem:[#allocation2_spill] sm:$0xff] }
0x169f   :  { %5292 = vpow2.f32 %v4413_v53 }
0x16a0   :  { %v5283_v12 = vpop.eup %5282  ;;  %v4350_v1 = vsub.f32 %v7422_v60, %v4346_v2  ;;  %v4362_v30 = vsub.f32 %v7512_v10, %v4346_v2  ;;  %v4374_v37 = vsub.f32 %v7504_v25, %v4346_v2  ;;  %v4386_v52 = vsub.f32 %v7545_v15, %v4346_v2 }
0x16a1   :  { %v5285_v45 = vpop.eup %5284  ;;  %5294 = vpow2.f32 %v4425_v32  ;;  %v4398_v31 = vsub.f32 %v7575_v54, %v4346_v2  ;;  %v4410_v25 = vsub.f32 %v7629_v22, %v4346_v2  ;;  %v4422_v23 = vsub.f32 %v7636_v24, %v4346_v2 }
0x16a2   :  { %v4445_v16 = vadd.f32 %v5285_v45, %v5283_v12  ;;  %v4355_v29 = vmul.f32 1.442695, %v4350_v1  ;;  %v4367_v4 = vmul.f32 1.442695, %v4362_v30  ;;  %v5287_v62 = vpop.eup %5286  ;;  %v4379_v34 = vmul.f32 1.442695, %v4374_v37 }
0x16a3   :  { %v5289_v60 = vpop.eup %5288  ;;  %v4391_v10 = vmul.f32 1.442695, %v4386_v52  ;;  %v4403_v15 = vmul.f32 1.442695, %v4398_v31  ;;  %v4473_v13 = vmul.f32 %v5283_v12, %v7848_v47  ;;  %v4477_v54 = vmul.f32 %v5285_v45, %v6116_v46 }
0x16a4   :  { %v4449_v40 = vadd.f32 %v5287_v62, %v4445_v16  ;;  %5296 = vpow2.f32 %v4355_v29  ;;  %v5291_v27 = vpop.eup %5290  ;;  %v4415_v53 = vmul.f32 1.442695, %v4410_v25  ;;  %v4434_v32 = vsub.f32 %v4314_v58, %v4346_v2  ;;  %v7849_v2 = vld [vmem:[#allocation3_spill] sm:$0xff] }
0x16a5   :  { %5298 = vpow2.f32 %v4367_v4  ;;  %v5293_v33 = vpop.eup %5292  ;;  %v4427_v37 = vmul.f32 1.442695, %v4422_v23  ;;  %v4481_v16 = vadd.f32 %v4477_v54, %v4473_v13  ;;  %v4485_v46 = vmul.f32 %v5287_v62, %v6372_v49 }
0x16a6   :  { %5300 = vpow2.f32 %v4437_v48  ;;  %v4453_v9 = vadd.f32 %v5289_v60, %v4449_v40  ;;  %v4439_v12 = vmul.f32 1.442695, %v4434_v32 }
0x16a7   :  { %5302 = vpow2.f32 %v4379_v34  ;;  %v7663_v35 = vpop.eup %5294 }
0x16a8   :  { %v4457_v26 = vadd.f32 %v5291_v27, %v4453_v9  ;;  %5304 = vpow2.f32 %v4391_v10  ;;  %v4489_v10 = vadd.f32 %v4485_v46, %v4481_v16  ;;  %v4324_v9 = vmax.f32 %v7446_v50, %v7537_v42 }
0x16a9   :  { %5306 = vpow2.f32 %v4403_v15  ;;  %v4493_v15 = vmul.f32 %v5289_v60, %v6581_v14 }
0x16aa   :  { %v5297_v1 = vpop.eup %5296  ;;  %v4461_v22 = vadd.f32 %v5293_v33, %v4457_v26  ;;  %5308 = vpow2.f32 %v4415_v53  ;;  %v4328_v54 = vmax.f32 %v4324_v9, %v7525_v51 }
0x16ab   :  { %v5299_v30 = vpop.eup %5298  ;;  %v4474_v4 = vmul.f32 %v5297_v1, %v7849_v2  ;;  %5310 = vpow2.f32 %v4427_v37 }
0x16ac   :  { %v7665_v48 = vpop.eup %5300  ;;  %v4465_v24 = vadd.f32 %v7663_v35, %v4461_v22  ;;  %v4446_v52 = vadd.f32 %v5299_v30, %v5297_v1  ;;  %v4478_v34 = vmul.f32 %v5299_v30, %v6130_v11  ;;  %v4497_v11 = vadd.f32 %v4493_v15, %v4489_v10 }
0x16ad   :  { %v5303_v29 = vpop.eup %5302  ;;  %v4501_v22 = vmul.f32 %v5291_v27, %v6833_v57  ;;  %v4332_v37 = vmax.f32 %v4328_v54, %v7587_v43  ;;  %v4509_v27 = vmul.f32 %v5293_v33, %v7029_v56  ;;  %v4517_v56 = vmul.f32 %v7663_v35, %v7327_v21 }
0x16ae   :  { %v7670_v45 = vadd.f32 %v7665_v48, %v4465_v24  ;;  %v4450_v58 = vadd.f32 %v5303_v29, %v4446_v52  ;;  %v5305_v31 = vpop.eup %5304  ;;  %v4482_v62 = vadd.f32 %v4478_v34, %v4474_v4  ;;  %v4486_v47 = vmul.f32 %v5303_v29, %v7846_v55 }
0x16af   :  { %v5307_v25 = vpop.eup %5306  ;;  %v4494_v55 = vmul.f32 %v5305_v31, %v6595_v41  ;;  %v4505_v60 = vadd.f32 %v4501_v22, %v4497_v11  ;;  %v4336_v52 = vmax.f32 %v4332_v37, %v7609_v39  ;;  %v4323_v29 = vmax.f32 %v7426_v36, %v7500_v44 }
0x16b0   :  { %5312 = vrcp.f32 %v7670_v45  ;;  %v4454_v40 = vadd.f32 %v5305_v31, %v4450_v58  ;;  %v5309_v23 = vpop.eup %5308  ;;  %v4490_v1 = vadd.f32 %v4486_v47, %v4482_v62  ;;  %v4502_v41 = vmul.f32 %v5307_v25, %v6847_v7 }
0x16b1   :  { %5314 = vpow2.f32 %v4439_v12  ;;  %v5311_v13 = vpop.eup %5310  ;;  %v7692_v12 = vpop.xlane.xlu0 %3803  ;;  %v4340_v46 = vmax.f32 %v4336_v52, %v7634_v61  ;;  %v4327_v2 = vmax.f32 %v4323_v29, %v7540_v3  ;;  %v4513_v4 = vadd.f32 %v4509_v27, %v4505_v60 }
0x16b2   :  { %v4458_v49 = vadd.f32 %v5307_v25, %v4454_v40  ;;  %v4498_v57 = vadd.f32 %v4494_v55, %v4490_v1  ;;  %v4544_v40 = vand.u32 2147483648, %v7670_v45  ;;  %vm4538_vm3 = vweird.f32 %v7670_v45 }
0x16b3   :  { %v4344_v34 = vmax.f32 %v4340_v46, %v7692_v12  ;;  %v4542_v33 = vand.u32 2147483647, %v7670_v45  ;;  %v4331_v62 = vmax.f32 %v4327_v2, %v7530_v0  ;;  %v4510_v15 = vmul.f32 %v5309_v23, %v7043_v17 }
0x16b4   :  { %v4462_v26 = vadd.f32 %v5309_v23, %v4458_v49  ;;  %v4506_v9 = vadd.f32 %v4502_v41, %v4498_v57  ;;  %v4545_v11 = vor.u32 1.1754944e-38, %v4544_v40  ;;  %v4525_v54 = vmul.f32 %v7665_v48, %v7568_v63 }
0x16b5   :  { %vm4543_vm5 = vcmp.eq.f32.partialorder %v4542_v33, 8.507059e+37  ;;  %v4518_v63 = vmul.f32 %v5311_v13, %v7358_v6 }
0x16b6   :  { %v5313_v53 = vpop.eup %5312  ;;  %v4466_v32 = vadd.f32 %v5311_v13, %v4462_v26  ;;  %v4521_v26 = vadd.f32 %v4517_v56, %v4513_v4  ;;  %v4514_v1 = vadd.f32 %v4510_v15, %v4506_v9  ;;  %v7853_v56 = vld [vmem:[#allocation7_spill] sm:$0xff] }
0x16b7   :  { %v7681_v30 = vpop.eup %5314  ;;  %v4534_v24 = vmul.f32 %v5313_v53, %v7670_v45  ;;  %vm4539_vm2 = vweird.f32 %v5313_v53 }
0x16b8   :  { %v7686_v14 = vadd.f32 %v7681_v30, %v4466_v32  ;;  %vm7708_vm4 = vmor %vm4538_vm3, %vm4539_vm2  ;;  %v4526_v6 = vmul.f32 %v7681_v30, %v7580_v20  ;;  %v7852_v30 = vld [vmem:[#allocation5_spill] sm:$0xff] }
0x16b9   :  { %v4535_v16 = vsub.f32 1.0, %v4534_v24  ;;  %v4529_v24 = vadd.f32 %v4525_v54, %v4521_v26  ;;  %v7854_v54 = vld [vmem:[#allocation10_spill] sm:$0xff] }
0x16ba   :  { %5316 = vrcp.f32 %v7686_v14  ;;  %v4557_v57 = vand.u32 2147483647, %v7686_v14  ;;  %vm4553_vm7 = vweird.f32 %v7686_v14 }
0x16bb   :  { %v4536_v58 = vmul.f32 %v5313_v53, %v4535_v16  ;;  %v4522_v16 = vadd.f32 %v4518_v63, %v4514_v1 }
0x16bc   :  { %vm4558_vm9 = vcmp.eq.f32.partialorder %v4557_v57, 8.507059e+37 }
0x16bd   :  { %v4537_v31 = vadd.f32 %v5313_v53, %v4536_v58 }
0x16be   :  { %v7701_v10 = vpop.xlane.xlu2 %4319 }
0x16bf   :  { %v4348_v49 = vmax.f32 %v4344_v34, %v7701_v10  ;;  %v4541_v47 = vsel %vm7708_vm4, %v5313_v53, %v4537_v31  ;;  %v4335_v53 = vmax.f32 %v4331_v62, %v7626_v19 }
0x16c0   :  { %v5317_v25 = vpop.eup %5316  ;;  %v4546_v23 = vsel %vm4543_vm5, %v4545_v11, %v4541_v47 }
0x16c1   :  { %v4352_v21 = vsub.f32 %v7446_v50, %v4348_v49  ;;  %v4364_v35 = vsub.f32 %v7537_v42, %v4348_v49  ;;  %v4376_v45 = vsub.f32 %v7525_v51, %v4348_v49  ;;  %v4388_v32 = vsub.f32 %v7587_v43, %v4348_v49  ;;  %v7725_v51 = vpop.permute.xlu1 %4600 }
0x16c2   :  { %v4549_v37 = vmul.f32 %v5317_v25, %v7686_v14  ;;  %v4400_v42 = vsub.f32 %v7609_v39, %v4348_v49  ;;  %v4559_v43 = vand.u32 2147483648, %v7686_v14  ;;  %v4412_v60 = vsub.f32 %v7634_v61, %v4348_v49 }
0x16c3   :  { %v4359_v22 = vmul.f32 1.442695, %v4352_v21  ;;  %v4371_v17 = vmul.f32 1.442695, %v4364_v35  ;;  %v4383_v50 = vmul.f32 1.442695, %v4376_v45  ;;  %v4593_v52 = vmul.f32 %v4546_v23, %v4529_v24 }
0x16c4   :  { %v4550_v48 = vsub.f32 1.0, %v4549_v37  ;;  %v4395_v55 = vmul.f32 1.442695, %v4388_v32  ;;  %vm4554_vm6 = vweird.f32 %v5317_v25  ;;  %v4407_v39 = vmul.f32 1.442695, %v4400_v42 }
0x16c5   :  { %5318 = vpow2.f32 %v4359_v22  ;;  %v4424_v27 = vsub.f32 %v7692_v12, %v4348_v49  ;;  %v4603_v46 = vmul.f32 %v7725_v51, %v4593_v52  ;;  %v4436_v13 = vsub.f32 %v7701_v10, %v4348_v49  ;;  %vm4555_vm8 = vmor %vm4553_vm7, %vm4554_vm6 }
0x16c6   :  { %5320 = vpow2.f32 %v4371_v17  ;;  %v4551_v29 = vmul.f32 %v5317_v25, %v4550_v48  ;;  %v4419_v61 = vmul.f32 1.442695, %v4412_v60  ;;  %v4560_v2 = vor.u32 1.1754944e-38, %v4559_v43  ;;  %v7855_v60 = vld [vmem:[#allocation12_spill] sm:$0xff] }
0x16c7   :  { %5322 = vpow2.f32 %v4383_v50  ;;  %4611 = vrot.lane.b32.xlu0 %v4603_v46, %s5400_s21  ;;  %v4339_v4 = vmax.f32 %v4335_v53, %v7622_v28  ;;  %v4530_v12 = vadd.f32 %v4526_v6, %v4522_v16  ;;  %v4431_v20 = vmul.f32 1.442695, %v4424_v27  ;;  %v7856_v27 = vld [vmem:[#allocation14_spill] sm:$0xff] }
0x16c8   :  { %v4552_v58 = vadd.f32 %v5317_v25, %v4551_v29  ;;  %5324 = vpow2.f32 %v4395_v55  ;;  %v4443_v9 = vmul.f32 1.442695, %v4436_v13 }
0x16c9   :  { %5326 = vpow2.f32 %v4407_v39  ;;  %v4343_v62 = vmax.f32 %v4339_v4, %v7643_v38 }
0x16ca   :  { %v4556_v34 = vsel %vm4555_vm8, %v5317_v25, %v4552_v58  ;;  %5328 = vpow2.f32 %v4419_v61 }
0x16cb   :  { %v5319_v41 = vpop.eup %5318  ;;  %v4561_v10 = vsel %vm4558_vm9, %v4560_v2, %v4556_v34  ;;  %5330 = vpow2.f32 %v4431_v20 }
0x16cc   :  { %v5321_v31 = vpop.eup %5320  ;;  %v4476_v40 = vmul.f32 %v5319_v41, %v7852_v30  ;;  %v4594_v49 = vmul.f32 %v4561_v10, %v4530_v12  ;;  %5332 = vpow2.f32 %v4443_v9 }
0x16cd   :  { %v4448_v14 = vadd.f32 %v5321_v31, %v5319_v41  ;;  %v4480_v33 = vmul.f32 %v5321_v31, %v7853_v56  ;;  %v5323_v7 = vpop.eup %5322  ;;  %v7857_v41 = vld [vmem:[#allocation16_spill] sm:$0xff] }
0x16ce   :  { %v4317_v15 = vpop.xlane.xlu0 %4316  ;;  %v4604_v25 = vmul.f32 %v7725_v51, %v4594_v49  ;;  %v5325_v47 = vpop.eup %5324  ;;  %v4488_v32 = vmul.f32 %v5323_v7, %v7854_v54  ;;  %v7858_v31 = vld [vmem:[#allocation4_spill] sm:$0xff] }
0x16cf   :  { %v4452_v26 = vadd.f32 %v5323_v7, %v4448_v14  ;;  %v4484_v21 = vadd.f32 %v4480_v33, %v4476_v40  ;;  %v4347_v35 = vmax.f32 %v4343_v62, %v4317_v15  ;;  %v5327_v11 = vpop.eup %5326  ;;  %v4496_v52 = vmul.f32 %v5325_v47, %v7855_v60 }
0x16d0   :  { %4613 = vrot.lane.b32.xlu2 %v4604_v25, %s5400_s21  ;;  %v5329_v53 = vpop.eup %5328 }
0x16d1   :  { %v4456_v45 = vadd.f32 %v5325_v47, %v4452_v26  ;;  %v4351_v1 = vsub.f32 %v7426_v36, %v4347_v35  ;;  %v4363_v22 = vsub.f32 %v7500_v44, %v4347_v35  ;;  %v4375_v17 = vsub.f32 %v7540_v3, %v4347_v35  ;;  %v5331_v55 = vpop.eup %5330 }
0x16d2   :  { %v4387_v37 = vsub.f32 %v7530_v0, %v4347_v35  ;;  %v4492_v50 = vadd.f32 %v4488_v32, %v4484_v21  ;;  %v4399_v43 = vsub.f32 %v7626_v19, %v4347_v35  ;;  %v5333_v16 = vpop.eup %5332  ;;  %v4411_v3 = vsub.f32 %v7622_v28, %v4347_v35 }
0x16d3   :  { %v4460_v23 = vadd.f32 %v5327_v11, %v4456_v45  ;;  %v4357_v42 = vmul.f32 1.442695, %v4351_v1  ;;  %v4369_v24 = vmul.f32 1.442695, %v4363_v22  ;;  %v4381_v48 = vmul.f32 1.442695, %v4375_v17 }
0x16d4   :  { %v4393_v36 = vmul.f32 1.442695, %v4387_v37  ;;  %v4500_v29 = vadd.f32 %v4496_v52, %v4492_v50  ;;  %v4405_v57 = vmul.f32 1.442695, %v4399_v43  ;;  %v4423_v39 = vsub.f32 %v7643_v38, %v4347_v35  ;;  %v7859_v38 = vld [vmem:[#allocation6_spill] sm:$0xff]  ;;  %v7861_v50 = vld [vmem:[#allocation11_spill] sm:$0xff] }
0x16d5   :  { %v4464_v63 = vadd.f32 %v5329_v53, %v4460_v23  ;;  %5334 = vpow2.f32 %v4357_v42  ;;  %v4504_v19 = vmul.f32 %v5327_v11, %v7856_v27  ;;  %v4417_v46 = vmul.f32 1.442695, %v4411_v3  ;;  %v7862_v52 = vld [vmem:[#allocation13_spill] sm:$0xff] }
0x16d6   :  { %5336 = vpow2.f32 %v4369_v24  ;;  %v4435_v6 = vsub.f32 %v4317_v15, %v4347_v35  ;;  %v4429_v2 = vmul.f32 1.442695, %v4423_v39  ;;  %v4512_v4 = vmul.f32 %v5329_v53, %v7857_v41  ;;  %v7860_v35 = vld [vmem:[#allocation9_spill] sm:$0xff] }
0x16d7   :  { %v4468_v44 = vadd.f32 %v5331_v55, %v4464_v63  ;;  %5338 = vpow2.f32 %v4381_v48  ;;  %v4508_v61 = vadd.f32 %v4504_v19, %v4500_v29  ;;  %v4520_v7 = vmul.f32 %v5331_v55, %v7360_v5 }
0x16d8   :  { %5340 = vpow2.f32 %v4393_v36  ;;  %v4441_v34 = vmul.f32 1.442695, %v4435_v6  ;;  %v4528_v17 = vmul.f32 %v5333_v16, %v7602_v18 }
0x16d9   :  { %v4472_v0 = vadd.f32 %v5333_v16, %v4468_v44  ;;  %v4516_v14 = vadd.f32 %v4512_v4, %v4508_v61  ;;  %v7863_v44 = vld [vmem:[#allocation15_spill] sm:$0xff] }
0x16db   :  { %5342 = vrcp.f32 %v4472_v0  ;;  %v5335_v13 = vpop.eup %5334  ;;  %v4524_v47 = vadd.f32 %v4520_v7, %v4516_v14  ;;  %v4589_v21 = vand.u32 2147483648, %v4472_v0  ;;  %v4587_v54 = vand.u32 2147483647, %v4472_v0 }
0x16dc   :  { %v5337_v58 = vpop.eup %5336  ;;  %5344 = vpow2.f32 %v4405_v57  ;;  %v4475_v20 = vmul.f32 %v5335_v13, %v7858_v31  ;;  %vm4583_vm11 = vweird.f32 %v4472_v0 }
0x16dd   :  { %v4447_v28 = vadd.f32 %v5337_v58, %v5335_v13  ;;  %v5339_v12 = vpop.eup %5338  ;;  %5346 = vpow2.f32 %v4417_v46  ;;  %v4479_v30 = vmul.f32 %v5337_v58, %v7859_v38  ;;  %v4590_v53 = vor.u32 1.1754944e-38, %v4589_v21 }
0x16de   :  { %v5341_v40 = vpop.eup %5340  ;;  %5348 = vpow2.f32 %v4429_v2  ;;  %v4487_v45 = vmul.f32 %v5339_v12, %v7860_v35  ;;  %v4532_v24 = vadd.f32 %v4528_v17, %v4524_v47  ;;  %vm4588_vm13 = vcmp.eq.f32.partialorder %v4587_v54, 8.507059e+37  ;;  %v5394_v35 = vld [vmem:[%s7801_s0] sm:$0xff]  ;;  %v5395_v54 = vld [vmem:[%s7801_s0 + $0x10] sm:$0xff] }
0x16df   :  { %v4451_v10 = vadd.f32 %v5339_v12, %v4447_v28  ;;  %5350 = vpow2.f32 %v4441_v34  ;;  %v4483_v62 = vadd.f32 %v4479_v30, %v4475_v20  ;;  %v4495_v42 = vmul.f32 %v5341_v40, %v7861_v50 }
0x16e1   :  { %v5343_v9 = vpop.eup %5342  ;;  %v4455_v33 = vadd.f32 %v5341_v40, %v4451_v10  ;;  %v4491_v22 = vadd.f32 %v4487_v45, %v4483_v62 }
0x16e2   :  { %v4579_v56 = vmul.f32 %v5343_v9, %v4472_v0  ;;  %v5345_v49 = vpop.eup %5344  ;;  %vm4584_vm10 = vweird.f32 %v5343_v9 }
0x16e3   :  { %v4459_v26 = vadd.f32 %v5345_v49, %v4455_v33  ;;  %v5347_v25 = vpop.eup %5346  ;;  %vm4585_vm12 = vmor %vm4583_vm11, %vm4584_vm10  ;;  %v4499_v55 = vadd.f32 %v4495_v42, %v4491_v22  ;;  %v4503_v36 = vmul.f32 %v5345_v49, %v7862_v52  ;;  %v5396_v22 = vld [vmem:[%s7801_s0 + $0x18] sm:$0xff] }
0x16e4   :  { %v4580_v15 = vsub.f32 1.0, %v4579_v56  ;;  %v5349_v1 = vpop.eup %5348  ;;  %v4511_v3 = vmul.f32 %v5347_v25, %v7863_v44 }
0x16e5   :  { %v4463_v32 = vadd.f32 %v5347_v25, %v4459_v26  ;;  %v5351_v37 = vpop.eup %5350  ;;  %v4507_v16 = vadd.f32 %v4503_v36, %v4499_v55  ;;  %v4519_v39 = vmul.f32 %v5349_v1, %v7369_v59  ;;  %v5393_v25 = vld [vmem:[%s7801_s0 + $0x8] sm:$0xff] }
0x16e6   :  { %v4581_v11 = vmul.f32 %v5343_v9, %v4580_v15  ;;  %v4527_v58 = vmul.f32 %v5351_v37, %v7592_v8 }
0x16e7   :  { %v4467_v5 = vadd.f32 %v5349_v1, %v4463_v32  ;;  %v4515_v0 = vadd.f32 %v4511_v3, %v4507_v16 }
0x16e8   :  { %v4582_v23 = vadd.f32 %v5343_v9, %v4581_v11 }
0x16e9   :  { %v4471_v48 = vadd.f32 %v5351_v37, %v4467_v5  ;;  %v4523_v46 = vadd.f32 %v4519_v39, %v4515_v0 }
0x16ea   :  { %v4586_v63 = vsel %vm4585_vm12, %v5343_v9, %v4582_v23 }
0x16eb   :  { %v4591_v43 = vsel %vm4588_vm13, %v4590_v53, %v4586_v63  ;;  %5352 = vrcp.f32 %v4471_v48  ;;  %v4574_v19 = vand.u32 2147483648, %v4471_v48  ;;  %v4572_v13 = vand.u32 2147483647, %v4471_v48 }
0x16ec   :  { %v4596_v60 = vmul.f32 %v4591_v43, %v4532_v24  ;;  %vm4568_vm15 = vweird.f32 %v4471_v48  ;;  %v4531_v41 = vadd.f32 %v4527_v58, %v4523_v46 }
0x16ed   :  { %v4575_v2 = vor.u32 1.1754944e-38, %v4574_v19  ;;  %vm4573_vm2 = vcmp.eq.f32.partialorder %v4572_v13, 8.507059e+37 }
0x16ee   :  { %v4606_v18 = vmul.f32 %v7725_v51, %v4596_v60 }
0x16f0   :  { %4617 = vrot.lane.b32.xlu1 %v4606_v18, %s5400_s21 }
0x16f1   :  { %v5353_v29 = vpop.eup %5352 }
0x16f2   :  { %v4564_v57 = vmul.f32 %v5353_v29, %v4471_v48  ;;  %vm4569_vm14 = vweird.f32 %v5353_v29 }
0x16f3   :  { %vm4570_vm1 = vmor %vm4568_vm15, %vm4569_vm14 }
0x16f4   :  { %v4565_v27 = vsub.f32 1.0, %v4564_v57 }
0x16f6   :  { %v4566_v6 = vmul.f32 %v5353_v29, %v4565_v27 }
0x16f8   :  { %v4567_v61 = vadd.f32 %v5353_v29, %v4566_v6 }
0x16fa   :  { %v4571_v4 = vsel %vm4570_vm1, %v5353_v29, %v4567_v61 }
0x16fb   :  { %v4576_v28 = vsel %vm4573_vm2, %v4575_v2, %v4571_v4 }
0x16fc   :  { %v4595_v12 = vmul.f32 %v4576_v28, %v4531_v41 }
0x16fe   :  { %v4605_v34 = vmul.f32 %v7725_v51, %v4595_v12  ;;  %v4897_v51 = vld [vmem:[%s7804_s4 + $0x10] ss:$0 sm:$0xff]  ;;  %s5402_s4 = smov 100  }
0x1700   :  { %4615 = vrot.lane.b32.xlu0 %v4605_v34, %s5400_s21  ;;  %s5401_s21 = smov 28  }
0x172a   :  { %v4614_v59 = vpop.permute.xlu2 %4613 }
0x172b   :  { %v4626_v31 = vsel %vm32_vm0, %v4614_v59, 0.0 }
0x172c   :  { %4627 = vadd.xlane.f32.xlu0 %v4626_v31 }
0x1739   :  { %v4612_v20 = vpop.permute.xlu0 %4611 }
0x173a   :  { %v4623_v8 = vsel %vm32_vm0, %v4612_v20, 0.0 }
0x173b   :  { %4624 = vadd.xlane.f32.xlu2 %v4623_v8 }
0x1762   :  { %v4618_v38 = vpop.permute.xlu1 %4617 }
0x1763   :  { %v4632_v30 = vsel %vm32_vm0, %v4618_v38, 0.0 }
0x1764   :  { %4633 = vadd.xlane.f32.xlu2 %v4632_v30 }
0x1772   :  { %v4616_v40 = vpop.permute.xlu0 %4615 }
0x1773   :  { %v4629_v10 = vsel %vm32_vm0, %v4616_v40, 0.0  ;;  %vm4677_vm0 = vcmask 7168  }
0x1774   :  { %4630 = vadd.xlane.f32.xlu1 %v4629_v10 }
0x179f   :  { %v4628_v9 = vpop.xlane.xlu0 %4627 }
0x17a0   :  { %v4638_v14 = vadd.f32 %v4897_v51, %v4628_v9 }
0x17a2   :  { %4647 = vrot.lane.b32.xlu1 %v4638_v14, %s5401_s21 }
0x17ae   :  { %v4625_v56 = vpop.xlane.xlu2 %4624 }
0x17af   :  { %v4637_v33 = vadd.f32 %v4897_v51, %v4625_v56 }
0x17b1   :  { %4645 = vrot.lane.b32.xlu0 %v4637_v33, %s5401_s21 }
0x17d7   :  { %v4634_v49 = vpop.xlane.xlu2 %4633 }
0x17d8   :  { %v4640_v7 = vadd.f32 %v4897_v51, %v4634_v49 }
0x17da   :  { %4651 = vrot.lane.b32.xlu0 %v4640_v7, %s5401_s21 }
0x17e7   :  { %v4631_v62 = vpop.xlane.xlu1 %4630 }
0x17e8   :  { %v4639_v15 = vadd.f32 %v4897_v51, %v4631_v62 }
0x17ea   :  { %4649 = vrot.lane.b32.xlu2 %v4639_v15, %s5401_s21 }
0x1814   :  { %v4648_v26 = vpop.permute.xlu1 %4647 }
0x1815   :  { %v4658_v47 = vadd.f32 %v5393_v25, %v4648_v26 }
0x1817   :  { %4667 = vrot.lane.b32.xlu0 %v4658_v47, %s5402_s4 }
0x1823   :  { %v4646_v21 = vpop.permute.xlu0 %4645 }
0x1824   :  { %v4657_v45 = vadd.f32 %v5394_v35, %v4646_v21 }
0x1826   :  { %4665 = vrot.lane.b32.xlu1 %v4657_v45, %s5402_s4 }
0x1844   :  { %v4650_v11 = vpop.permute.xlu2 %4649 }
0x1845   :  { %v4659_v32 = vadd.f32 %v5395_v54, %v4650_v11 }
0x1847   :  { %4669 = vrot.lane.b32.xlu2 %v4659_v32, %s5402_s4 }
0x184c   :  { %v4652_v1 = vpop.permute.xlu0 %4651 }
0x184d   :  { %v4660_v17 = vadd.f32 %v5396_v22, %v4652_v1 }
0x184f   :  { %4671 = vrot.lane.b32.xlu1 %v4660_v17, %s5402_s4 }
0x1889   :  { %v4668_v23 = vpop.permute.xlu0 %4667 }
0x188a   :  { %4679 = vst.msk [vmem:[%s7805_s5 + $0x8] sm:$0xff] %vm4677_vm0, %v4668_v23 }
0x1898   :  { %v4666_v5 = vpop.permute.xlu1 %4665 }
0x1899   :  { %4678 = vst.msk [vmem:[%s7805_s5] sm:$0xff] %vm4677_vm0, %v4666_v5 }
0x18a1   :  { %v4670_v37 = vpop.permute.xlu2 %4669 }
0x18a2   :  { %4680 = vst.msk [vmem:[%s7805_s5 + $0x10] sm:$0xff] %vm4677_vm0, %v4670_v37 }
0x18c1   :  { %v4672_v53 = vpop.permute.xlu1 %4671 }
0x18c2   :  { %4681 = vst.msk [vmem:[%s7805_s5 + $0x18] sm:$0xff] %vm4677_vm0, %v4672_v53 }

</bundles_post_ra>
